<compile_context>
chip_gen: v7x
topology: tpu7x:2x2x1
jax: 0.10.0
libtpu: 0.0.40
codegen_flags: <defaults>
</compile_context>

<pallas_src>
import jax
import jax.numpy as jnp
from jax import lax
from jax.experimental import pallas as pl
from jax.experimental.pallas import tpu as pltpu

LANE = 128
BP = 8  # per-step batch rows padded to 8 sublanes (lane/sublane-dense epilogue)


# ---------------------------------------------------------------------------
# Fused kernel: q_sample -> conv3x3 (one matmul) -> bias/ReLU -> MXU pool -> fc
# One grid step == B images (rows stacked into a single matmul LHS).
# ---------------------------------------------------------------------------
def _fused_kernel(coef_ref,              # SMEM (2,): [sqrt_ab, sqrt_1m_ab]
                  xp_ref, np_ref,        # (B*HW, KIN_PAD) im2col of x / noise
                  w_ref,                 # (KIN_PAD, COUT_PAD) packed conv weight
                  b_ref,                 # (1, COUT_PAD) conv bias
                  pool_ref,              # (BP, B*HW) block-diag mean-pool matrix
                  fcw_ref,               # (COUT_PAD, K_PAD) classifier weight
                  fcb_ref,               # (1, K_PAD) classifier bias
                  out_ref):              # (1, BP, K_PAD) logits (lane-dense)
    sqrt_ab = coef_ref[0]
    sqrt_1m_ab = coef_ref[1]

    # --- q_sample fused into the lane-dense im2col operands (zero halo stays
    #     zero == SAME padding) ------------------------------------------------
    xt = sqrt_ab * xp_ref[...] + sqrt_1m_ab * np_ref[...]        # (M, KIN_PAD)

    # --- 3x3 conv as ONE MXU matmul over the packed 9*C contraction axis ------
    y = jnp.dot(xt, w_ref[...],
                preferred_element_type=jnp.float32,
                precision=lax.Precision.HIGHEST)                  # (M, COUT_PAD)
    y = jnp.maximum(y + b_ref[...], 0.0)

    # --- global average pool on the MXU (per-image block mask * 1/(H*W)) ------
    pooled = jnp.dot(pool_ref[...], y,
                     preferred_element_type=jnp.float32,
                     precision=lax.Precision.HIGHEST)             # (BP, COUT_PAD)

    # --- classifier (padded lanes are zero rows/cols -> no effect) ------------
    logits = jnp.dot(pooled, fcw_ref[...],
                     preferred_element_type=jnp.float32,
                     precision=lax.Precision.HIGHEST) + fcb_ref[...]
    out_ref[0] = logits                                           # (BP, K_PAD)


# ---------------------------------------------------------------------------
# Wrapper: NCHW in, logits out.  Only cheap layout glue lives outside the
# kernel (transpose, im2col, 128-lane zero padding of weights/outputs).
# ---------------------------------------------------------------------------
def attack_realcode_forward(x_nchw, noise_nchw, sqrt_ab, sqrt_1m_ab,
                            conv_w, conv_b, fc_w, fc_b):
    N, C, H, W = x_nchw.shape
    Cout = conv_w.shape[0]
    K = fc_w.shape[1]
    HW = H * W
    KIN = 9 * C
    KIN_PAD = ((KIN + LANE - 1) // LANE) * LANE
    COUT_PAD = ((Cout + LANE - 1) // LANE) * LANE
    K_PAD = ((K + LANE - 1) // LANE) * LANE

    # Batch B images per grid step; keep grid length even when possible (v7x
    # has 2 TensorCores), cap B so the per-step LHS stays comfortably in VMEM.
    B = min(8, max(1, N // 2))
    G = -(-N // B)                 # cdiv
    N_pad = G * B
    M = B * HW

    def im2col(a_nchw):
        a = jnp.transpose(a_nchw, (0, 2, 3, 1)).astype(jnp.float32)   # NHWC
        if N_pad != N:
            a = jnp.pad(a, ((0, N_pad - N), (0, 0), (0, 0), (0, 0)))
        ap = jnp.pad(a, ((0, 0), (1, 1), (1, 1), (0, 0)))             # SAME halo
        taps = [ap[:, kh:kh + H, kw:kw + W, :]
                for kh in range(3) for kw in range(3)]
        p = jnp.stack(taps, axis=3).reshape(N_pad, HW, KIN)           # (kh,kw,cin)
        p = jnp.pad(p, ((0, 0), (0, 0), (0, KIN_PAD - KIN)))          # lane pad
        return p.reshape(N_pad * HW, KIN_PAD)

    xp = im2col(x_nchw)
    np_ = im2col(noise_nchw)

    # conv weight OIHW -> (kh, kw, Cin, Cout) -> (9C, Cout), zero-pad to 128x128
    w_mat = jnp.transpose(conv_w, (2, 3, 1, 0)).reshape(KIN, Cout).astype(jnp.float32)
    w_mat = jnp.pad(w_mat, ((0, KIN_PAD - KIN), (0, COUT_PAD - Cout)))
    b_mat = jnp.pad(conv_b.reshape(1, Cout).astype(jnp.float32),
                    ((0, 0), (0, COUT_PAD - Cout)))

    # block-diagonal mean-pool matrix (BP, B*HW): row b averages image b's rows
    rows = jnp.arange(M, dtype=jnp.int32) // HW                       # (M,)
    pool = (rows[None, :] == jnp.arange(BP, dtype=jnp.int32)[:, None])
    pool = pool.astype(jnp.float32) * (1.0 / float(HW))               # (BP, M)

    fcw = jnp.pad(fc_w.astype(jnp.float32),
                  ((0, COUT_PAD - Cout), (0, K_PAD - K)))
    fcb = jnp.pad(fc_b.reshape(1, K).astype(jnp.float32),
                  ((0, 0), (0, K_PAD - K)))

    coef = jnp.array([sqrt_ab, sqrt_1m_ab], dtype=jnp.float32)

    out = pl.pallas_call(
        _fused_kernel,
        out_shape=jax.ShapeDtypeStruct((G, BP, K_PAD), jnp.float32),
        grid_spec=pltpu.PrefetchScalarGridSpec(
            num_scalar_prefetch=0,
            grid=(G,),
            in_specs=[
                pl.BlockSpec(memory_space=pltpu.MemorySpace.SMEM),      # coef
                pl.BlockSpec((M, KIN_PAD), lambda i: (i, 0)),           # x patches
                pl.BlockSpec((M, KIN_PAD), lambda i: (i, 0)),           # noise patches
                pl.BlockSpec((KIN_PAD, COUT_PAD), lambda i: (0, 0)),    # conv weight
                pl.BlockSpec((1, COUT_PAD), lambda i: (0, 0)),          # conv bias
                pl.BlockSpec((BP, M), lambda i: (0, 0)),                # pool matrix
                pl.BlockSpec((COUT_PAD, K_PAD), lambda i: (0, 0)),      # fc weight
                pl.BlockSpec((1, K_PAD), lambda i: (0, 0)),             # fc bias
            ],
            out_specs=pl.BlockSpec((1, BP, K_PAD), lambda i: (i, 0, 0)),
        ),
        compiler_params=pltpu.CompilerParams(
            dimension_semantics=("parallel",),       # v7x: shard batch over 2 TCs
        ),
    )(coef, xp, np_, w_mat, b_mat, pool, fcw, fcb)

    # drop padded batch rows / padded lanes
    out = out[:, :B, :].reshape(N_pad, K_PAD)[:N, :K]
    return out


# ---------------------------------------------------------------------------
# Pure-JAX reference (NCHW, mirrors the PyTorch semantics) for verification
# ---------------------------------------------------------------------------
def reference_forward(x_nchw, noise_nchw, sqrt_ab, sqrt_1m_ab,
                      conv_w, conv_b, fc_w, fc_b):
    x_t = sqrt_ab * x_nchw + sqrt_1m_ab * noise_nchw
    y = lax.conv_general_dilated(
        x_t, conv_w, window_strides=(1, 1), padding="SAME",
        dimension_numbers=("NCHW", "OIHW", "NCHW"),
        precision=lax.Precision.HIGHEST)
    y = jnp.maximum(y + conv_b[None, :, None, None], 0.0)
    pooled = y.mean(axis=(2, 3))
    return jnp.dot(pooled, fc_w, precision=lax.Precision.HIGHEST) + fc_b


if __name__ == "__main__":
    # small shapes consistent with the module: x is an NCHW image batch
    N, C, H, W = 2, 4, 16, 16
    NUM_CLASSES = 10
    T, t = 10, 3   # diffusion timesteps / fixed self.t

    key = jax.random.PRNGKey(0)
    k_x, k_noise, k_cw, k_cb, k_fw, k_fb = jax.random.split(key, 6)

    x = jax.random.normal(k_x, (N, C, H, W), dtype=jnp.float32)
    noise = jax.random.normal(k_noise, (N, C, H, W), dtype=jnp.float32)

    # diffusion schedule (linear betas) -> q_sample coefficients at step t
    betas = jnp.linspace(1e-4, 2e-2, T, dtype=jnp.float32)
    alphas_cumprod = jnp.cumprod(1.0 - betas)
    sqrt_ab = float(jnp.sqrt(alphas_cumprod[t]))
    sqrt_1m_ab = float(jnp.sqrt(1.0 - alphas_cumprod[t]))

    # deterministic parameter init ("model" conv + "classifier" linear)
    conv_w = 0.1 * jax.random.normal(k_cw, (C, C, 3, 3), dtype=jnp.float32)  # OIHW
    conv_b = 0.1 * jax.random.normal(k_cb, (C,), dtype=jnp.float32)
    fc_w = 0.1 * jax.random.normal(k_fw, (C, NUM_CLASSES), dtype=jnp.float32)
    fc_b = 0.1 * jax.random.normal(k_fb, (NUM_CLASSES,), dtype=jnp.float32)

    out = attack_realcode_forward(x, noise, sqrt_ab, sqrt_1m_ab,
                                  conv_w, conv_b, fc_w, fc_b)
    out = jax.block_until_ready(out)

    ref = reference_forward(x, noise, sqrt_ab, sqrt_1m_ab,
                            conv_w, conv_b, fc_w, fc_b)
    assert out.shape == (N, NUM_CLASSES)
    assert jnp.allclose(out, ref, rtol=1e-4, atol=1e-4), "mismatch vs reference"

    # TODO(synk): attack_method_v1 is an empty stub in the reference module; nothing to port.
    print("KERNEL_OK")
</pallas_src>

<mosaic_0001>
module attributes {stable_mosaic.version = 11 : i64} {
  func.func @_fused_kernel(%arg0: i32, %arg1: memref<2xf32, #tpu.memory_space<smem>>, %arg2: memref<256x128xf32, #tpu.memory_space<vmem>>, %arg3: memref<256x128xf32, #tpu.memory_space<vmem>>, %arg4: memref<128x128xf32, #tpu.memory_space<vmem>>, %arg5: memref<1x128xf32, #tpu.memory_space<vmem>>, %arg6: memref<8x256xf32, #tpu.memory_space<vmem>>, %arg7: memref<128x128xf32, #tpu.memory_space<vmem>>, %arg8: memref<1x128xf32, #tpu.memory_space<vmem>>, %arg9: memref<1x8x128xf32, #tpu.memory_space<vmem>>) attributes {dimension_semantics = [#tpu.dimension_semantics<parallel>], iteration_bounds = array<i64: 2>, scalar_prefetch = 0 : i64, scratch_operands = 0 : i64, tpu.core_type = #tpu.core_type<tc>, window_params = [{transform_indices = @transform_0, window_bounds = array<i64: 2>}, {transform_indices = @transform_1, window_bounds = array<i64: 256, 128>}, {transform_indices = @transform_2, window_bounds = array<i64: 256, 128>}, {pipeline_mode = #tpu.pipeline_mode<synchronous>, transform_indices = @transform_3, window_bounds = array<i64: 128, 128>}, {pipeline_mode = #tpu.pipeline_mode<synchronous>, transform_indices = @transform_4, window_bounds = array<i64: 1, 128>}, {pipeline_mode = #tpu.pipeline_mode<synchronous>, transform_indices = @transform_5, window_bounds = array<i64: 8, 256>}, {pipeline_mode = #tpu.pipeline_mode<synchronous>, transform_indices = @transform_6, window_bounds = array<i64: 128, 128>}, {pipeline_mode = #tpu.pipeline_mode<synchronous>, transform_indices = @transform_7, window_bounds = array<i64: 1, 128>}, {transform_indices = @transform_8, window_bounds = array<i64: 1, 8, 128>}]} {
    %c0 = arith.constant 0 : index
    %0 = memref.load %arg1[%c0] : memref<2xf32, #tpu.memory_space<smem>>
    %c1 = arith.constant 1 : index
    %1 = memref.load %arg1[%c1] : memref<2xf32, #tpu.memory_space<smem>>
    %c0_0 = arith.constant 0 : index
    %c0_1 = arith.constant 0 : index
    %2 = vector.load %arg2[%c0_0, %c0_1] : memref<256x128xf32, #tpu.memory_space<vmem>>, vector<256x128xf32>
    %3 = vector.broadcast %0 : f32 to vector<256x128xf32>
    %4 = arith.mulf %3, %2 : vector<256x128xf32>
    %c0_2 = arith.constant 0 : index
    %c0_3 = arith.constant 0 : index
    %5 = vector.load %arg3[%c0_2, %c0_3] : memref<256x128xf32, #tpu.memory_space<vmem>>, vector<256x128xf32>
    %6 = vector.broadcast %1 : f32 to vector<256x128xf32>
    %7 = arith.mulf %6, %5 : vector<256x128xf32>
    %8 = arith.addf %4, %7 : vector<256x128xf32>
    %c0_4 = arith.constant 0 : index
    %c0_5 = arith.constant 0 : index
    %9 = vector.load %arg4[%c0_4, %c0_5] : memref<128x128xf32, #tpu.memory_space<vmem>>, vector<128x128xf32>
    %cst = arith.constant dense<0.000000e+00> : vector<256x128xf32>
    %10 = tpu.matmul %8, %9, %cst {dimension_numbers = #tpu.dot_dimension_numbers<[1], [0], [0], [1], [0, 0, 1, 1], [], []>, precision = #tpu.contract_precision<fp32>} : vector<256x128xf32>, vector<128x128xf32>, vector<256x128xf32> -> vector<256x128xf32>
    %c0_6 = arith.constant 0 : index
    %c0_7 = arith.constant 0 : index
    %11 = vector.load %arg5[%c0_6, %c0_7] : memref<1x128xf32, #tpu.memory_space<vmem>>, vector<1x128xf32>
    %12 = vector.broadcast %11 : vector<1x128xf32> to vector<256x128xf32>
    %13 = arith.addf %10, %12 : vector<256x128xf32>
    %cst_8 = arith.constant 0.000000e+00 : f32
    %14 = vector.broadcast %cst_8 : f32 to vector<256x128xf32>
    %15 = arith.maximumf %13, %14 : vector<256x128xf32>
    %c0_9 = arith.constant 0 : index
    %c0_10 = arith.constant 0 : index
    %16 = vector.load %arg6[%c0_9, %c0_10] : memref<8x256xf32, #tpu.memory_space<vmem>>, vector<8x256xf32>
    %cst_11 = arith.constant dense<0.000000e+00> : vector<8x128xf32>
    %17 = tpu.matmul %16, %15, %cst_11 {dimension_numbers = #tpu.dot_dimension_numbers<[1], [0], [0], [1], [0, 0, 1, 1], [], []>, precision = #tpu.contract_precision<fp32>} : vector<8x256xf32>, vector<256x128xf32>, vector<8x128xf32> -> vector<8x128xf32>
    %c0_12 = arith.constant 0 : index
    %c0_13 = arith.constant 0 : index
    %18 = vector.load %arg7[%c0_12, %c0_13] : memref<128x128xf32, #tpu.memory_space<vmem>>, vector<128x128xf32>
    %cst_14 = arith.constant dense<0.000000e+00> : vector<8x128xf32>
    %19 = tpu.matmul %17, %18, %cst_14 {dimension_numbers = #tpu.dot_dimension_numbers<[1], [0], [0], [1], [0, 0, 1, 1], [], []>, precision = #tpu.contract_precision<fp32>} : vector<8x128xf32>, vector<128x128xf32>, vector<8x128xf32> -> vector<8x128xf32>
    %c0_15 = arith.constant 0 : index
    %c0_16 = arith.constant 0 : index
    %20 = vector.load %arg8[%c0_15, %c0_16] : memref<1x128xf32, #tpu.memory_space<vmem>>, vector<1x128xf32>
    %21 = vector.broadcast %20 : vector<1x128xf32> to vector<8x128xf32>
    %22 = arith.addf %19, %21 : vector<8x128xf32>
    %c0_17 = arith.constant 0 : index
    %c0_18 = arith.constant 0 : index
    %c0_19 = arith.constant 0 : index
    %23 = vector.load %arg9[%c0_17, %c0_18, %c0_19] : memref<1x8x128xf32, #tpu.memory_space<vmem>>, vector<1x8x128xf32>
    %24 = vector.shape_cast %23 : vector<1x8x128xf32> to vector<8x128xf32>
    %25 = vector.shape_cast %22 : vector<8x128xf32> to vector<1x8x128xf32>
    tpu.vector_store %arg9[%c0_17, %c0_18, %c0_19], %25 {strides = array<i32>} : memref<1x8x128xf32, #tpu.memory_space<vmem>>, vector<1x8x128xf32>,
    return
  }
  func.func @transform_0(%arg0: i32) -> i32 {
    %c0_i32 = arith.constant 0 : i32
    %c0_i32_0 = arith.constant 0 : i32
    return %c0_i32 : i32
  }
  func.func @transform_1(%arg0: i32) -> (i32, i32) {
    %c0_i32 = arith.constant 0 : i32
    %c0_i32_0 = arith.constant 0 : i32
    return %arg0, %c0_i32 : i32, i32
  }
  func.func @transform_2(%arg0: i32) -> (i32, i32) {
    %c0_i32 = arith.constant 0 : i32
    %c0_i32_0 = arith.constant 0 : i32
    return %arg0, %c0_i32 : i32, i32
  }
  func.func @transform_3(%arg0: i32) -> (i32, i32) {
    %c0_i32 = arith.constant 0 : i32
    %c0_i32_0 = arith.constant 0 : i32
    %c0_i32_1 = arith.constant 0 : i32
    return %c0_i32, %c0_i32_0 : i32, i32
  }
  func.func @transform_4(%arg0: i32) -> (i32, i32) {
    %c0_i32 = arith.constant 0 : i32
    %c0_i32_0 = arith.constant 0 : i32
    %c0_i32_1 = arith.constant 0 : i32
    return %c0_i32, %c0_i32_0 : i32, i32
  }
  func.func @transform_5(%arg0: i32) -> (i32, i32) {
    %c0_i32 = arith.constant 0 : i32
    %c0_i32_0 = arith.constant 0 : i32
    %c0_i32_1 = arith.constant 0 : i32
    return %c0_i32, %c0_i32_0 : i32, i32
  }
  func.func @transform_6(%arg0: i32) -> (i32, i32) {
    %c0_i32 = arith.constant 0 : i32
    %c0_i32_0 = arith.constant 0 : i32
    %c0_i32_1 = arith.constant 0 : i32
    return %c0_i32, %c0_i32_0 : i32, i32
  }
  func.func @transform_7(%arg0: i32) -> (i32, i32) {
    %c0_i32 = arith.constant 0 : i32
    %c0_i32_0 = arith.constant 0 : i32
    %c0_i32_1 = arith.constant 0 : i32
    return %c0_i32, %c0_i32_0 : i32, i32
  }
  func.func @transform_8(%arg0: i32) -> (i32, i32, i32) {
    %c0_i32 = arith.constant 0 : i32
    %c0_i32_0 = arith.constant 0 : i32
    %c0_i32_1 = arith.constant 0 : i32
    return %arg0, %c0_i32, %c0_i32_0 : i32, i32, i32
  }
}

</mosaic_0001>

<bundles_post_ra>
// kernel: tpu_custom_call.1
= control target key start
LH: loop header
LB: loop body
LE: loop exit
PB: predicated region body
PF: predicated region fallthrough
CT: control target
= control target key end

     0   :  { %s8778_s0 = inlined_call_operand.hbm [shape: f32[2], index: 0, kind: input, shape index: {}]   ;;  %s8779_s1 = inlined_call_operand.hbm [shape: f32[512,128], index: 1, kind: input, shape index: {}]   ;;  %s8780_s2 = inlined_call_operand.hbm [shape: f32[512,128], index: 2, kind: input, shape index: {}]   ;;  %s8781_s3 = inlined_call_operand.hbm [shape: f32[128,128], index: 3, kind: input, shape index: {}]   ;;  %s8782_s4 = inlined_call_operand.vmem [shape: f32[1,128], index: 4, kind: input, shape index: {}]   ;;  %s8783_s5 = inlined_call_operand.vmem [shape: f32[8,256], index: 5, kind: input, shape index: {}]   ;;  %s8784_s6 = inlined_call_operand.hbm [shape: f32[128,128], index: 6, kind: input, shape index: {}]   ;;  %s8785_s7 = inlined_call_operand.vmem [shape: f32[1,128], index: 7, kind: input, shape index: {}]   ;;  %s8786_s8 = inlined_call_operand.hbm [shape: f32[2,8,128], index: 8, kind: output, shape index: {}]  }
   0x1   :  { %9046 = sst [smem:[#allocation83_spill]] %s8778_s0 }
   0x2   :  { %9047 = sst [smem:[#allocation84_spill]] %s8779_s1 }
   0x3   :  { %9048 = sst [smem:[#allocation85_spill]] %s8781_s3 }
   0x4   :  { %9049 = sst [smem:[#allocation86_spill]] %s8784_s6 }
   0x5   :  { %13 = vsyncpa [#allocation5], 0 }
   0x6   :  { %14 = vsyncpa [#allocation3], 0 }
   0x7   :  { %16 = vsyncpa [#allocation3 + $0x1], 0 }
   0x8   :  { %17 = vsyncpa [#allocation8], 0 }
   0x9   :  { %19 = vsyncpa [#allocation8 + $0x1], 0 }
   0xa   :  { %20 = vsyncpa [#allocation11], 0 }
   0xb   :  { %21 = vsyncpa [#allocation4], 0 }
   0xc   :  { %23 = vsyncpa [#allocation4 + $0x1], 0  ;;  %s6672_s27 = smov 0   ;;  %s6674_s28 = smov 0  }
   0xd   :  { %s6676_s29 = smov 0   ;;  %s6678_s30 = smov 0  }
   0xe LB: > { %9050 = sst [smem:[#allocation19_spill]] %s6602_s27  ;;  %s6693_s9 = sadd.s32 4294967295, %s6614_s30   ;;  %s6614_s30 = sphi %s6678_s30, %s9400_s30   ;;  %s6610_s29 = sphi %s6676_s29, %s9399_s29   ;;  %s6606_s28 = sphi %s6674_s28, %s9398_s28   ;;  %s6602_s27 = sphi %s6672_s27, %s9397_s27  }
   0xf   : > { %s4267_s10 = sadd.s32 4294967294, %s6614_s30   ;;  %p70_p0 = scmp.ne.s32.totalorder %s6606_s28, %s6602_s27 }
  0x10   : > { %p8787_p1 = scmp.eq.s32.totalorder %s6693_s9, 0  ;;  %p231_p3 = scmp.eq.s32.totalorder %s4267_s10, 1 }
  0x11   : > { %p4268_p5 = scmp.ge.s32.totalorder %s6614_s30, 1  ;;  %p238_p7 = scmp.lt.s32.totalorder %s6614_s30, 3 }
  0x12   : > { %p6702_p4 = por %p8787_p1, %p70_p0  ;;  %p6707_p6 = por %p231_p3, %p70_p0 }
  0x13   : > { %p6712_p8 = pnand %p4268_p5, %p238_p7  ;;  %s6616_s14 = smov [#allocation9]  }
  0x14   : > { %s9051_s11 = scalar_select %p6702_p4, 1, 0 }
  0x15   : > { %s9052_s12 = scalar_select %p6707_p6, 1, 0 }
  0x16   : > { %s259_s15 = sshll.u32 %s6616_s14, 4  ;;  %p6334_p9 = pneg %p6712_p8  ;;  %s6716_s15 = int_to_ptr.vmem [resolvable:$true] %s259_s15 }
  0x17   : > { %9053 = sst [smem:[#allocation20_spill]] %s9052_s12  ;;  %s6617_s17 = smov [#allocation10]  }
  0x18   : > { %p6723_p11 = pnand %p6334_p9, %p8787_p1  ;;  %s278_s18 = sshll.u32 %s6617_s17, 4  ;;  %s6727_s18 = int_to_ptr.vmem [resolvable:$true] %s278_s18 }
  0x19   : > { %s9056_s3 = sld [smem:[#allocation85_spill]] }
  0x1a   : > { %p6737_p13 = pneg %p6723_p11 }
  0x1f   : > { %s6403_s21 = scalar_lea.hbm %s9056_s3, 2048 }
  0x20   : > { %p6404_p12 = scmp.ne.s32.totalorder %s9056_s3, %s6403_s21  ;;  %p6410_p5 = scmp.lt.u32.totalorder %s6403_s21, %s9056_s3 }
  0x22   : > { %p6406_p0 = pnand %p6737_p13, %p6404_p12 }
  0x24   : > { %p6407_p3 = pneg %p6406_p0 }
  0x26   : > { %p6412_p7 = pnand %p6410_p5, %p6407_p3 }
  0x28   : > { %6415 = shalt.err (!%p6412_p7)
}
  0x29   : > { %s6416_s10 = scalar_lea.vmem %s6716_s15, 2048  ;;  %p6424_p2 = scmp.lt.s32.totalorder %s6716_s15, %s6716_s15 }
  0x2a   : > { %p6417_p9 = scmp.ne.s32.totalorder %s6716_s15, %s6416_s10  ;;  %p6425_p6 = scmp.lt.s32.totalorder %s6416_s10, %s6416_s10 }
  0x2c   : > { %p6419_p10 = pnand %p6417_p9, %p6737_p13  ;;  %p6426_p12 = por %p6425_p6, %p6424_p2 }
  0x2e   : > { %p6420_p1 = pneg %p6419_p10 }
  0x30   : > { %p6427_p0 = pnand %p6426_p12, %p6420_p1 }
  0x32   : > { %6430 = shalt.err (!%p6427_p0)
}
  0x33   : > { %s8790_s14 = smov 128   ;;  %s8792_s17 = smov 8  }
  0x34   : > { %6340 = dma.hbm_to_vmem [thread:$0]  (!%p6723_p11), %s9056_s3, 2048, %s6716_s15, [#allocation8], %s8790_s14, %s8790_s14, %s8792_s17  }
  0x35   : > { %s9058_s0 = sld [smem:[#allocation83_spill]] }
  0x3b   : > { %s6431_s23 = scalar_lea.hbm %s9058_s0, 16 }
  0x3c   : > { %p6432_p1 = scmp.ne.s32.totalorder %s9058_s0, %s6431_s23  ;;  %p6438_p10 = scmp.lt.u32.totalorder %s6431_s23, %s9058_s0 }
  0x3e   : > { %p6434_p2 = pnand %p6432_p1, %p6737_p13 }
  0x40   : > { %p6435_p6 = pneg %p6434_p2 }
  0x42   : > { %p6440_p3 = pnand %p6438_p10, %p6435_p6 }
  0x44   : > { %6443 = shalt.err (!%p6440_p3)
}
  0x45   : > { %s6620_s27 = smov [#allocation2]   ;;  %s9059_s6 = sld [smem:[#allocation86_spill]] }
  0x46   : > { %6337 = dma.hbm_to_smem (!%p6723_p11), %s9058_s0, 16, %s6620_s27, [#allocation5]  }
  0x4b   : > { %s6444_s22 = scalar_lea.hbm %s9059_s6, 2048 }
  0x4c   : > { %p6445_p5 = scmp.ne.s32.totalorder %s9059_s6, %s6444_s22  ;;  %p6451_p12 = scmp.lt.u32.totalorder %s6444_s22, %s9059_s6 }
  0x4e   : > { %p6447_p7 = pnand %p6445_p5, %p6737_p13 }
  0x50   : > { %p6448_p9 = pneg %p6447_p7 }
  0x52   : > { %p6453_p0 = pnand %p6451_p12, %p6448_p9 }
  0x54   : > { %6456 = shalt.err (!%p6453_p0)
}
  0x55   : > { %s6457_s27 = scalar_lea.vmem %s6727_s18, 2048  ;;  %p6465_p10 = scmp.lt.s32.totalorder %s6727_s18, %s6727_s18 }
  0x56   : > { %p6458_p1 = scmp.ne.s32.totalorder %s6727_s18, %s6457_s27  ;;  %p6466_p3 = scmp.lt.s32.totalorder %s6457_s27, %s6457_s27 }
  0x58   : > { %p6460_p2 = pnand %p6458_p1, %p6737_p13  ;;  %p6467_p5 = por %p6466_p3, %p6465_p10 }
  0x5a   : > { %p6461_p6 = pneg %p6460_p2 }
  0x5c   : > { %p6468_p7 = pnand %p6467_p5, %p6461_p6 }
  0x5e   : > { %6471 = shalt.err (!%p6468_p7)
}
  0x5f   : > { %6343 = dma.hbm_to_vmem [thread:$0]  (!%p6723_p11), %s9059_s6, 2048, %s6727_s18, [#allocation11], %s8790_s14, %s8790_s14, %s8792_s17  }
  0x60   : > { %s6804_s16 = sadd.s32 1, %s6614_s30   ;;  %s57_s19 = sadd.s32 1, %s6610_s29 }
  0x61   : > { %s54_s24 = ssub.s32 %s6614_s30, %s6804_s16  ;;  %p64_p9 = scmp.ne.s32.totalorder %s6610_s29, %s6606_s28 }
  0x62   : > { %p55_p13 = scmp.eq.s32.totalorder %s54_s24, 0  ;;  %p65_p12 = scmp.eq.s32.totalorder %s6614_s30, 0 }
  0x63   : > { %p6358_p0 = scmp.lt.s32.totalorder %s6614_s30, 2  ;;  %p9061_p2 = scmp.eq.s32.totalorder %s6693_s9, 1 }
  0x64   : > { %s6814_s20 = scalar_select %p55_p13, %s6610_s29, %s57_s19  }
  0x65   : > { %p66_p1 = por %p65_p12, %p64_p9  ;;  %p6818_p6 = por %p9061_p2, %p64_p9 }
  0x66   : > { %9060 = sst [smem:[#allocation21_spill]] %s6814_s20  ;;  %s295_s22 = sand.u32 1, %s6610_s29  }
  0x67   : > { %s9062_s21 = scalar_select %p6818_p6, 1, 0 }
  0x68   : > { %s4293_s25 = sshll.u32 %s6614_s30, 12  ;;  %s6824_s18 = sshll.u32 %s295_s22, 8 }
  0x69   : > { %s9063_s1 = sld [smem:[#allocation84_spill]]  ;;  %s299_s27 = scalar_lea.vmem [#allocation6], %s6824_s18 }
  0x6a   : > { %s306_s10 = sshll.u32 %s299_s27, 4  ;;  %p6832_p11 = pnand %p6358_p0, %p66_p1  ;;  %s6836_s10 = int_to_ptr.vmem [resolvable:$true] %s306_s10 }
  0x6b   : > { %s6841_s26 = scalar_lea.hbm %s8780_s2, %s4293_s25  ;;  %s6843_s12 = scalar_lea.sflag [#allocation3], %s295_s22 }
  0x6c   : > { %p6474_p3 = pneg %p6832_p11 }
  0x6f   : > { %s6829_s23 = scalar_lea.hbm %s9063_s1, %s4293_s25  ;;  %s6477_s0 = scalar_lea.hbm %s9063_s1, 8192 }
  0x70   : > { %s6472_s14 = scalar_lea.hbm %s6829_s23, 4096  ;;  %p6478_p13 = scmp.lt.u32.totalorder %s6829_s23, %s9063_s1 }
  0x71   : > { %p6473_p10 = scmp.ne.s32.totalorder %s6829_s23, %s6472_s14  ;;  %p6479_p9 = scmp.lt.u32.totalorder %s6477_s0, %s6472_s14 }
  0x72   : > { %p6481_p0 = scmp.lt.u32.totalorder %s6472_s14, %s6829_s23 }
  0x73   : > { %p6475_p5 = pnand %p6474_p3, %p6473_p10  ;;  %p6480_p12 = por %p6479_p9, %p6478_p13 }
  0x75   : > { %p6476_p7 = pneg %p6475_p5  ;;  %p6482_p1 = por %p6481_p0, %p6480_p12 }
  0x77   : > { %p6483_p2 = pnand %p6482_p1, %p6476_p7 }
  0x79   : > { %6486 = shalt.err (!%p6483_p2)
}
  0x7a   : > { %s6487_s22 = scalar_lea.vmem %s6836_s10, 4096  ;;  %s6621_s17 = smov [#allocation6]  }
  0x7b   : > { %p6488_p10 = scmp.ne.s32.totalorder %s6836_s10, %s6487_s22  ;;  %s6492_s25 = sshll.u32 %s6621_s17, 4  ;;  %s6493_s25 = int_to_ptr.vmem [resolvable:$false] %s6492_s25 }
  0x7c   : > { %s6494_s3 = scalar_lea.vmem %s6493_s25, 8192  ;;  %p6495_p4 = scmp.lt.s32.totalorder %s6836_s10, %s6493_s25 }
  0x7d   : > { %p6490_p5 = pnand %p6488_p10, %p6474_p3  ;;  %p6496_p13 = scmp.lt.s32.totalorder %s6494_s3, %s6487_s22 }
  0x7f   : > { %p6491_p6 = pneg %p6490_p5  ;;  %p6497_p9 = por %p6496_p13, %p6495_p4 }
  0x81   : > { %p6498_p12 = pnand %p6497_p9, %p6491_p6 }
  0x83   : > { %6501 = shalt.err (!%p6498_p12)
}
  0x84   : > { %s9065_s0 = smov 8   ;;  %s9066_s6 = smov 128  }
  0x85   : > { %6347 = dma.hbm_to_vmem [thread:$0]  (!%p6832_p11), %s6829_s23, 4096, %s6836_s10, %s6843_s12, %s9066_s6, %s9066_s6, %s9065_s0  }
  0x86   : > { %s320_s14 = scalar_lea.vmem [#allocation7], %s6824_s18  ;;  %s316_s19 = sand.u32 1, %s6614_s30  }
  0x87   : > { %s327_s24 = sshll.u32 %s320_s14, 4  ;;  %s6878_s27 = scalar_lea.sflag [#allocation8], %s316_s19  ;;  %s6876_s24 = int_to_ptr.vmem [resolvable:$true] %s327_s24 }
  0x88   : > { %s6502_s22 = scalar_lea.hbm %s6841_s26, 4096  ;;  %s6507_s3 = scalar_lea.hbm %s8780_s2, 8192 }
  0x89   : > { %p6503_p4 = scmp.ne.s32.totalorder %s6841_s26, %s6502_s22  ;;  %p6508_p0 = scmp.lt.u32.totalorder %s6841_s26, %s8780_s2 }
  0x8a   : > { %p6509_p1 = scmp.lt.u32.totalorder %s6507_s3, %s6502_s22  ;;  %p6511_p10 = scmp.lt.u32.totalorder %s6502_s22, %s6841_s26 }
  0x8b   : > { %p6505_p6 = pnand %p6503_p4, %p6474_p3 }
  0x8c   : > { %p6510_p2 = por %p6509_p1, %p6508_p0 }
  0x8d   : > { %p6506_p7 = pneg %p6505_p6 }
  0x8e   : > { %p6512_p5 = por %p6511_p10, %p6510_p2 }
  0x90   : > { %p6513_p13 = pnand %p6512_p5, %p6506_p7 }
  0x92   : > { %6516 = shalt.err (!%p6513_p13)
}
  0x93   : > { %s6517_s18 = scalar_lea.vmem %s6876_s24, 4096  ;;  %s6622_s23 = smov [#allocation7]  }
  0x94   : > { %p6518_p9 = scmp.ne.s32.totalorder %s6876_s24, %s6517_s18  ;;  %s6522_s10 = sshll.u32 %s6622_s23, 4  ;;  %s6523_s10 = int_to_ptr.vmem [resolvable:$false] %s6522_s10 }
  0x95   : > { %s6524_s1 = scalar_lea.vmem %s6523_s10, 8192  ;;  %p6525_p6 = scmp.lt.s32.totalorder %s6876_s24, %s6523_s10 }
  0x96   : > { %p6520_p12 = pnand %p6518_p9, %p6474_p3  ;;  %p6526_p0 = scmp.lt.s32.totalorder %s6524_s1, %s6517_s18 }
  0x98   : > { %p6521_p4 = pneg %p6520_p12  ;;  %p6527_p1 = por %p6526_p0, %p6525_p6 }
  0x9a   : > { %p6528_p2 = pnand %p6527_p1, %p6521_p4 }
  0x9c   : > { %6531 = shalt.err (!%p6528_p2)
}
  0x9d   : > { %6350 = dma.hbm_to_vmem [thread:$0]  (!%p6832_p11), %s6841_s26, 4096, %s6876_s24, %s6878_s27, %s9066_s6, %s9066_s6, %s9065_s0  }
  0x9e   : > { %339 = sbr.rel (%p6712_p8) target bundleno = 1607 (0x647), region = 52 }
  0xa5   : > { %p9067_p3 = scmp.eq.s32.totalorder %s6693_s9, 0 }
  0xa7   : > { %6577 = dma.done.wait (%p9067_p3), [#allocation5], 16   ;;  %p9068_p7 = pmov %p9067_p3 }
  0xa8   : > { %s6914_s20 = sand.u32 1, %s6606_s28   ;;  %p9069_p11 = scmp.ne.s32.totalorder %s9051_s11, 0 }
  0xa9   : > { %6579 = vsyncadd (%p9068_p7), [#allocation5], 4294967280  ;;  %s4281_s15 = sshll.u32 %s6914_s20, 8  ;;  %s346_s12 = scalar_lea.sflag [#allocation3], %s6914_s20 }
  0xaa   : > { %s6918_s14 = scalar_lea.vmem [#allocation6], %s4281_s15 }
  0xab   : > { %6581 = dma.done.wait (%p9069_p11), %s346_s12, 4096  }
  0xac   : > { %6583 = vsyncadd (%p9069_p11), %s346_s12, 4294963200  ;;  %s354_s13 = sand.u32 1, %s6693_s9   ;;  %s6925_s0 = scalar_lea.vmem [#allocation7], %s4281_s15 }
  0xad   : > { %s355_s26 = scalar_lea.sflag [#allocation8], %s354_s13 }
  0xae   : > { %6585 = dma.done.wait (%p9069_p11), %s355_s26, 4096  }
  0xaf   : > { %6587 = vsyncadd (%p9069_p11), %s355_s26, 4294963200  ;;  %p9070_p8 = pmov %p9067_p3 }
  0xb0   : > { %p9071_p10 = pmov %p9067_p3 }
  0xb1   : > { %6589 = dma.done.wait (%p9070_p8), [#allocation8], 2048  }
  0xb2   : > { %6591 = vsyncadd (%p9071_p10), [#allocation8], 4294965248  ;;  %p9072_p5 = pmov %p9067_p3 }
  0xb3   : > { %p9073_p13 = pmov %p9067_p3 }
  0xb4   : > { %6593 = dma.done.wait (%p9072_p5), [#allocation11], 2048  }
  0xb5   : > { %6595 = vsyncadd (%p9073_p13), [#allocation11], 4294965248 }
  0xb6   : > { %371 = sfence }
  0xb7   : > { %v571_v0 = vld [vmem:[#allocation9] sm:$0xff]  ;;  %v572_v1 = vld [vmem:[#allocation9 + $0x8] sm:$0xff]  ;;  %v573_v2 = vld [vmem:[#allocation9 + $0x10] sm:$0xff]  ;;  %s6939_s6 = sld [smem:[#allocation2]]  ;;  %s6990_s11 = sld [smem:[#allocation2 + $0x1]]  ;;  %vm6624_vm0 = vmmov 0  }
  0xb8   : > { %v595_v3 = vand.u32 4294901760, %v571_v0  ;;  %v598_v4 = vand.u32 4294901760, %v572_v1  ;;  %v574_v5 = vld [vmem:[#allocation9 + $0x18] sm:$0xff]  ;;  %v601_v6 = vand.u32 4294901760, %v573_v2  ;;  %v6941_v7 = vld [vmem:[#allocation9 + $0x20] sm:$0xff]  ;;  %v6943_v8 = vld [vmem:[#allocation9 + $0x28] sm:$0xff] }
  0xb9   : > { %v604_v9 = vand.u32 4294901760, %v574_v5  ;;  %v607_v10 = vand.u32 4294901760, %v6941_v7  ;;  %v610_v11 = vand.u32 4294901760, %v6943_v8  ;;  %v6947_v12 = vld [vmem:[#allocation9 + $0x30] sm:$0xff]  ;;  %v6949_v13 = vld [vmem:[#allocation9 + $0x38] sm:$0xff]  ;;  %v6951_v14 = vld [vmem:[#allocation9 + $0x40] sm:$0xff] }
  0xba   : > { %v6953_v15 = vpack.c.bf16 %v598_v4, %v595_v3  ;;  %v8815_v16 = vand.u32 4294901760, %v6947_v12  ;;  %v8814_v17 = vand.u32 4294901760, %v6949_v13  ;;  %v6957_v18 = vld [vmem:[#allocation9 + $0x48] sm:$0xff]  ;;  %v8813_v19 = vand.u32 4294901760, %v6951_v14  ;;  %v6960_v20 = vld [vmem:[#allocation9 + $0x50] sm:$0xff]  ;;  %v6962_v21 = vld [vmem:[#allocation9 + $0x58] sm:$0xff] }
  0xbb   : > { %v6964_v22 = vpack.c.bf16 %v604_v9, %v601_v6  ;;  %v6968_v23 = vpack.c.bf16 %v610_v11, %v607_v10  ;;  %v8811_v24 = vand.u32 4294901760, %v6957_v18  ;;  %v8809_v25 = vand.u32 4294901760, %v6960_v20  ;;  %v6972_v26 = vld [vmem:[#allocation9 + $0x60] sm:$0xff]  ;;  %v6974_v27 = vld [vmem:[#allocation9 + $0x68] sm:$0xff]  ;;  %v6976_v28 = vld [vmem:[#allocation9 + $0x70] sm:$0xff]  ;;  %s4285_s3 = sshll.u32 %s6914_s20, 3 }
  0xbc   : > { %5586 = vmatprep.subr.bf16.mxu0 %v6953_v15  ;;  %v6983_v29 = vpack.c.bf16 %v8814_v17, %v8815_v16  ;;  %v8808_v30 = vand.u32 4294901760, %v6962_v21  ;;  %v8807_v31 = vand.u32 4294901760, %v6972_v26  ;;  %v8805_v32 = vand.u32 4294901760, %v6974_v27  ;;  %v6988_v33 = vld [vmem:[#allocation9 + $0x78] sm:$0xff]  ;;  %v409_v37 = vld [vmem:[%s6918_s14] sm:$0xff]  ;;  %v410_v39 = vld [vmem:[%s6918_s14 + $0x8] sm:$0xff] }
  0xbd   : > { %9074 = vst [vmem:[#allocation22_spill] sm:$0xff] %v6964_v22  ;;  %9075 = vst [vmem:[#allocation23_spill] sm:$0xff] %v6968_v23  ;;  %5588 = vmatpush3.bf16.msra.mxu0 %v6953_v15  ;;  %v6997_v34 = vpack.c.bf16 %v8811_v24, %v8813_v19  ;;  %v8799_v35 = vand.u32 4294901760, %v6976_v28  ;;  %v8797_v36 = vand.u32 4294901760, %v6988_v33  ;;  %v7003_v38 = vstv %s6939_s6  ;;  %v474_v43 = vld [vmem:[%s6925_s0] sm:$0xff]  ;;  %v411_v45 = vld [vmem:[%s6918_s14 + $0x10] sm:$0xff] }
  0xbe   : > { %9076 = vst [vmem:[#allocation24_spill] sm:$0xff] %v6983_v29  ;;  %5590 = vmatprep.subr.bf16.mxu0 %v6964_v22  ;;  %v7011_v40 = vpack.c.bf16 %v8808_v30, %v8809_v25  ;;  %v7017_v41 = vpack.c.bf16 %v8805_v32, %v8807_v31  ;;  %v442_v42 = vmul.f32 %v7003_v38, %v409_v37  ;;  %v475_v47 = vld [vmem:[%s6925_s0 + $0x8] sm:$0xff]  ;;  %v412_v51 = vld [vmem:[%s6918_s14 + $0x18] sm:$0xff]  ;;  %v413_v52 = vld [vmem:[%s6918_s14 + $0x20] sm:$0xff]  ;;  %s4290_s10 = sshll.u32 %s6693_s9, 7  ;;  %s404_s1 = scalar_lea.vmem [#allocation12], %s4285_s3 }
  0xbf   : > { %9077 = vst [vmem:[#allocation25_spill] sm:$0xff] %v6997_v34  ;;  %v443_v44 = vmul.f32 %v7003_v38, %v410_v39  ;;  %v7027_v46 = vpack.c.bf16 %v8797_v36, %v8799_v35  ;;  %v7030_v48 = vsub.f32 %v571_v0, %v595_v3  ;;  %v7032_v49 = vsub.f32 %v572_v1, %v598_v4  ;;  %v476_v53 = vld [vmem:[%s6925_s0 + $0x10] sm:$0xff]  ;;  %v477_v55 = vld [vmem:[%s6925_s0 + $0x18] sm:$0xff]  ;;  %v414_v57 = vld [vmem:[%s6918_s14 + $0x28] sm:$0xff]  ;;  %s4143_s15 = sshll.u32 %s404_s1, 4  ;;  %s8734_s13 = scalar_lea.hbm %s8786_s8, %s4290_s10  ;;  %s8736_s15 = int_to_ptr.vmem [resolvable:$true] %s4143_s15 }
  0xc0   : > { %9078 = vst [vmem:[#allocation26_spill] sm:$0xff] %v7011_v40  ;;  %9079 = vst [vmem:[#allocation27_spill] sm:$0xff] %v7017_v41  ;;  %v444_v50 = vmul.f32 %v7003_v38, %v411_v45  ;;  %v445_v54 = vmul.f32 %v7003_v38, %v412_v51  ;;  %v446_v56 = vmul.f32 %v7003_v38, %v413_v52  ;;  %v478_v62 = vld [vmem:[%s6925_s0 + $0x20] sm:$0xff]  ;;  %v479_v0 = vld [vmem:[%s6925_s0 + $0x28] sm:$0xff]  ;;  %s4130_s26 = scalar_lea.sflag [#allocation4], %s6914_s20  ;;  %p9391_p12 = scmp.ne.s32.totalorder %s9062_s21, 0 }
  0xc1   : > { %9080 = vst [vmem:[#allocation28_spill] sm:$0xff] %v7027_v46  ;;  %v7042_v58 = vsub.f32 %v573_v2, %v601_v6  ;;  %v7044_v59 = vsub.f32 %v574_v5, %v604_v9  ;;  %5592 = vmatpush3.bf16.msra.mxu0 %v6964_v22  ;;  %v8796_v60 = vand.u32 4294901760, %v7030_v48  ;;  %v8798_v61 = vand.u32 4294901760, %v7032_v49  ;;  %v415_v1 = vld [vmem:[%s6918_s14 + $0x30] sm:$0xff]  ;;  %v482_v31 = vld [vmem:[%s6925_s0 + $0x40] sm:$0xff]  ;;  %v418_v30 = vld [vmem:[%s6918_s14 + $0x48] sm:$0xff] }
  0xc2   : > { %v447_v63 = vmul.f32 %v7003_v38, %v414_v57  ;;  %v7054_v3 = vsub.f32 %v6941_v7, %v607_v10  ;;  %5594 = vmatprep.subr.bf16.mxu0 %v6968_v23  ;;  %v7058_v2 = vstv %s6990_s11  ;;  %v448_v6 = vmul.f32 %v7003_v38, %v415_v1  ;;  %v483_v25 = vld [vmem:[%s6925_s0 + $0x48] sm:$0xff]  ;;  %v484_v24 = vld [vmem:[%s6925_s0 + $0x50] sm:$0xff]  ;;  %s6626_s9 = smov [#allocation12]  }
  0xc3   : > { %v8801_v4 = vand.u32 4294901760, %v7042_v58  ;;  %v8800_v5 = vand.u32 4294901760, %v7044_v59  ;;  %v507_v9 = vmul.f32 %v7058_v2, %v474_v43  ;;  %v508_v37 = vmul.f32 %v7058_v2, %v475_v47  ;;  %s6536_s6 = sshll.u32 %s6626_s9, 4  ;;  %s6537_s6 = int_to_ptr.vmem [resolvable:$false] %s6536_s6 }
  0xc4   : > { %v999_v39 = vsub.f32 %v7030_v48, %v8796_v60  ;;  %v1006_v7 = vsub.f32 %v7032_v49, %v8798_v61  ;;  %v509_v10 = vmul.f32 %v7058_v2, %v476_v53  ;;  %v510_v45 = vmul.f32 %v7058_v2, %v477_v55  ;;  %s6538_s11 = scalar_lea.vmem %s6537_s6, 256  ;;  %p6539_p0 = scmp.lt.s32.totalorder %s8736_s15, %s6537_s6 }
  0xc5   : > { %v511_v51 = vmul.f32 %v7058_v2, %v478_v62  ;;  %v512_v52 = vmul.f32 %v7058_v2, %v479_v0  ;;  %5596 = vmatpush3.bf16.msra.mxu0 %v6968_v23  ;;  %v539_v43 = vadd.f32 %v507_v9, %v442_v42  ;;  %v540_v47 = vadd.f32 %v508_v37, %v443_v44 }
  0xc6   : > { %v1000_v57 = vand.u32 4294901760, %v999_v39  ;;  %v1007_v1 = vand.u32 4294901760, %v1006_v7  ;;  %5598 = vmatprep.subr.bf16.mxu0 %v6983_v29  ;;  %v541_v60 = vadd.f32 %v509_v10, %v444_v50  ;;  %v542_v36 = vadd.f32 %v510_v45, %v445_v54  ;;  %v480_v54 = vld [vmem:[%s6925_s0 + $0x30] sm:$0xff] }
  0xc7   : > { %v543_v61 = vadd.f32 %v511_v51, %v446_v56  ;;  %v544_v35 = vadd.f32 %v512_v52, %v447_v63  ;;  %v7077_v53 = vand.u32 4294901760, %v539_v43  ;;  %v7079_v55 = vand.u32 4294901760, %v540_v47 }
  0xc8   : > { %v7081_v62 = vpack.c.bf16 %v1007_v1, %v1000_v57  ;;  %v1013_v42 = vsub.f32 %v7042_v58, %v8801_v4  ;;  %v7086_v44 = vand.u32 4294901760, %v541_v60  ;;  %v7088_v0 = vand.u32 4294901760, %v542_v36 }
  0xc9   : > { %v7090_v9 = vand.u32 4294901760, %v543_v61  ;;  %v7092_v50 = vand.u32 4294901760, %v544_v35  ;;  %5600 = vmatpush3.bf16.msra.mxu0 %v6983_v29  ;;  %v7097_v56 = vsub.f32 %v539_v43, %v7077_v53  ;;  %v7100_v63 = vsub.f32 %v540_v47, %v7079_v55 }
  0xca   : > { %v1014_v37 = vand.u32 4294901760, %v1013_v42  ;;  %v1020_v39 = vsub.f32 %v7044_v59, %v8800_v5  ;;  %5602 = vmatprep.subr.bf16.mxu0 %v6997_v34  ;;  %v7107_v7 = vsub.f32 %v541_v60, %v7086_v44  ;;  %v7110_v10 = vsub.f32 %v542_v36, %v7088_v0  ;;  %v416_v42 = vld [vmem:[%s6918_s14 + $0x38] sm:$0xff] }
  0xcb   : > { %9081 = vst [vmem:[#allocation29_spill] sm:$0xff] %v7092_v50  ;;  %9082 = vst [vmem:[#allocation30_spill] sm:$0xff] %v7097_v56  ;;  %v7113_v45 = vsub.f32 %v543_v61, %v7090_v9  ;;  %v7116_v51 = vsub.f32 %v544_v35, %v7092_v50  ;;  %v8802_v52 = vand.u32 4294901760, %v7097_v56  ;;  %v8803_v43 = vand.u32 4294901760, %v7100_v63 }
  0xcc   : > { %9083 = vst [vmem:[#allocation31_spill] sm:$0xff] %v7100_v63  ;;  %9084 = vst [vmem:[#allocation32_spill] sm:$0xff] %v7107_v7  ;;  %v1021_v47 = vand.u32 4294901760, %v1020_v39  ;;  %v513_v57 = vmul.f32 %v7058_v2, %v480_v54  ;;  %v8804_v60 = vand.u32 4294901760, %v7107_v7  ;;  %v8806_v36 = vand.u32 4294901760, %v7110_v10 }
  0xcd   : > { %9085 = vst [vmem:[#allocation33_spill] sm:$0xff] %v7110_v10  ;;  %9086 = vst [vmem:[#allocation34_spill] sm:$0xff] %v7113_v45  ;;  %v8810_v1 = vand.u32 4294901760, %v7113_v45  ;;  %v8812_v61 = vand.u32 4294901760, %v7116_v51  ;;  %5604 = vmatpush3.bf16.msra.mxu0 %v6997_v34  ;;  %v678_v35 = vsub.f32 %v7097_v56, %v8802_v52  ;;  %v7133_v54 = vsub.f32 %v7100_v63, %v8803_v43  ;;  %v495_v63 = vld [vmem:[%s6925_s0 + $0xa8] sm:$0xff] }
  0xce   : > { %9087 = vst [vmem:[#allocation35_spill] sm:$0xff] %v7116_v51  ;;  %v7135_v39 = vpack.c.bf16 %v1021_v47, %v1014_v37  ;;  %v545_v5 = vadd.f32 %v513_v57, %v448_v6  ;;  %5606 = vmatprep.subr.bf16.mxu0 %v7011_v40  ;;  %v7141_v4 = vsub.f32 %v7107_v7, %v8804_v60  ;;  %v481_v37 = vld [vmem:[%s6925_s0 + $0x38] sm:$0xff]  ;;  %v417_v47 = vld [vmem:[%s6918_s14 + $0x40] sm:$0xff] }
  0xcf   : > { %v7146_v52 = vsub.f32 %v7110_v10, %v8806_v36  ;;  %v7151_v43 = vsub.f32 %v7113_v45, %v8810_v1  ;;  %v7156_v6 = vsub.f32 %v7116_v51, %v8812_v61  ;;  %v679_v57 = vand.u32 4294901760, %v678_v35  ;;  %v419_v35 = vld [vmem:[%s6918_s14 + $0x50] sm:$0xff]  ;;  %v426_v10 = vld [vmem:[%s6918_s14 + $0x88] sm:$0xff] }
  0xd0   : > { %v7161_v32 = vand.u32 4294901760, %v545_v5  ;;  %v449_v36 = vmul.f32 %v7003_v38, %v416_v42  ;;  %v514_v42 = vmul.f32 %v7058_v2, %v481_v37  ;;  %v450_v16 = vmul.f32 %v7003_v38, %v417_v47  ;;  %v420_v37 = vld [vmem:[%s6918_s14 + $0x58] sm:$0xff] }
  0xd1   : > { %5608 = vmatpush3.bf16.msra.mxu0 %v7011_v40  ;;  %4927 = vmatprep.mubr.f32.mxu0 %v679_v57  ;;  %v8822_v1 = vand.u32 4294901760, %v7054_v3  ;;  %v515_v19 = vmul.f32 %v7058_v2, %v482_v31  ;;  %v451_v61 = vmul.f32 %v7003_v38, %v418_v30  ;;  %v516_v57 = vmul.f32 %v7058_v2, %v483_v25 }
  0xd2   : > { %9088 = vst [vmem:[#allocation36_spill] sm:$0xff] %v7161_v32  ;;  %v7174_v17 = vsub.f32 %v545_v5, %v7161_v32  ;;  %5610 = vmatprep.subr.bf16.mxu0 %v7017_v41  ;;  %v7187_v5 = vsub.f32 %v6943_v8, %v610_v11  ;;  %v546_v60 = vadd.f32 %v514_v42, %v449_v36  ;;  %v485_v8 = vld [vmem:[%s6925_s0 + $0x58] sm:$0xff]  ;;  %v421_v11 = vld [vmem:[%s6918_s14 + $0x60] sm:$0xff] }
  0xd3   : > { %v1027_v40 = vsub.f32 %v7054_v3, %v8822_v1  ;;  %v452_v34 = vmul.f32 %v7003_v38, %v419_v35  ;;  %v547_v31 = vadd.f32 %v515_v19, %v450_v16  ;;  %v548_v30 = vadd.f32 %v516_v57, %v451_v61  ;;  %v486_v1 = vld [vmem:[%s6925_s0 + $0x60] sm:$0xff] }
  0xd4   : > { %9089 = vst [vmem:[#allocation37_spill] sm:$0xff] %v7174_v17  ;;  %v8823_v47 = vand.u32 4294901760, %v7174_v17  ;;  %v8834_v25 = vand.u32 4294901760, %v7187_v5  ;;  %v517_v29 = vmul.f32 %v7058_v2, %v484_v24  ;;  %v7205_v42 = vand.u32 4294901760, %v546_v60 }
  0xd5   : > { %5612 = vmatpush3.bf16.msra.mxu0 %v7017_v41  ;;  %v1028_v35 = vand.u32 4294901760, %v1027_v40  ;;  %v453_v16 = vmul.f32 %v7003_v38, %v420_v37  ;;  %v7209_v19 = vand.u32 4294901760, %v547_v31  ;;  %v7211_v24 = vand.u32 4294901760, %v548_v30 }
  0xd6   : > { %v7203_v36 = vsub.f32 %v7174_v17, %v8823_v47  ;;  %9090 = vst [vmem:[#allocation38_spill] sm:$0xff] %v7205_v42  ;;  %5614 = vmatprep.subr.bf16.mxu0 %v7027_v46  ;;  %v1034_v61 = vsub.f32 %v7187_v5, %v8834_v25  ;;  %v549_v57 = vadd.f32 %v517_v29, %v452_v34  ;;  %v422_v47 = vld [vmem:[%s6918_s14 + $0x68] sm:$0xff] }
  0xd7   : > { %9091 = vst [vmem:[#allocation39_spill] sm:$0xff] %v7209_v19  ;;  %9092 = vst [vmem:[#allocation40_spill] sm:$0xff] %v7211_v24  ;;  %v7220_v40 = vsub.f32 %v546_v60, %v7205_v42  ;;  %v518_v37 = vmul.f32 %v7058_v2, %v485_v8  ;;  %v454_v17 = vmul.f32 %v7003_v38, %v421_v11  ;;  %v487_v29 = vld [vmem:[%s6925_s0 + $0x68] sm:$0xff] }
  0xd8   : > { %v7225_v51 = vsub.f32 %v547_v31, %v7209_v19  ;;  %v7228_v23 = vsub.f32 %v548_v30, %v7211_v24  ;;  %v1035_v45 = vand.u32 4294901760, %v1034_v61  ;;  %v7230_v25 = vand.u32 4294901760, %v549_v57 }
  0xd9   : > { %9093 = vst [vmem:[#allocation41_spill] sm:$0xff] %v7220_v40  ;;  %5616 = vmatpush3.bf16.msra.mxu0 %v7027_v46  ;;  %v8837_v34 = vand.u32 4294901760, %v7220_v40  ;;  %v550_v60 = vadd.f32 %v518_v37, %v453_v16  ;;  %v519_v41 = vmul.f32 %v7058_v2, %v486_v1  ;;  %v455_v8 = vmul.f32 %v7003_v38, %v422_v47 }
  0xda   : > { %9094 = vst [vmem:[#allocation42_spill] sm:$0xff] %v7225_v51  ;;  %9095 = vst [vmem:[#allocation43_spill] sm:$0xff] %v7228_v23  ;;  %5618 = vmatprep.subr.bf16.mxu0 %v7081_v62  ;;  %v8839_v31 = vand.u32 4294901760, %v7225_v51  ;;  %v8838_v30 = vand.u32 4294901760, %v7228_v23  ;;  %v5625_v11 = vpack.c.bf16 %v1035_v45, %v1028_v35  ;;  %v7241_v61 = vsub.f32 %v549_v57, %v7230_v25  ;;  %v488_v57 = vld [vmem:[%s6925_s0 + $0x70] sm:$0xff] }
  0xdb   : > { %9096 = vst [vmem:[#allocation44_spill] sm:$0xff] %v7230_v25  ;;  %v7246_v46 = vsub.f32 %v7220_v40, %v8837_v34  ;;  %v7248_v1 = vand.u32 4294901760, %v550_v60  ;;  %v551_v47 = vadd.f32 %v519_v41, %v454_v17  ;;  %v520_v16 = vmul.f32 %v7058_v2, %v487_v29 }
  0xdc   : > { %9097 = vst [vmem:[#allocation45_spill] sm:$0xff] %v7241_v61  ;;  %v9099_v37 = vand.u32 4294901760, %v7133_v54  ;;  %v7256_v45 = vsub.f32 %v7225_v51, %v8839_v31  ;;  %v7261_v35 = vsub.f32 %v7228_v23, %v8838_v30  ;;  %v9100_v34 = vand.u32 4294901760, %v6947_v12  ;;  %v423_v31 = vld [vmem:[%s6918_s14 + $0x70] sm:$0xff]  ;;  %v489_v23 = vld [vmem:[%s6925_s0 + $0x78] sm:$0xff] }
  0xdd   : > { %9098 = vst [vmem:[#allocation46_spill] sm:$0xff] %v7248_v1  ;;  %v9101_v41 = vand.u32 4294901760, %v7141_v4  ;;  %v749_v54 = vand.u32 4294901760, %v7246_v46  ;;  %v7274_v29 = vsub.f32 %v550_v60, %v7248_v1  ;;  %v552_v30 = vadd.f32 %v520_v16, %v455_v8 }
  0xde   : > { %4928 = vmatmul.mubr.f32.vlgmr.msra.gmra.mrb[0].mxu0 %v9099_v37  ;;  %v7267_v17 = vsub.f32 %v6947_v12, %v9100_v34  ;;  %v7276_v37 = vand.u32 4294901760, %v551_v47  ;;  %v759_v12 = vand.u32 4294901760, %v7256_v45  ;;  %v9104_v4 = vand.u32 4294901760, %v7241_v61 }
  0xdf   : > { %5620 = vmatpush3.bf16.msra.mxu0 %v7081_v62  ;;  %4930 = vmatprep.mubr.f32.mxu0 %v9101_v41  ;;  %9102 = vst [vmem:[#allocation47_spill] sm:$0xff] %v7274_v29  ;;  %v7293_v8 = vand.u32 4294901760, %v552_v30  ;;  %v9107_v16 = vand.u32 4294901760, %v6949_v13  ;;  %v424_v62 = vld [vmem:[%s6918_s14 + $0x78] sm:$0xff]  ;;  %v521_v51 = vmul.f32 %v7058_v2, %v488_v57  ;;  %v9110_v40 = vand.u32 4294901760, %v7151_v43  ;;  %v490_v57 = vld [vmem:[%s6925_s0 + $0x80] sm:$0xff] }
  0xe0   : > { %9103 = vst [vmem:[#allocation48_spill] sm:$0xff] %v7276_v37  ;;  %5622 = vmatprep.subr.bf16.mxu0 %v7135_v39  ;;  %v7286_v34 = vsub.f32 %v7241_v61, %v9104_v4  ;;  %v7291_v41 = vsub.f32 %v551_v47, %v7276_v37  ;;  %v9108_v4 = vand.u32 4294901760, %v7146_v52  ;;  %v9109_v60 = vand.u32 4294901760, %v7267_v17 }
  0xe1   : > { %9106 = vst [vmem:[#allocation50_spill] sm:$0xff] %v7293_v8  ;;  %v7298_v45 = vsub.f32 %v6949_v13, %v9107_v16  ;;  %v456_v61 = vmul.f32 %v7003_v38, %v423_v31  ;;  %v9111_v13 = vand.u32 4294901760, %v7274_v29  ;;  %v522_v46 = vmul.f32 %v7058_v2, %v489_v23 }
  0xe2   : > { %9105 = vst [vmem:[#allocation49_spill] sm:$0xff] %v7291_v41  ;;  %4931 = vmatmul.mubr.f32.gmra.mrb[2].mxu0 %v9108_v4  ;;  %v1041_v47 = vsub.f32 %v7267_v17, %v9109_v60  ;;  %v8854_v16 = vand.u32 4294901760, %v7291_v41  ;;  %v7320_v60 = vsub.f32 %v552_v30, %v7293_v8  ;;  %v425_v4 = vld [vmem:[%s6918_s14 + $0x80] sm:$0xff] }
  0xe3   : > { %4933 = vmatprep.mubr.f32.mxu0 %v9110_v40  ;;  %5624 = vmatpush3.bf16.msra.mxu0 %v7135_v39  ;;  %v7316_v52 = vsub.f32 %v7274_v29, %v9111_v13  ;;  %v8855_v31 = vand.u32 4294901760, %v7298_v45  ;;  %v553_v40 = vadd.f32 %v521_v51, %v456_v61  ;;  %v457_v39 = vmul.f32 %v7003_v38, %v424_v62 }
  0xe4   : > { %9112 = vst [vmem:[#allocation51_spill] sm:$0xff] %v7320_v60  ;;  %5626 = vmatprep.subr.bf16.mxu0 %v5625_v11  ;;  %v1042_v43 = vand.u32 4294901760, %v1041_v47  ;;  %v7332_v29 = vsub.f32 %v7291_v41, %v8854_v16  ;;  %v491_v47 = vld [vmem:[%s6925_s0 + $0x88] sm:$0xff]  ;;  %v9113_v51 = vand.u32 4294901760, %v7156_v6  ;;  %v458_v62 = vmul.f32 %v7003_v38, %v425_v4 }
  0xe5   : > { %v1048_v22 = vsub.f32 %v7298_v45, %v8855_v31  ;;  %v7341_v23 = vand.u32 4294901760, %v553_v40  ;;  %v554_v61 = vadd.f32 %v522_v46, %v457_v39  ;;  %v523_v16 = vmul.f32 %v7058_v2, %v490_v57  ;;  %v492_v39 = vld [vmem:[%s6925_s0 + $0x90] sm:$0xff] }
  0xe6   : > { %4934 = vmatmul.mubr.f32.gmra.mrb[4].mxu0 %v9113_v51  ;;  %v9115_v13 = vand.u32 4294901760, %v7203_v36  ;;  %v9116_v31 = vand.u32 4294901760, %v7320_v60  ;;  %v459_v41 = vmul.f32 %v7003_v38, %v426_v10  ;;  %v524_v36 = vmul.f32 %v7058_v2, %v491_v47 }
  0xe7   : > { %9114 = vst [vmem:[#allocation52_spill] sm:$0xff] %v7341_v23  ;;  %5628 = vmatpush3.bf16.msra.mxu0 %v5625_v11  ;;  %v1049_v51 = vand.u32 4294901760, %v1048_v22  ;;  %v7355_v46 = vsub.f32 %v553_v40, %v7341_v23  ;;  %v7357_v4 = vand.u32 4294901760, %v554_v61  ;;  %v555_v57 = vadd.f32 %v523_v16, %v458_v62  ;;  %v427_v11 = vld [vmem:[%s6918_s14 + $0x90] sm:$0xff] }
  0xe8   : > { %4936 = vmatprep.mubr.f32.mxu0 %v9115_v13  ;;  %v7351_v6 = vsub.f32 %v7320_v60, %v9116_v31  ;;  %v9119_v31 = vand.u32 4294901760, %v6951_v14  ;;  %v9120_v10 = vand.u32 4294901760, %v6957_v18  ;;  %v429_v13 = vld [vmem:[%s6918_s14 + $0xa0] sm:$0xff] }
  0xe9   : > { %9117 = vst [vmem:[#allocation53_spill] sm:$0xff] %v7355_v46  ;;  %9118 = vst [vmem:[#allocation54_spill] sm:$0xff] %v7357_v4  ;;  %v5629_v30 = vpack.c.bf16 %v1049_v51, %v1042_v43  ;;  %v8858_v16 = vand.u32 4294901760, %v7355_v46  ;;  %v7375_v47 = vsub.f32 %v554_v61, %v7357_v4  ;;  %v7377_v62 = vand.u32 4294901760, %v555_v57  ;;  %v428_v51 = vld [vmem:[%s6918_s14 + $0x98] sm:$0xff] }
  0xea   : > { %v7366_v22 = vsub.f32 %v6951_v14, %v9119_v31  ;;  %v7371_v40 = vsub.f32 %v6957_v18, %v9120_v10  ;;  %4937 = vmatmul.mubr.f32.gmra.mrb[6].mxu0 %v749_v54  ;;  %v556_v43 = vadd.f32 %v524_v36, %v459_v41  ;;  %v460_v18 = vmul.f32 %v7003_v38, %v427_v11  ;;  %v493_v10 = vld [vmem:[%s6925_s0 + $0x98] sm:$0xff] }
  0xeb   : > { %9121 = vst [vmem:[#allocation55_spill] sm:$0xff] %v7375_v47  ;;  %9122 = vst [vmem:[#allocation56_spill] sm:$0xff] %v7377_v62  ;;  %4939 = vmatprep.mubr.f32.mxu0 %v759_v12  ;;  %5630 = vmatprep.subr.bf16.mxu0 %v5629_v30  ;;  %v525_v54 = vmul.f32 %v7058_v2, %v492_v39  ;;  %v818_v61 = vsub.f32 %v7355_v46, %v8858_v16  ;;  %v9126_v46 = vand.u32 4294901760, %v7375_v47 }
  0xec   : > { %v8863_v14 = vand.u32 4294901760, %v7366_v22  ;;  %v8866_v31 = vand.u32 4294901760, %v7371_v40  ;;  %5632 = vmatpush3.bf16.msra.mxu0 %v5629_v30  ;;  %v7389_v12 = vsub.f32 %v555_v57, %v7377_v62  ;;  %v7391_v36 = vand.u32 4294901760, %v556_v43 }
  0xed   : > { %v557_v39 = vadd.f32 %v525_v54, %v460_v18  ;;  %v461_v16 = vmul.f32 %v7003_v38, %v428_v51  ;;  %v9125_v57 = vand.u32 4294901760, %v7261_v35  ;;  %v819_v41 = vand.u32 4294901760, %v818_v61 }
  0xee   : > { %9123 = vst [vmem:[#allocation57_spill] sm:$0xff] %v7389_v12  ;;  %9124 = vst [vmem:[#allocation58_spill] sm:$0xff] %v7391_v36  ;;  %v1055_v11 = vsub.f32 %v7366_v22, %v8863_v14  ;;  %v1062_v30 = vsub.f32 %v7371_v40, %v8866_v31  ;;  %v7407_v60 = vsub.f32 %v7375_v47, %v9126_v46  ;;  %v8875_v14 = vand.u32 4294901760, %v7389_v12  ;;  %v494_v31 = vld [vmem:[%s6925_s0 + $0xa0] sm:$0xff] }
  0xef   : > { %4940 = vmatmul.mubr.f32.gmra.mrb[8].mxu0 %v9125_v57  ;;  %v7411_v7 = vsub.f32 %v556_v43, %v7391_v36  ;;  %v9128_v18 = vand.u32 4294901760, %v7286_v34  ;;  %v7416_v35 = vand.u32 4294901760, %v557_v39  ;;  %v526_v61 = vmul.f32 %v7058_v2, %v493_v10  ;;  %v430_v57 = vld [vmem:[%s6918_s14 + $0xa8] sm:$0xff] }
  0xf0   : > { %v1056_v51 = vand.u32 4294901760, %v1055_v11  ;;  %v1063_v54 = vand.u32 4294901760, %v1062_v30  ;;  %v829_v46 = vand.u32 4294901760, %v7407_v60  ;;  %v838_v43 = vsub.f32 %v7389_v12, %v8875_v14 }
  0xf1   : > { %9127 = vst [vmem:[#allocation59_spill] sm:$0xff] %v7411_v7  ;;  %4942 = vmatprep.mubr.f32.mxu0 %v9128_v18  ;;  %9129 = vst [vmem:[#allocation60_spill] sm:$0xff] %v7416_v35  ;;  %v8876_v47 = vand.u32 4294901760, %v7411_v7  ;;  %v462_v34 = vmul.f32 %v7003_v38, %v429_v13  ;;  %v7428_v11 = vsub.f32 %v557_v39, %v7416_v35  ;;  %v431_v18 = vld [vmem:[%s6918_s14 + $0xb0] sm:$0xff]  ;;  %v9131_v60 = vand.u32 4294901760, %v7316_v52 }
  0xf2   : > { %v5633_v56 = vpack.c.bf16 %v1063_v54, %v1056_v51  ;;  %v558_v30 = vadd.f32 %v526_v61, %v461_v16  ;;  %v527_v10 = vmul.f32 %v7058_v2, %v494_v31  ;;  %v839_v36 = vand.u32 4294901760, %v838_v43  ;;  %v496_v43 = vld [vmem:[%s6925_s0 + $0xb0] sm:$0xff] }
  0xf3   : > { %9130 = vst [vmem:[#allocation61_spill] sm:$0xff] %v7428_v11  ;;  %4943 = vmatmul.mubr.f32.gmra.mrb[10].mxu0 %v9131_v60  ;;  %v7437_v14 = vsub.f32 %v7411_v7, %v8876_v47  ;;  %v463_v13 = vmul.f32 %v7003_v38, %v430_v57  ;;  %v528_v51 = vmul.f32 %v7058_v2, %v495_v63  ;;  %v9132_v39 = vand.u32 4294901760, %v7332_v29  ;;  %v432_v60 = vld [vmem:[%s6918_s14 + $0xb8] sm:$0xff] }
  0xf4   : > { %5634 = vmatprep.subr.bf16.mxu0 %v5633_v56  ;;  %v8877_v16 = vand.u32 4294901760, %v7428_v11  ;;  %v7444_v31 = vand.u32 4294901760, %v558_v30  ;;  %v559_v52 = vadd.f32 %v527_v10, %v462_v34  ;;  %v9134_v54 = vand.u32 4294901760, %v6960_v20 }
  0xf5   : > { %4945 = vmatprep.mubr.f32.mxu0 %v9132_v39  ;;  %v849_v63 = vand.u32 4294901760, %v7437_v14  ;;  %5636 = vmatpush3.bf16.msra.mxu0 %v5633_v56  ;;  %v560_v29 = vadd.f32 %v528_v51, %v463_v13  ;;  %v9135_v57 = vand.u32 4294901760, %v6962_v21  ;;  %v464_v47 = vmul.f32 %v7003_v38, %v431_v18  ;;  %v497_v56 = vld [vmem:[%s6925_s0 + $0xb8] sm:$0xff] }
  0xf6   : > { %9133 = vst [vmem:[#allocation62_spill] sm:$0xff] %v7444_v31  ;;  %v7449_v61 = vsub.f32 %v6960_v20, %v9134_v54  ;;  %v858_v34 = vsub.f32 %v7428_v11, %v8877_v16  ;;  %v7464_v20 = vsub.f32 %v558_v30, %v7444_v31  ;;  %v7466_v10 = vand.u32 4294901760, %v559_v52  ;;  %v433_v30 = vld [vmem:[%s6918_s14 + $0xc0] sm:$0xff]  ;;  %v434_v16 = vld [vmem:[%s6918_s14 + $0xc8] sm:$0xff] }
  0xf7   : > { %v7457_v39 = vsub.f32 %v6962_v21, %v9135_v57  ;;  %v9138_v13 = vand.u32 4294901760, %v7351_v6  ;;  %v7472_v21 = vand.u32 4294901760, %v560_v29  ;;  %v529_v51 = vmul.f32 %v7058_v2, %v496_v43 }
  0xf8   : > { %9136 = vst [vmem:[#allocation63_spill] sm:$0xff] %v7464_v20  ;;  %9137 = vst [vmem:[#allocation64_spill] sm:$0xff] %v7466_v10  ;;  %v465_v54 = vmul.f32 %v7003_v38, %v432_v60  ;;  %v859_v57 = vand.u32 4294901760, %v858_v34  ;;  %v7480_v14 = vsub.f32 %v559_v52, %v7466_v10  ;;  %v9141_v6 = vand.u32 4294901760, %v7449_v61  ;;  %v498_v34 = vld [vmem:[%s6925_s0 + $0xc0] sm:$0xff] }
  0xf9   : > { %4946 = vmatmul.mubr.f32.gmra.mrb[12].mxu0 %v9138_v13  ;;  %9139 = vst [vmem:[#allocation65_spill] sm:$0xff] %v7472_v21  ;;  %v8888_v18 = vand.u32 4294901760, %v7457_v39  ;;  %v7486_v11 = vsub.f32 %v560_v29, %v7472_v21  ;;  %v561_v60 = vadd.f32 %v529_v51, %v464_v47  ;;  %v9143_v52 = vand.u32 4294901760, %v7464_v20 }
  0xfa   : > { %4948 = vmatprep.mubr.f32.mxu0 %v819_v41  ;;  %9140 = vst [vmem:[#allocation66_spill] sm:$0xff] %v7480_v14  ;;  %v1069_v13 = vsub.f32 %v7449_v61, %v9141_v6  ;;  %v530_v41 = vmul.f32 %v7058_v2, %v497_v56  ;;  %v8891_v12 = vand.u32 4294901760, %v7480_v14  ;;  %v466_v10 = vmul.f32 %v7003_v38, %v433_v30  ;;  %v499_v56 = vld [vmem:[%s6925_s0 + $0xc8] sm:$0xff] }
  0xfb   : > { %9142 = vst [vmem:[#allocation67_spill] sm:$0xff] %v7486_v11  ;;  %v1076_v43 = vsub.f32 %v7457_v39, %v8888_v18  ;;  %v868_v7 = vsub.f32 %v7464_v20, %v9143_v52  ;;  %v8894_v29 = vand.u32 4294901760, %v7486_v11  ;;  %v7500_v18 = vand.u32 4294901760, %v561_v60 }
  0xfc   : > { %v1070_v6 = vand.u32 4294901760, %v1069_v13  ;;  %v562_v47 = vadd.f32 %v530_v41, %v465_v54  ;;  %v878_v52 = vsub.f32 %v7480_v14, %v8891_v12  ;;  %v531_v13 = vmul.f32 %v7058_v2, %v498_v34  ;;  %v500_v14 = vld [vmem:[%s6925_s0 + $0xd0] sm:$0xff] }
  0xfd   : > { %4949 = vmatmul.mubr.f32.gmra.mrb[14].mxu0 %v829_v46  ;;  %v1077_v21 = vand.u32 4294901760, %v1076_v43  ;;  %9144 = vst [vmem:[#allocation68_spill] sm:$0xff] %v7500_v18  ;;  %v869_v51 = vand.u32 4294901760, %v868_v7  ;;  %v467_v30 = vmul.f32 %v7003_v38, %v434_v16  ;;  %v888_v46 = vsub.f32 %v7486_v11, %v8894_v29  ;;  %v435_v7 = vld [vmem:[%s6918_s14 + $0xd0] sm:$0xff]  ;;  %v502_v11 = vld [vmem:[%s6925_s0 + $0xe0] sm:$0xff] }
  0xfe   : > { %4951 = vmatprep.mubr.f32.mxu0 %v839_v36  ;;  %v7512_v54 = vsub.f32 %v561_v60, %v7500_v18  ;;  %v7514_v41 = vand.u32 4294901760, %v562_v47  ;;  %v879_v36 = vand.u32 4294901760, %v878_v52  ;;  %v563_v20 = vadd.f32 %v531_v13, %v466_v10 }
  0xff   : > { %v5637_v43 = vpack.c.bf16 %v1077_v21, %v1070_v6  ;;  %v532_v12 = vmul.f32 %v7058_v2, %v499_v56  ;;  %v9147_v34 = vand.u32 4294901760, %v6972_v26  ;;  %v889_v29 = vand.u32 4294901760, %v888_v46  ;;  %v436_v56 = vld [vmem:[%s6918_s14 + $0xd8] sm:$0xff] }
 0x100   : > { %9145 = vst [vmem:[#allocation69_spill] sm:$0xff] %v7512_v54  ;;  %9146 = vst [vmem:[#allocation70_spill] sm:$0xff] %v7514_v41  ;;  %v8895_v21 = vand.u32 4294901760, %v7512_v54  ;;  %v7526_v60 = vsub.f32 %v562_v47, %v7514_v41  ;;  %v9149_v6 = vand.u32 4294901760, %v6974_v27  ;;  %v468_v13 = vmul.f32 %v7003_v38, %v435_v7  ;;  %v503_v41 = vld [vmem:[%s6925_s0 + $0xe8] sm:$0xff] }
 0x101   : > { %v7521_v16 = vsub.f32 %v6972_v26, %v9147_v34  ;;  %4952 = vmatmul.mubr.f32.gmra.mrb[16].mxu0 %v849_v63  ;;  %5638 = vmatprep.subr.bf16.mxu0 %v5637_v43  ;;  %v7534_v26 = vand.u32 4294901760, %v563_v20  ;;  %v564_v63 = vadd.f32 %v532_v12, %v467_v30  ;;  %v533_v34 = vmul.f32 %v7058_v2, %v500_v14 }
 0x102   : > { %9148 = vst [vmem:[#allocation71_spill] sm:$0xff] %v7526_v60  ;;  %v7531_v10 = vsub.f32 %v6974_v27, %v9149_v6  ;;  %4954 = vmatprep.mubr.f32.mxu0 %v859_v57  ;;  %5640 = vmatpush3.bf16.msra.mxu0 %v5637_v43  ;;  %v898_v47 = vsub.f32 %v7512_v54, %v8895_v21  ;;  %v8907_v46 = vand.u32 4294901760, %v7526_v60  ;;  %v501_v57 = vld [vmem:[%s6925_s0 + $0xd8] sm:$0xff]  ;;  %v437_v6 = vld [vmem:[%s6918_s14 + $0xe0] sm:$0xff] }
 0x103   : > { %9150 = vst [vmem:[#allocation72_spill] sm:$0xff] %v7534_v26  ;;  %v8902_v52 = vand.u32 4294901760, %v7521_v16  ;;  %v7546_v43 = vsub.f32 %v563_v20, %v7534_v26  ;;  %v7548_v12 = vand.u32 4294901760, %v564_v63  ;;  %v469_v7 = vmul.f32 %v7003_v38, %v436_v56 }
 0x104   : > { %v8910_v27 = vand.u32 4294901760, %v7531_v10  ;;  %v899_v21 = vand.u32 4294901760, %v898_v47  ;;  %v908_v14 = vsub.f32 %v7526_v60, %v8907_v46  ;;  %v565_v54 = vadd.f32 %v533_v34, %v468_v13  ;;  %v438_v47 = vld [vmem:[%s6918_s14 + $0xe8] sm:$0xff] }
 0x105   : > { %9151 = vst [vmem:[#allocation73_spill] sm:$0xff] %v7546_v43  ;;  %9152 = vst [vmem:[#allocation74_spill] sm:$0xff] %v7548_v12  ;;  %v1083_v30 = vsub.f32 %v7521_v16, %v8902_v52  ;;  %4955 = vmatmul.mubr.f32.gmra.mrb[18].mxu0 %v869_v51  ;;  %v8915_v26 = vand.u32 4294901760, %v7546_v43  ;;  %v7564_v52 = vsub.f32 %v564_v63, %v7548_v12 }
 0x106   : > { %v1090_v20 = vsub.f32 %v7531_v10, %v8910_v27  ;;  %4957 = vmatprep.mubr.f32.mxu0 %v879_v36  ;;  %v534_v51 = vmul.f32 %v7058_v2, %v501_v57  ;;  %v909_v18 = vand.u32 4294901760, %v908_v14  ;;  %v7569_v60 = vand.u32 4294901760, %v565_v54 }
 0x107   : > { %9153 = vst [vmem:[#allocation75_spill] sm:$0xff] %v7564_v52  ;;  %v1084_v56 = vand.u32 4294901760, %v1083_v30  ;;  %v470_v27 = vmul.f32 %v7003_v38, %v437_v6  ;;  %v918_v36 = vsub.f32 %v7546_v43, %v8915_v26  ;;  %v8913_v13 = vand.u32 4294901760, %v7564_v52 }
 0x108   : > { %v1091_v46 = vand.u32 4294901760, %v1090_v20  ;;  %9154 = vst [vmem:[#allocation76_spill] sm:$0xff] %v7569_v60  ;;  %v566_v63 = vadd.f32 %v534_v51, %v469_v7  ;;  %v535_v34 = vmul.f32 %v7058_v2, %v502_v11  ;;  %v7578_v30 = vsub.f32 %v565_v54, %v7569_v60  ;;  %v439_v20 = vld [vmem:[%s6918_s14 + $0xf0] sm:$0xff] }
 0x109   : > { %4958 = vmatmul.mubr.f32.gmra.mrb[20].mxu0 %v889_v29  ;;  %v471_v14 = vmul.f32 %v7003_v38, %v438_v47  ;;  %v536_v6 = vmul.f32 %v7058_v2, %v503_v41  ;;  %v919_v12 = vand.u32 4294901760, %v918_v36  ;;  %v928_v7 = vsub.f32 %v7564_v52, %v8913_v13  ;;  %v504_v47 = vld [vmem:[%s6925_s0 + $0xf0] sm:$0xff]  ;;  %v440_v36 = vld [vmem:[%s6918_s14 + $0xf8] sm:$0xff] }
 0x10a   : > { %v5641_v57 = vpack.c.bf16 %v1091_v46, %v1084_v56  ;;  %9155 = vst [vmem:[#allocation77_spill] sm:$0xff] %v7578_v30  ;;  %4960 = vmatprep.mubr.f32.mxu0 %v899_v21  ;;  %v7586_v51 = vand.u32 4294901760, %v566_v63  ;;  %v567_v11 = vadd.f32 %v535_v34, %v470_v27  ;;  %v8914_v29 = vand.u32 4294901760, %v7578_v30 }
 0x10b   : > { %v568_v54 = vadd.f32 %v536_v6, %v471_v14  ;;  %v9157_v46 = vand.u32 4294901760, %v6976_v28  ;;  %v9158_v41 = vand.u32 4294901760, %v6988_v33  ;;  %v929_v13 = vand.u32 4294901760, %v928_v7  ;;  %v505_v7 = vld [vmem:[%s6925_s0 + $0xf8] sm:$0xff]  ;;  %s6532_s0 = scalar_lea.vmem %s8736_s15, 128 }
 0x10c   : > { %9156 = vst [vmem:[#allocation78_spill] sm:$0xff] %v7586_v51  ;;  %5642 = vmatprep.subr.bf16.mxu0 %v5641_v57  ;;  %v7602_v27 = vsub.f32 %v566_v63, %v7586_v51  ;;  %v7604_v34 = vand.u32 4294901760, %v567_v11  ;;  %v472_v14 = vmul.f32 %v7003_v38, %v439_v20  ;;  %v537_v20 = vmul.f32 %v7058_v2, %v504_v47  ;;  %p6533_p9 = scmp.ne.s32.totalorder %s8736_s15, %s6532_s0  ;;  %p6540_p1 = scmp.lt.s32.totalorder %s6538_s11, %s6532_s0 }
 0x10d   : > { %v7592_v56 = vsub.f32 %v6976_v28, %v9157_v46  ;;  %v7597_v21 = vsub.f32 %v6988_v33, %v9158_v41  ;;  %5644 = vmatpush3.bf16.msra.mxu0 %v5641_v57  ;;  %v938_v28 = vsub.f32 %v7578_v30, %v8914_v29  ;;  %v7610_v6 = vand.u32 4294901760, %v568_v54 }
 0x10e   : > { %9159 = vst [vmem:[#allocation79_spill] sm:$0xff] %v7604_v34  ;;  %4961 = vmatmul.mubr.f32.gmra.mrb[22].mxu0 %v909_v18  ;;  %v8928_v63 = vand.u32 4294901760, %v7602_v27  ;;  %v7617_v57 = vsub.f32 %v567_v11, %v7604_v34  ;;  %v473_v18 = vmul.f32 %v7003_v38, %v440_v36  ;;  %v569_v30 = vadd.f32 %v537_v20, %v472_v14  ;;  %p6534_p4 = pnand %p6533_p9, %p9391_p12  ;;  %p6541_p2 = por %p6540_p1, %p6539_p0 }
 0x10f   : > { %9160 = vst [vmem:[#allocation80_spill] sm:$0xff] %v7610_v6  ;;  %v8918_v33 = vand.u32 4294901760, %v7592_v56  ;;  %v8919_v46 = vand.u32 4294901760, %v7597_v21  ;;  %4963 = vmatprep.mubr.f32.mxu0 %v919_v12  ;;  %v939_v41 = vand.u32 4294901760, %v938_v28  ;;  %v7622_v29 = vsub.f32 %v568_v54, %v7610_v6 }
 0x110   : > { %v948_v11 = vsub.f32 %v7602_v27, %v8928_v63  ;;  %v8927_v47 = vand.u32 4294901760, %v7617_v57  ;;  %v538_v38 = vmul.f32 %v7058_v2, %v505_v7  ;;  %v7639_v52 = vand.u32 4294901760, %v569_v30  ;;  %v9179_v63 = vld [vmem:[#allocation24_spill] sm:$0xff]  ;;  %p6535_p6 = pneg %p6534_p4 }
 0x111   : > { %v1097_v26 = vsub.f32 %v7592_v56, %v8918_v33  ;;  %v1104_v12 = vsub.f32 %v7597_v21, %v8919_v46  ;;  %v8926_v54 = vand.u32 4294901760, %v7622_v29  ;;  %v5649_v2 = vpack.c.bf16 %v7032_v49, %v7030_v48 }
 0x112   : > { %4964 = vmatmul.mubr.f32.gmra.mrb[24].mxu0 %v929_v13  ;;  %v949_v33 = vand.u32 4294901760, %v948_v11  ;;  %v958_v46 = vsub.f32 %v7617_v57, %v8927_v47  ;;  %9161 = vst [vmem:[#allocation81_spill] sm:$0xff] %v7639_v52  ;;  %v570_v43 = vadd.f32 %v538_v38, %v473_v18  ;;  %v7649_v7 = vsub.f32 %v569_v30, %v7639_v52  ;;  %v9178_v47 = vld [vmem:[#allocation37_spill] sm:$0xff]  ;;  %p6542_p3 = pnand %p6541_p2, %p6535_p6 }
 0x113   : > { %v1098_v36 = vand.u32 4294901760, %v1097_v26  ;;  %v1105_v28 = vand.u32 4294901760, %v1104_v12  ;;  %4966 = vmatprep.mubr.f32.mxu0 %v939_v41  ;;  %v968_v14 = vsub.f32 %v7622_v29, %v8926_v54  ;;  %v5657_v26 = vpack.c.bf16 %v7187_v5, %v7054_v3  ;;  %v9177_v54 = vld [vmem:[#allocation35_spill] sm:$0xff] }
 0x114   : > { %v959_v13 = vand.u32 4294901760, %v958_v46  ;;  %v7651_v41 = vand.u32 4294901760, %v570_v43  ;;  %v5661_v18 = vpack.c.bf16 %v7298_v45, %v7267_v17  ;;  %v5665_v11 = vpack.c.bf16 %v7371_v40, %v7366_v22 }
 0x115   : > { %v5645_v20 = vpack.c.bf16 %v1105_v28, %v1098_v36  ;;  %v969_v12 = vand.u32 4294901760, %v968_v14  ;;  %v8925_v38 = vand.u32 4294901760, %v7649_v7 }
 0x116   : > { %9162 = vst [vmem:[#allocation82_spill] sm:$0xff] %v7651_v41  ;;  %4967 = vmatmul.mubr.f32.gmra.mrb[26].mxu0 %v949_v33  ;;  %v7659_v46 = vsub.f32 %v570_v43, %v7651_v41  ;;  %v5653_v43 = vpack.c.bf16 %v7044_v59, %v7042_v58 }
 0x117   : > { %5646 = vmatprep.subr.bf16.mxu0 %v5645_v20  ;;  %4969 = vmatprep.mubr.f32.mxu0 %v959_v13  ;;  %v978_v30 = vsub.f32 %v7649_v7, %v8925_v38  ;;  %v9163_v13 = vld [vmem:[#allocation58_spill] sm:$0xff]  ;;  %v9176_v38 = vld [vmem:[#allocation23_spill] sm:$0xff] }
 0x118   : > { %5648 = vmatpush3.bf16.msra.mxu0 %v5645_v20  ;;  %v8924_v36 = vand.u32 4294901760, %v7659_v46  ;;  %v5669_v20 = vpack.c.bf16 %v7457_v39, %v7449_v61 }
 0x119   : > { %5650 = vmatprep.subr.bf16.mxu0 %v5649_v2  ;;  %v979_v33 = vand.u32 4294901760, %v978_v30  ;;  %v9167_v30 = vld [vmem:[#allocation70_spill] sm:$0xff] }
 0x11a   : > { %4970 = vmatmul.mubr.f32.gmra.mrb[28].mxu0 %v969_v12  ;;  %v988_v28 = vsub.f32 %v7659_v46, %v8924_v36  ;;  %v9165_v12 = vld [vmem:[#allocation65_spill] sm:$0xff]  ;;  %v9175_v36 = vld [vmem:[#allocation34_spill] sm:$0xff] }
 0x11b   : > { %4972 = vmatprep.mubr.f32.mxu0 %v979_v33  ;;  %v9168_v33 = vld [vmem:[#allocation72_spill] sm:$0xff] }
 0x11c   : > { %v989_v14 = vand.u32 4294901760, %v988_v28  ;;  %v9169_v28 = vld [vmem:[#allocation74_spill] sm:$0xff] }
 0x11e   : > { %4973 = vmatmul.mubr.f32.gmra.mrb[30].mxu0 %v989_v14  ;;  %v9170_v14 = vld [vmem:[#allocation30_spill] sm:$0xff] }
 0x11f   : > { %5007 = vmatprep.mubr.f32.mxu0 %v7077_v53 }
 0x122   : > { %5008 = vmatmul.mubr.f32.vlgmr.msra.gmra.mrb[0].mxu0 %v7079_v55 }
 0x123   : > { %5652 = vmatpush3.bf16.msra.mxu0 %v5649_v2  ;;  %5010 = vmatprep.mubr.f32.mxu0 %v7086_v44  ;;  %v5673_v2 = vpack.c.bf16 %v7531_v10, %v7521_v16 }
 0x124   : > { %5654 = vmatprep.subr.bf16.mxu0 %v5653_v43 }
 0x126   : > { %5011 = vmatmul.mubr.f32.gmra.mrb[2].mxu0 %v7088_v0 }
 0x127   : > { %5013 = vmatprep.mubr.f32.mxu0 %v7090_v9  ;;  %5656 = vmatpush3.bf16.msra.mxu0 %v5653_v43  ;;  %v9171_v43 = vld [vmem:[#allocation31_spill] sm:$0xff] }
 0x128   : > { %5658 = vmatprep.subr.bf16.mxu0 %v5657_v26 }
 0x12a   : > { %5014 = vmatmul.mubr.f32.gmra.mrb[4].mxu0 %v7092_v50 }
 0x12b   : > { %5016 = vmatprep.mubr.f32.mxu0 %v7161_v32  ;;  %5660 = vmatpush3.bf16.msra.mxu0 %v5657_v26  ;;  %v5677_v26 = vpack.c.bf16 %v7597_v21, %v7592_v56  ;;  %v9212_v32 = vand.u32 4294901760, %v7187_v5  ;;  %v9220_v5 = vand.u32 4294901760, %v7371_v40  ;;  %v9227_v40 = vand.u32 4294901760, %v7521_v16 }
 0x12c   : > { %5662 = vmatprep.subr.bf16.mxu0 %v5661_v18 }
 0x12e   : > { %5017 = vmatmul.mubr.f32.gmra.mrb[6].mxu0 %v7205_v42 }
 0x12f   : > { %5019 = vmatprep.mubr.f32.mxu0 %v7209_v19  ;;  %5664 = vmatpush3.bf16.msra.mxu0 %v5661_v18  ;;  %v9164_v18 = vld [vmem:[#allocation64_spill] sm:$0xff]  ;;  %v9209_v19 = vand.u32 4294901760, %v9171_v43 }
 0x130   : > { %5666 = vmatprep.subr.bf16.mxu0 %v5665_v11 }
 0x132   : > { %5020 = vmatmul.mubr.f32.gmra.mrb[8].mxu0 %v7211_v24  ;;  %v9208_v24 = vand.u32 4294901760, %v7044_v59  ;;  %v9215_v59 = vand.u32 4294901760, %v7267_v17 }
 0x133   : > { %5022 = vmatprep.mubr.f32.mxu0 %v7230_v25  ;;  %5668 = vmatpush3.bf16.msra.mxu0 %v5665_v11  ;;  %v9166_v11 = vld [vmem:[#allocation68_spill] sm:$0xff]  ;;  %v9207_v25 = vand.u32 4294901760, %v7042_v58  ;;  %v9214_v58 = vand.u32 4294901760, %v9175_v36 }
 0x134   : > { %5670 = vmatprep.subr.bf16.mxu0 %v5669_v20 }
 0x136   : > { %5023 = vmatmul.mubr.f32.gmra.mrb[10].mxu0 %v7248_v1  ;;  %v9200_v1 = vld [vmem:[#allocation67_spill] sm:$0xff] }
 0x137   : > { %5025 = vmatprep.mubr.f32.mxu0 %v7276_v37  ;;  %5672 = vmatpush3.bf16.msra.mxu0 %v5669_v20  ;;  %v9172_v20 = vld [vmem:[#allocation32_spill] sm:$0xff]  ;;  %v9198_v37 = vld [vmem:[#allocation63_spill] sm:$0xff] }
 0x138   : > { %5674 = vmatprep.subr.bf16.mxu0 %v5673_v2  ;;  %v9210_v42 = vand.u32 4294901760, %v9172_v20 }
 0x13a   : > { %5026 = vmatmul.mubr.f32.gmra.mrb[12].mxu0 %v7293_v8  ;;  %v9197_v8 = vld [vmem:[#allocation61_spill] sm:$0xff] }
 0x13b   : > { %5028 = vmatprep.mubr.f32.mxu0 %v7341_v23  ;;  %5676 = vmatpush3.bf16.msra.mxu0 %v5673_v2  ;;  %v9173_v2 = vld [vmem:[#allocation22_spill] sm:$0xff]  ;;  %v9196_v23 = vld [vmem:[#allocation59_spill] sm:$0xff] }
 0x13c   : > { %5678 = vmatprep.subr.bf16.mxu0 %v5677_v26 }
 0x13e   : > { %5029 = vmatmul.mubr.f32.gmra.mrb[14].mxu0 %v7357_v4  ;;  %v9195_v4 = vld [vmem:[#allocation57_spill] sm:$0xff] }
 0x13f   : > { %5031 = vmatprep.mubr.f32.mxu0 %v7377_v62  ;;  %5680 = vmatpush3.bf16.msra.mxu0 %v5677_v26  ;;  %v9174_v26 = vld [vmem:[#allocation33_spill] sm:$0xff]  ;;  %v9194_v62 = vld [vmem:[#allocation55_spill] sm:$0xff] }
 0x140   : > { %5682 = vmatprep.subr.bf16.mxu0 %v6953_v15 }
 0x142   : > { %5032 = vmatmul.mubr.f32.gmra.mrb[16].mxu0 %v9163_v13 }
 0x143   : > { %5034 = vmatprep.mubr.f32.mxu0 %v7416_v35  ;;  %v9193_v35 = vand.u32 4294901760, %v7032_v49  ;;  %v9202_v49 = vld [vmem:[#allocation71_spill] sm:$0xff] }
 0x146   : > { %5035 = vmatmul.mubr.f32.gmra.mrb[18].mxu0 %v7444_v31  ;;  %v9192_v31 = vand.u32 4294901760, %v7030_v48  ;;  %v9201_v48 = vld [vmem:[#allocation69_spill] sm:$0xff] }
 0x147   : > { %5037 = vmatprep.mubr.f32.mxu0 %v9164_v18  ;;  %v9191_v18 = vld [vmem:[#allocation28_spill] sm:$0xff] }
 0x148   : > { %v5713_v13 = vpack.c.bf16 %v9193_v35, %v9192_v31  ;;  %v9203_v35 = vld [vmem:[#allocation73_spill] sm:$0xff]  ;;  %v9204_v31 = vld [vmem:[#allocation75_spill] sm:$0xff] }
 0x14a   : > { %5038 = vmatmul.mubr.f32.gmra.mrb[20].mxu0 %v9165_v12  ;;  %v9190_v12 = vld [vmem:[#allocation53_spill] sm:$0xff] }
 0x14b   : > { %5040 = vmatprep.mubr.f32.mxu0 %v9166_v11  ;;  %v9189_v11 = vld [vmem:[#allocation51_spill] sm:$0xff]  ;;  %v9234_v16 = vand.u32 4294901760, %v9190_v12 }
 0x14e   : > { %5041 = vmatmul.mubr.f32.gmra.mrb[22].mxu0 %v9167_v30  ;;  %v9188_v30 = vld [vmem:[#allocation27_spill] sm:$0xff] }
 0x14f   : > { %5043 = vmatprep.mubr.f32.mxu0 %v9168_v33  ;;  %v9187_v33 = vld [vmem:[#allocation49_spill] sm:$0xff] }
 0x152   : > { %5044 = vmatmul.mubr.f32.gmra.mrb[24].mxu0 %v9169_v28  ;;  %v9186_v28 = vld [vmem:[#allocation47_spill] sm:$0xff] }
 0x153   : > { %5046 = vmatprep.mubr.f32.mxu0 %v7569_v60  ;;  %v9185_v60 = vld [vmem:[#allocation26_spill] sm:$0xff] }
 0x156   : > { %5047 = vmatmul.mubr.f32.gmra.mrb[26].mxu0 %v7586_v51  ;;  %v9184_v51 = vld [vmem:[#allocation45_spill] sm:$0xff] }
 0x157   : > { %5049 = vmatprep.mubr.f32.mxu0 %v7604_v34  ;;  %v9183_v34 = vld [vmem:[#allocation43_spill] sm:$0xff] }
 0x15a   : > { %5050 = vmatmul.mubr.f32.gmra.mrb[28].mxu0 %v7610_v6  ;;  %v9182_v6 = vld [vmem:[#allocation25_spill] sm:$0xff] }
 0x15b   : > { %5052 = vmatprep.mubr.f32.mxu0 %v7639_v52  ;;  %v9181_v52 = vld [vmem:[#allocation42_spill] sm:$0xff] }
 0x15c   : > { %v9222_v17 = vand.u32 4294901760, %v9181_v52 }
 0x15e   : > { %5053 = vmatmul.mubr.f32.gmra.mrb[30].mxu0 %v7651_v41  ;;  %v9180_v41 = vld [vmem:[#allocation41_spill] sm:$0xff] }
 0x15f   : > { %5087 = vmatprep.mubr.f32.mxu0 %v9170_v14 }
 0x162   : > { %5088 = vmatmul.mubr.f32.vlgmr.msra.gmra.mrb[0].mxu0 %v9171_v43  ;;  %v9251_v43 = vand.u32 4294901760, %v7659_v46 }
 0x163   : > { %5684 = vmatpush3.bf16.msra.mxu0 %v6953_v15  ;;  %5090 = vmatprep.mubr.f32.mxu0 %v9172_v20  ;;  %v9259_v20 = vld [vmem:[#allocation44_spill] sm:$0xff] }
 0x164   : > { %5686 = vmatprep.subr.bf16.mxu0 %v9173_v2 }
 0x166   : > { %5091 = vmatmul.mubr.f32.gmra.mrb[2].mxu0 %v9174_v26 }
 0x167   : > { %5093 = vmatprep.mubr.f32.mxu0 %v9175_v36  ;;  %5688 = vmatpush3.bf16.msra.mxu0 %v9173_v2  ;;  %v9233_v36 = vand.u32 4294901760, %v9189_v11 }
 0x168   : > { %5690 = vmatprep.subr.bf16.mxu0 %v9176_v38 }
 0x16a   : > { %5094 = vmatmul.mubr.f32.gmra.mrb[4].mxu0 %v9177_v54 }
 0x16b   : > { %5096 = vmatprep.mubr.f32.mxu0 %v9178_v47  ;;  %5692 = vmatpush3.bf16.msra.mxu0 %v9176_v38 }
 0x16c   : > { %5694 = vmatprep.subr.bf16.mxu0 %v9179_v63 }
 0x16e   : > { %5097 = vmatmul.mubr.f32.gmra.mrb[6].mxu0 %v9180_v41 }
 0x16f   : > { %5099 = vmatprep.mubr.f32.mxu0 %v9181_v52  ;;  %5696 = vmatpush3.bf16.msra.mxu0 %v9179_v63  ;;  %v9211_v63 = vand.u32 4294901760, %v7054_v3  ;;  %v9218_v3 = vand.u32 4294901760, %v9178_v47  ;;  %v9228_v52 = vand.u32 4294901760, %v7531_v10  ;;  %v9235_v10 = vand.u32 4294901760, %v9194_v62 }
 0x170   : > { %5698 = vmatprep.subr.bf16.mxu0 %v9182_v6 }
 0x171   : > { %v5721_v50 = vpack.c.bf16 %v9212_v32, %v9211_v63  ;;  %v9219_v32 = vand.u32 4294901760, %v7366_v22  ;;  %v9224_v63 = vand.u32 4294901760, %v7457_v39  ;;  %v9226_v22 = vand.u32 4294901760, %v9184_v51 }
 0x172   : > { %5100 = vmatmul.mubr.f32.gmra.mrb[8].mxu0 %v9183_v34  ;;  %v9231_v39 = vand.u32 4294901760, %v7592_v56  ;;  %v9237_v56 = vand.u32 4294901760, %v9196_v23 }
 0x173   : > { %5102 = vmatprep.mubr.f32.mxu0 %v9184_v51  ;;  %5700 = vmatpush3.bf16.msra.mxu0 %v9182_v6  ;;  %v5717_v6 = vpack.c.bf16 %v9208_v24, %v9207_v25  ;;  %v9216_v25 = vand.u32 4294901760, %v7298_v45  ;;  %v5729_v24 = vpack.c.bf16 %v9220_v5, %v9219_v32  ;;  %v9223_v45 = vand.u32 4294901760, %v7449_v61  ;;  %v9274_v32 = vld [vmem:[#allocation68_spill] sm:$0xff]  ;;  %v9275_v5 = vld [vmem:[#allocation70_spill] sm:$0xff] }
 0x174   : > { %5702 = vmatprep.subr.bf16.mxu0 %v9185_v60  ;;  %v9230_v61 = vand.u32 4294901760, %v9187_v33  ;;  %v9232_v51 = vand.u32 4294901760, %v7597_v21  ;;  %v9238_v21 = vand.u32 4294901760, %v9197_v8 }
 0x175   : > { %v5733_v47 = vpack.c.bf16 %v9224_v63, %v9223_v45  ;;  %v9279_v45 = vld [vmem:[#allocation78_spill] sm:$0xff]  ;;  %v9280_v63 = vld [vmem:[#allocation79_spill] sm:$0xff] }
 0x176   : > { %5103 = vmatmul.mubr.f32.gmra.mrb[10].mxu0 %v9186_v28 }
 0x177   : > { %5105 = vmatprep.mubr.f32.mxu0 %v9187_v33  ;;  %5704 = vmatpush3.bf16.msra.mxu0 %v9185_v60  ;;  %v9206_v60 = vand.u32 4294901760, %v9170_v14  ;;  %v9243_v33 = vand.u32 4294901760, %v9202_v49  ;;  %v9250_v14 = vand.u32 4294901760, %v7649_v7 }
 0x178   : > { %5706 = vmatprep.subr.bf16.mxu0 %v9188_v30 }
 0x17a   : > { %5106 = vmatmul.mubr.f32.gmra.mrb[12].mxu0 %v9189_v11 }
 0x17b   : > { %5108 = vmatprep.mubr.f32.mxu0 %v9190_v12  ;;  %5708 = vmatpush3.bf16.msra.mxu0 %v9188_v30  ;;  %v9199_v30 = vld [vmem:[#allocation66_spill] sm:$0xff]  ;;  %v9239_v12 = vand.u32 4294901760, %v9198_v37 }
 0x17c   : > { %5710 = vmatprep.subr.bf16.mxu0 %v9191_v18  ;;  %v9240_v11 = vand.u32 4294901760, %v9199_v30 }
 0x17e   : > { %5109 = vmatmul.mubr.f32.gmra.mrb[14].mxu0 %v9194_v62  ;;  %v9241_v62 = vand.u32 4294901760, %v9200_v1 }
 0x17f   : > { %5111 = vmatprep.mubr.f32.mxu0 %v9195_v4  ;;  %5712 = vmatpush3.bf16.msra.mxu0 %v9191_v18  ;;  %v9205_v18 = vld [vmem:[#allocation77_spill] sm:$0xff] }
 0x180   : > { %5714 = vmatprep.subr.bf16.mxu0 %v5713_v13 }
 0x182   : > { %5112 = vmatmul.mubr.f32.gmra.mrb[16].mxu0 %v9196_v23  ;;  %v9244_v23 = vand.u32 4294901760, %v9203_v35 }
 0x183   : > { %5114 = vmatprep.mubr.f32.mxu0 %v9197_v8  ;;  %v9245_v8 = vand.u32 4294901760, %v9204_v31 }
 0x186   : > { %5115 = vmatmul.mubr.f32.gmra.mrb[18].mxu0 %v9198_v37  ;;  %v9246_v37 = vand.u32 4294901760, %v9205_v18 }
 0x187   : > { %5117 = vmatprep.mubr.f32.mxu0 %v9199_v30  ;;  %v9247_v30 = vand.u32 4294901760, %v7602_v27 }
 0x18a   : > { %5118 = vmatmul.mubr.f32.gmra.mrb[20].mxu0 %v9200_v1  ;;  %v9248_v1 = vand.u32 4294901760, %v7617_v57 }
 0x18b   : > { %5120 = vmatprep.mubr.f32.mxu0 %v9201_v48 }
 0x18e   : > { %5121 = vmatmul.mubr.f32.gmra.mrb[22].mxu0 %v9202_v49  ;;  %v9264_v49 = vld [vmem:[#allocation50_spill] sm:$0xff] }
 0x18f   : > { %5123 = vmatprep.mubr.f32.mxu0 %v9203_v35  ;;  %v9265_v35 = vld [vmem:[#allocation52_spill] sm:$0xff] }
 0x192   : > { %5124 = vmatmul.mubr.f32.gmra.mrb[24].mxu0 %v9204_v31  ;;  %v9266_v31 = vld [vmem:[#allocation28_spill] sm:$0xff] }
 0x193   : > { %5126 = vmatprep.mubr.f32.mxu0 %v9205_v18  ;;  %v9258_v18 = vld [vmem:[#allocation40_spill] sm:$0xff] }
 0x196   : > { %5127 = vmatmul.mubr.f32.gmra.mrb[26].mxu0 %v7602_v27  ;;  %v9253_v27 = vld [vmem:[#allocation36_spill] sm:$0xff] }
 0x197   : > { %5129 = vmatprep.mubr.f32.mxu0 %v7617_v57  ;;  %v9254_v57 = vld [vmem:[#allocation24_spill] sm:$0xff] }
 0x19a   : > { %5130 = vmatmul.mubr.f32.gmra.mrb[28].mxu0 %v7622_v29 }
 0x19b   : > { %5132 = vmatprep.mubr.f32.mxu0 %v7649_v7  ;;  %v9256_v7 = vld [vmem:[#allocation39_spill] sm:$0xff] }
 0x19e   : > { %5133 = vmatmul.mubr.f32.gmra.mrb[30].mxu0 %v7659_v46  ;;  %v9257_v46 = vld [vmem:[#allocation25_spill] sm:$0xff] }
 0x19f   : > { %5167 = vmatprep.mubr.f32.mxu0 %v9206_v60  ;;  %v9213_v60 = vand.u32 4294901760, %v9174_v26  ;;  %v9261_v26 = vld [vmem:[#allocation46_spill] sm:$0xff] }
 0x1a2   : > { %5168 = vmatmul.mubr.f32.vlgmr.msra.gmra.mrb[0].mxu0 %v9209_v19  ;;  %v5725_v19 = vpack.c.bf16 %v9216_v25, %v9215_v59  ;;  %v9269_v59 = vld [vmem:[#allocation58_spill] sm:$0xff]  ;;  %v9270_v25 = vld [vmem:[#allocation60_spill] sm:$0xff] }
 0x1a3   : > { %5716 = vmatpush3.bf16.msra.mxu0 %v5713_v13  ;;  %5170 = vmatprep.mubr.f32.mxu0 %v9210_v42  ;;  %v9217_v42 = vand.u32 4294901760, %v9177_v54  ;;  %v5737_v54 = vpack.c.bf16 %v9228_v52, %v9227_v40  ;;  %v9236_v13 = vand.u32 4294901760, %v9195_v4  ;;  %v9242_v4 = vand.u32 4294901760, %v9201_v48  ;;  %v9263_v48 = vld [vmem:[#allocation27_spill] sm:$0xff]  ;;  %v2600_v52 = vld [vmem:[%s8783_s5] sm:$0xff] }
 0x1a4   : > { %5718 = vmatprep.subr.bf16.mxu0 %v5717_v6 }
 0x1a6   : > { %5171 = vmatmul.mubr.f32.gmra.mrb[2].mxu0 %v9213_v60  ;;  %v9267_v60 = vld [vmem:[#allocation54_spill] sm:$0xff] }
 0x1a7   : > { %5173 = vmatprep.mubr.f32.mxu0 %v9214_v58  ;;  %5720 = vmatpush3.bf16.msra.mxu0 %v5717_v6  ;;  %v9221_v6 = vand.u32 4294901760, %v9180_v41  ;;  %v9229_v41 = vand.u32 4294901760, %v9186_v28  ;;  %v9249_v28 = vand.u32 4294901760, %v7622_v29  ;;  %v9252_v29 = vld [vmem:[#allocation29_spill] sm:$0xff]  ;;  %v9268_v58 = vld [vmem:[#allocation56_spill] sm:$0xff] }
 0x1a8   : > { %5722 = vmatprep.subr.bf16.mxu0 %v5721_v50 }
 0x1aa   : > { %5174 = vmatmul.mubr.f32.gmra.mrb[4].mxu0 %v9217_v42  ;;  %v9272_v42 = vld [vmem:[#allocation64_spill] sm:$0xff] }
 0x1ab   : > { %5176 = vmatprep.mubr.f32.mxu0 %v9218_v3  ;;  %5724 = vmatpush3.bf16.msra.mxu0 %v5721_v50  ;;  %v9225_v50 = vand.u32 4294901760, %v9183_v34  ;;  %v5741_v34 = vpack.c.bf16 %v9232_v51, %v9231_v39  ;;  %v9273_v3 = vld [vmem:[#allocation65_spill] sm:$0xff] }
 0x1ac   : > { %5726 = vmatprep.subr.bf16.mxu0 %v5725_v19 }
 0x1ae   : > { %5177 = vmatmul.mubr.f32.gmra.mrb[6].mxu0 %v9221_v6  ;;  %v9277_v6 = vld [vmem:[#allocation74_spill] sm:$0xff] }
 0x1af   : > { %5179 = vmatprep.mubr.f32.mxu0 %v9222_v17  ;;  %5728 = vmatpush3.bf16.msra.mxu0 %v5725_v19  ;;  %v9271_v19 = vld [vmem:[#allocation62_spill] sm:$0xff]  ;;  %v9278_v17 = vld [vmem:[#allocation76_spill] sm:$0xff] }
 0x1b0   : > { %5730 = vmatprep.subr.bf16.mxu0 %v5729_v24 }
 0x1b2   : > { %5180 = vmatmul.mubr.f32.gmra.mrb[8].mxu0 %v9225_v50  ;;  %v9282_v50 = vld [vmem:[#allocation81_spill] sm:$0xff] }
 0x1b3   : > { %5182 = vmatprep.mubr.f32.mxu0 %v9226_v22  ;;  %5732 = vmatpush3.bf16.msra.mxu0 %v5729_v24  ;;  %v9276_v24 = vld [vmem:[#allocation72_spill] sm:$0xff]  ;;  %v9283_v22 = vld [vmem:[#allocation82_spill] sm:$0xff] }
 0x1b4   : > { %5734 = vmatprep.subr.bf16.mxu0 %v5733_v47 }
 0x1b6   : > { %5183 = vmatmul.mubr.f32.gmra.mrb[10].mxu0 %v9229_v41  ;;  %v7952_v41 = vld [vmem:[%s8782_s4] ss:$0 sm:$0xff] }
 0x1b7   : > { %5185 = vmatprep.mubr.f32.mxu0 %v9230_v61  ;;  %5736 = vmatpush3.bf16.msra.mxu0 %v5733_v47  ;;  %v9281_v47 = vld [vmem:[#allocation80_spill] sm:$0xff] }
 0x1b8   : > { %5738 = vmatprep.subr.bf16.mxu0 %v5737_v54 }
 0x1ba   : > { %5186 = vmatmul.mubr.f32.gmra.mrb[12].mxu0 %v9233_v36 }
 0x1bb   : > { %5188 = vmatprep.mubr.f32.mxu0 %v9234_v16  ;;  %5740 = vmatpush3.bf16.msra.mxu0 %v5737_v54  ;;  %v7947_v54 = vand.u32 4294901760, %v2600_v52 }
 0x1bc   : > { %5742 = vmatprep.subr.bf16.mxu0 %v5741_v34 }
 0x1bd   : > { %9285 = vst [vmem:[#allocation31_spill] sm:$0xff] %v7947_v54  ;;  %v7955_v61 = vsub.f32 %v2600_v52, %v7947_v54 }
 0x1be   : > { %5189 = vmatmul.mubr.f32.gmra.mrb[14].mxu0 %v9235_v10 }
 0x1bf   : > { %5191 = vmatprep.mubr.f32.mxu0 %v9236_v13  ;;  %5744 = vmatpush3.bf16.msra.mxu0 %v5741_v34  ;;  %9286 = vst [vmem:[#allocation32_spill] sm:$0xff] %v7955_v61  ;;  %v8974_v10 = vand.u32 4294901760, %v7955_v61 }
 0x1c0   : > { %5746 = vmatprep.subr.bf16.mxu0 %v6953_v15 }
 0x1c2   : > { %5192 = vmatmul.mubr.f32.gmra.mrb[16].mxu0 %v9237_v56 }
 0x1c3   : > { %5194 = vmatprep.mubr.f32.mxu0 %v9238_v21 }
 0x1c6   : > { %5195 = vmatmul.mubr.f32.gmra.mrb[18].mxu0 %v9239_v12 }
 0x1c7   : > { %5197 = vmatprep.mubr.f32.mxu0 %v9240_v11 }
 0x1ca   : > { %5198 = vmatmul.mubr.f32.gmra.mrb[20].mxu0 %v9241_v62 }
 0x1cb   : > { %5200 = vmatprep.mubr.f32.mxu0 %v9242_v4 }
 0x1ce   : > { %5201 = vmatmul.mubr.f32.gmra.mrb[22].mxu0 %v9243_v33 }
 0x1cf   : > { %5203 = vmatprep.mubr.f32.mxu0 %v9244_v23 }
 0x1d2   : > { %5204 = vmatmul.mubr.f32.gmra.mrb[24].mxu0 %v9245_v8  ;;  %v7967_v8 = vsub.f32 %v7955_v61, %v8974_v10 }
 0x1d3   : > { %5206 = vmatprep.mubr.f32.mxu0 %v9246_v37 }
 0x1d6   : > { %5207 = vmatmul.mubr.f32.gmra.mrb[26].mxu0 %v9247_v30 }
 0x1d7   : > { %5209 = vmatprep.mubr.f32.mxu0 %v9248_v1 }
 0x1da   : > { %5210 = vmatmul.mubr.f32.gmra.mrb[28].mxu0 %v9249_v28 }
 0x1db   : > { %5212 = vmatprep.mubr.f32.mxu0 %v9250_v14 }
 0x1de   : > { %5213 = vmatmul.mubr.f32.gmra.mrb[30].mxu0 %v9251_v43 }
 0x1df   : > { %5247 = vmatprep.mubr.f32.mxu0 %v7077_v53 }
 0x1e2   : > { %5248 = vmatmul.mubr.f32.vlgmr.msra.gmra.mrb[0].mxu0 %v7079_v55 }
 0x1e3   : > { %5748 = vmatpush3.bf16.msra.mxu0 %v6953_v15  ;;  %5250 = vmatprep.mubr.f32.mxu0 %v7086_v44  ;;  %v9255_v15 = vld [vmem:[#allocation38_spill] sm:$0xff] }
 0x1e4   : > { %5750 = vmatprep.subr.bf16.mxu0 %v9173_v2 }
 0x1e6   : > { %5251 = vmatmul.mubr.f32.gmra.mrb[2].mxu0 %v7088_v0 }
 0x1e7   : > { %5253 = vmatprep.mubr.f32.mxu0 %v7090_v9  ;;  %5752 = vmatpush3.bf16.msra.mxu0 %v9173_v2  ;;  %v9260_v2 = vld [vmem:[#allocation26_spill] sm:$0xff] }
 0x1e8   : > { %5754 = vmatprep.subr.bf16.mxu0 %v9176_v38 }
 0x1ea   : > { %5254 = vmatmul.mubr.f32.gmra.mrb[4].mxu0 %v9252_v29 }
 0x1eb   : > { %5256 = vmatprep.mubr.f32.mxu0 %v9253_v27  ;;  %5756 = vmatpush3.bf16.msra.mxu0 %v9176_v38  ;;  %v9262_v38 = vld [vmem:[#allocation48_spill] sm:$0xff] }
 0x1ec   : > { %5758 = vmatprep.subr.bf16.mxu0 %v9254_v57 }
 0x1ee   : > { %5257 = vmatmul.mubr.f32.gmra.mrb[6].mxu0 %v9255_v15 }
 0x1ef   : > { %5259 = vmatprep.mubr.f32.mxu0 %v9256_v7  ;;  %5760 = vmatpush3.bf16.msra.mxu0 %v9254_v57 }
 0x1f0   : > { %5762 = vmatprep.subr.bf16.mxu0 %v9257_v46 }
 0x1f2   : > { %5260 = vmatmul.mubr.f32.gmra.mrb[8].mxu0 %v9258_v18 }
 0x1f3   : > { %5262 = vmatprep.mubr.f32.mxu0 %v9259_v20  ;;  %5764 = vmatpush3.bf16.msra.mxu0 %v9257_v46 }
 0x1f4   : > { %5766 = vmatprep.subr.bf16.mxu0 %v9260_v2 }
 0x1f6   : > { %5263 = vmatmul.mubr.f32.gmra.mrb[10].mxu0 %v9261_v26 }
 0x1f7   : > { %5265 = vmatprep.mubr.f32.mxu0 %v9262_v38  ;;  %5768 = vmatpush3.bf16.msra.mxu0 %v9260_v2 }
 0x1f8   : > { %5770 = vmatprep.subr.bf16.mxu0 %v9263_v48 }
 0x1fa   : > { %5266 = vmatmul.mubr.f32.gmra.mrb[12].mxu0 %v9264_v49 }
 0x1fb   : > { %5268 = vmatprep.mubr.f32.mxu0 %v9265_v35  ;;  %5772 = vmatpush3.bf16.msra.mxu0 %v9263_v48 }
 0x1fc   : > { %5774 = vmatprep.subr.bf16.mxu0 %v9266_v31 }
 0x1fe   : > { %5269 = vmatmul.mubr.f32.gmra.mrb[14].mxu0 %v9267_v60 }
 0x1ff   : > { %5271 = vmatprep.mubr.f32.mxu0 %v9268_v58  ;;  %5776 = vmatpush3.bf16.msra.mxu0 %v9266_v31 }
 0x202   : > { %5272 = vmatmul.mubr.f32.gmra.mrb[16].mxu0 %v9269_v59 }
 0x203   : > { %5274 = vmatprep.mubr.f32.mxu0 %v9270_v25 }
 0x206   : > { %5275 = vmatmul.mubr.f32.gmra.mrb[18].mxu0 %v9271_v19 }
 0x207   : > { %5277 = vmatprep.mubr.f32.mxu0 %v9272_v42 }
 0x20a   : > { %5278 = vmatmul.mubr.f32.gmra.mrb[20].mxu0 %v9273_v3 }
 0x20b   : > { %5280 = vmatprep.mubr.f32.mxu0 %v9274_v32 }
 0x20e   : > { %5281 = vmatmul.mubr.f32.gmra.mrb[22].mxu0 %v9275_v5 }
 0x20f   : > { %5283 = vmatprep.mubr.f32.mxu0 %v9276_v24 }
 0x212   : > { %5284 = vmatmul.mubr.f32.gmra.mrb[24].mxu0 %v9277_v6 }
 0x213   : > { %5286 = vmatprep.mubr.f32.mxu0 %v9278_v17 }
 0x216   : > { %5287 = vmatmul.mubr.f32.gmra.mrb[26].mxu0 %v9279_v45 }
 0x217   : > { %5289 = vmatprep.mubr.f32.mxu0 %v9280_v63 }
 0x21a   : > { %5290 = vmatmul.mubr.f32.gmra.mrb[28].mxu0 %v9281_v47 }
 0x21b   : > { %5292 = vmatprep.mubr.f32.mxu0 %v9282_v50 }
 0x21e   : > { %5293 = vmatmul.mubr.f32.gmra.mrb[30].mxu0 %v9283_v22 }
 0x21f   : > { %5327 = vmatprep.mubr.f32.mxu0 %v7077_v53  ;;  %v2601_v53 = vld [vmem:[%s8783_s5 + $0x8] sm:$0xff] }
 0x222   : > { %5328 = vmatmul.mubr.f32.vlgmr.msra.gmra.mrb[0].mxu0 %v7079_v55  ;;  %v7935_v55 = vand.u32 4294901760, %v2601_v53 }
 0x223   : > { %5330 = vmatprep.mubr.f32.mxu0 %v7086_v44 }
 0x224   : > { %v7938_v44 = vsub.f32 %v2601_v53, %v7935_v55 }
 0x226   : > { %5331 = vmatmul.mubr.f32.gmra.mrb[2].mxu0 %v7088_v0  ;;  %9284 = vst [vmem:[#allocation30_spill] sm:$0xff] %v7938_v44  ;;  %v8975_v0 = vand.u32 4294901760, %v7938_v44 }
 0x227   : > { %5333 = vmatprep.mubr.f32.mxu0 %v7090_v9 }
 0x228   : > { %v2701_v9 = vsub.f32 %v7938_v44, %v8975_v0 }
 0x22a   : > { %5334 = vmatmul.mubr.f32.gmra.mrb[4].mxu0 %v9252_v29  ;;  %v2702_v40 = vand.u32 4294901760, %v2701_v9 }
 0x22b   : > { %5336 = vmatprep.mubr.f32.mxu0 %v9253_v27 }
 0x22c   : > { %2703 = vmatprep.mubr.f32.mxu1 %v2702_v40 }
 0x22e   : > { %5337 = vmatmul.mubr.f32.gmra.mrb[6].mxu0 %v9255_v15 }
 0x22f   : > { %5339 = vmatprep.mubr.f32.mxu0 %v9256_v7 }
 0x232   : > { %5340 = vmatmul.mubr.f32.gmra.mrb[8].mxu0 %v9258_v18 }
 0x233   : > { %5342 = vmatprep.mubr.f32.mxu0 %v9259_v20 }
 0x236   : > { %5343 = vmatmul.mubr.f32.gmra.mrb[10].mxu0 %v9261_v26 }
 0x237   : > { %5345 = vmatprep.mubr.f32.mxu0 %v9262_v38 }
 0x23a   : > { %5346 = vmatmul.mubr.f32.gmra.mrb[12].mxu0 %v9264_v49 }
 0x23b   : > { %5348 = vmatprep.mubr.f32.mxu0 %v9265_v35 }
 0x23e   : > { %5349 = vmatmul.mubr.f32.gmra.mrb[14].mxu0 %v9267_v60 }
 0x23f   : > { %5351 = vmatprep.mubr.f32.mxu0 %v9268_v58 }
 0x242   : > { %5352 = vmatmul.mubr.f32.gmra.mrb[16].mxu0 %v9269_v59 }
 0x243   : > { %5354 = vmatprep.mubr.f32.mxu0 %v9270_v25 }
 0x246   : > { %5355 = vmatmul.mubr.f32.gmra.mrb[18].mxu0 %v9271_v19 }
 0x247   : > { %5357 = vmatprep.mubr.f32.mxu0 %v9272_v42 }
 0x24a   : > { %5358 = vmatmul.mubr.f32.gmra.mrb[20].mxu0 %v9273_v3 }
 0x24b   : > { %5360 = vmatprep.mubr.f32.mxu0 %v9274_v32 }
 0x24e   : > { %5361 = vmatmul.mubr.f32.gmra.mrb[22].mxu0 %v9275_v5 }
 0x24f   : > { %5363 = vmatprep.mubr.f32.mxu0 %v9276_v24 }
 0x252   : > { %5364 = vmatmul.mubr.f32.gmra.mrb[24].mxu0 %v9277_v6 }
 0x253   : > { %5366 = vmatprep.mubr.f32.mxu0 %v9278_v17 }
 0x256   : > { %5367 = vmatmul.mubr.f32.gmra.mrb[26].mxu0 %v9279_v45 }
 0x257   : > { %5369 = vmatprep.mubr.f32.mxu0 %v9280_v63 }
 0x25a   : > { %5370 = vmatmul.mubr.f32.gmra.mrb[28].mxu0 %v9281_v47 }
 0x25b   : > { %5372 = vmatprep.mubr.f32.mxu0 %v9282_v50 }
 0x25e   : > { %5373 = vmatmul.mubr.f32.gmra.mrb[30].mxu0 %v9283_v22 }
 0x2f5   : > { %v5329_v39 = vpop.f32.mrb[0].mxu0 }
 0x2f6   : > { %v6113_v51 = vadd.f32 %v5329_v39, %v7952_v41  ;;  %v2378_v34 = vpop.f32.mrb[1].mxu0 }
 0x2f7   : > { %v6114_v36 = vadd.f32 %v7952_v41, %v2378_v34 }
 0x2f8   : > { %v2569_v16 = vmax.f32 %v6113_v51, 0.0 }
 0x2f9   : > { %v2568_v13 = vmax.f32 %v6114_v36, 0.0  ;;  %v5332_v56 = vpop.f32.mrb[2].mxu0 }
 0x2fa   : > { %v2606_v21 = vand.u32 4294901760, %v2569_v16  ;;  %v6115_v12 = vadd.f32 %v5332_v56, %v7952_v41  ;;  %v2390_v11 = vpop.f32.mrb[3].mxu0 }
 0x2fb   : > { %v2603_v62 = vand.u32 4294901760, %v2568_v13  ;;  %v6116_v4 = vadd.f32 %v7952_v41, %v2390_v11 }
 0x2fc   : > { %v7962_v33 = vsub.f32 %v2569_v16, %v2606_v21  ;;  %v2571_v23 = vmax.f32 %v6115_v12, 0.0 }
 0x2fd   : > { %v7969_v37 = vsub.f32 %v2568_v13, %v2603_v62  ;;  %v2570_v30 = vmax.f32 %v6116_v4, 0.0  ;;  %v5335_v1 = vpop.f32.mrb[4].mxu0  ;;  %v7971_v28 = vpack.c.bf16 %v2606_v21, %v2603_v62 }
 0x2fe   : > { %v8990_v14 = vand.u32 4294901760, %v7962_v33  ;;  %v2612_v43 = vand.u32 4294901760, %v2571_v23  ;;  %v6117_v29 = vadd.f32 %v5335_v1, %v7952_v41  ;;  %v2402_v27 = vpop.f32.mrb[5].mxu0 }
 0x2ff   : > { %9287 = vst [vmem:[#allocation22_spill] sm:$0xff] %v7971_v28  ;;  %v8991_v57 = vand.u32 4294901760, %v7969_v37  ;;  %v2609_v15 = vand.u32 4294901760, %v2570_v30  ;;  %v6118_v7 = vadd.f32 %v7952_v41, %v2402_v27 }
 0x300   : > { %v2725_v18 = vsub.f32 %v7962_v33, %v8990_v14  ;;  %v7982_v20 = vsub.f32 %v2571_v23, %v2612_v43  ;;  %v2573_v2 = vmax.f32 %v6117_v29, 0.0 }
 0x301   : > { %v2718_v38 = vsub.f32 %v7969_v37, %v8991_v57  ;;  %v7988_v48 = vsub.f32 %v2570_v30, %v2609_v15  ;;  %v2572_v49 = vmax.f32 %v6118_v7, 0.0  ;;  %v5338_v35 = vpop.f32.mrb[6].mxu0  ;;  %v7990_v31 = vpack.c.bf16 %v2612_v43, %v2609_v15 }
 0x302   : > { %v2726_v60 = vand.u32 4294901760, %v2725_v18  ;;  %v8987_v58 = vand.u32 4294901760, %v7982_v20  ;;  %v2618_v59 = vand.u32 4294901760, %v2573_v2  ;;  %v6119_v25 = vadd.f32 %v5338_v35, %v7952_v41  ;;  %v2414_v19 = vpop.f32.mrb[7].mxu0 }
 0x303   : > { %9288 = vst [vmem:[#allocation33_spill] sm:$0xff] %v7990_v31  ;;  %v2719_v42 = vand.u32 4294901760, %v2718_v38  ;;  %v8989_v3 = vand.u32 4294901760, %v7988_v48  ;;  %v2615_v32 = vand.u32 4294901760, %v2572_v49  ;;  %v6120_v5 = vadd.f32 %v7952_v41, %v2414_v19 }
 0x304   : > { %v2739_v24 = vsub.f32 %v7982_v20, %v8987_v58  ;;  %v7999_v6 = vsub.f32 %v2573_v2, %v2618_v59  ;;  %v2575_v17 = vmax.f32 %v6119_v25, 0.0 }
 0x305   : > { %v2732_v63 = vsub.f32 %v7988_v48, %v8989_v3  ;;  %v8006_v47 = vsub.f32 %v2572_v49, %v2615_v32  ;;  %v2574_v50 = vmax.f32 %v6120_v5, 0.0  ;;  %v5341_v22 = vpop.f32.mrb[8].mxu0  ;;  %v8008_v53 = vpack.c.bf16 %v2618_v59, %v2615_v32 }
 0x306   : > { %v2740_v9 = vand.u32 4294901760, %v2739_v24  ;;  %v8984_v40 = vand.u32 4294901760, %v7999_v6  ;;  %v2624_v52 = vand.u32 4294901760, %v2575_v17  ;;  %v6121_v39 = vadd.f32 %v5341_v22, %v7952_v41  ;;  %v2426_v51 = vpop.f32.mrb[9].mxu0 }
 0x307   : > { %9289 = vst [vmem:[#allocation34_spill] sm:$0xff] %v8008_v53  ;;  %v2733_v34 = vand.u32 4294901760, %v2732_v63  ;;  %v8985_v36 = vand.u32 4294901760, %v8006_v47  ;;  %v2621_v16 = vand.u32 4294901760, %v2574_v50  ;;  %v6122_v13 = vadd.f32 %v7952_v41, %v2426_v51 }
 0x308   : > { %v2753_v56 = vsub.f32 %v7999_v6, %v8984_v40  ;;  %v8017_v21 = vsub.f32 %v2575_v17, %v2624_v52  ;;  %v2577_v12 = vmax.f32 %v6121_v39, 0.0  ;;  %v8019_v11 = vpack.c.bf16 %v2726_v60, %v2719_v42 }
 0x309   : > { %v2746_v62 = vsub.f32 %v8006_v47, %v8985_v36  ;;  %v8024_v4 = vsub.f32 %v2574_v50, %v2621_v16  ;;  %v2576_v23 = vmax.f32 %v6122_v13, 0.0  ;;  %v5344_v30 = vpop.f32.mrb[10].mxu0  ;;  %v8026_v1 = vpack.c.bf16 %v2624_v52, %v2621_v16 }
 0x30a   : > { %v2754_v43 = vand.u32 4294901760, %v2753_v56  ;;  %v8981_v29 = vand.u32 4294901760, %v8017_v21  ;;  %v2630_v27 = vand.u32 4294901760, %v2577_v12  ;;  %v6123_v15 = vadd.f32 %v5344_v30, %v7952_v41  ;;  %v2438_v7 = vpop.f32.mrb[11].mxu0 }
 0x30b   : > { %9290 = vst [vmem:[#allocation23_spill] sm:$0xff] %v8026_v1  ;;  %v2747_v18 = vand.u32 4294901760, %v2746_v62  ;;  %v8983_v2 = vand.u32 4294901760, %v8024_v4  ;;  %v2627_v38 = vand.u32 4294901760, %v2576_v23  ;;  %v6124_v49 = vadd.f32 %v7952_v41, %v2438_v7 }
 0x30c   : > { %v2767_v35 = vsub.f32 %v8017_v21, %v8981_v29  ;;  %v8035_v60 = vsub.f32 %v2577_v12, %v2630_v27  ;;  %v2579_v59 = vmax.f32 %v6123_v15, 0.0  ;;  %v8037_v25 = vpack.c.bf16 %v2740_v9, %v2733_v34 }
 0x30d   : > { %v2760_v19 = vsub.f32 %v8024_v4, %v8983_v2  ;;  %v8042_v42 = vsub.f32 %v2576_v23, %v2627_v38  ;;  %v2578_v32 = vmax.f32 %v6124_v49, 0.0  ;;  %v5347_v5 = vpop.f32.mrb[12].mxu0  ;;  %v8044_v24 = vpack.c.bf16 %v2630_v27, %v2627_v38 }
 0x30e   : > { %v2768_v17 = vand.u32 4294901760, %v2767_v35  ;;  %v8978_v63 = vand.u32 4294901760, %v8035_v60  ;;  %v2636_v50 = vand.u32 4294901760, %v2579_v59  ;;  %v6125_v22 = vadd.f32 %v5347_v5, %v7952_v41  ;;  %v2450_v52 = vpop.f32.mrb[13].mxu0 }
 0x30f   : > { %9291 = vst [vmem:[#allocation35_spill] sm:$0xff] %v8044_v24  ;;  %v2761_v39 = vand.u32 4294901760, %v2760_v19  ;;  %v8979_v9 = vand.u32 4294901760, %v8042_v42  ;;  %v2633_v51 = vand.u32 4294901760, %v2578_v32  ;;  %v6126_v34 = vadd.f32 %v7952_v41, %v2450_v52 }
 0x310   : > { %v2781_v16 = vsub.f32 %v8035_v60, %v8978_v63  ;;  %v8053_v13 = vsub.f32 %v2579_v59, %v2636_v50  ;;  %v2581_v56 = vmax.f32 %v6125_v22, 0.0  ;;  %v8055_v12 = vpack.c.bf16 %v2754_v43, %v2747_v18 }
 0x311   : > { %v2774_v62 = vsub.f32 %v8042_v42, %v8979_v9  ;;  %v8060_v23 = vsub.f32 %v2578_v32, %v2633_v51  ;;  %v2580_v30 = vmax.f32 %v6126_v34, 0.0  ;;  %v5350_v27 = vpop.f32.mrb[14].mxu0  ;;  %v8062_v15 = vpack.c.bf16 %v2636_v50, %v2633_v51 }
 0x312   : > { %9292 = vst [vmem:[#allocation37_spill] sm:$0xff] %v8055_v12  ;;  %v2782_v7 = vand.u32 4294901760, %v2781_v16  ;;  %v8976_v38 = vand.u32 4294901760, %v8053_v13  ;;  %v2642_v49 = vand.u32 4294901760, %v2581_v56  ;;  %v6127_v35 = vadd.f32 %v5350_v27, %v7952_v41  ;;  %v2462_v59 = vpop.f32.mrb[15].mxu0 }
 0x313   : > { %9293 = vst [vmem:[#allocation41_spill] sm:$0xff] %v8062_v15  ;;  %v2775_v19 = vand.u32 4294901760, %v2774_v62  ;;  %v8977_v43 = vand.u32 4294901760, %v8060_v23  ;;  %v2639_v18 = vand.u32 4294901760, %v2580_v30  ;;  %v6128_v5 = vadd.f32 %v7952_v41, %v2462_v59 }
 0x314   : > { %v2795_v32 = vsub.f32 %v8053_v13, %v8976_v38  ;;  %v8071_v22 = vsub.f32 %v2581_v56, %v2642_v49  ;;  %v2583_v50 = vmax.f32 %v6127_v35, 0.0  ;;  %v8073_v52 = vpack.c.bf16 %v2768_v17, %v2761_v39 }
 0x315   : > { %v2788_v51 = vsub.f32 %v8060_v23, %v8977_v43  ;;  %v8078_v34 = vsub.f32 %v2580_v30, %v2639_v18  ;;  %v2582_v16 = vmax.f32 %v6128_v5, 0.0  ;;  %v5353_v62 = vpop.f32.mrb[16].mxu0  ;;  %v8080_v27 = vpack.c.bf16 %v2642_v49, %v2639_v18 }
 0x316   : > { %9294 = vst [vmem:[#allocation42_spill] sm:$0xff] %v8073_v52  ;;  %v2796_v59 = vand.u32 4294901760, %v2795_v32  ;;  %v8980_v10 = vand.u32 4294901760, %v8071_v22  ;;  %v2648_v0 = vand.u32 4294901760, %v2583_v50  ;;  %v6129_v56 = vadd.f32 %v5353_v62, %v7952_v41  ;;  %v2474_v45 = vpop.f32.mrb[17].mxu0 }
 0x317   : > { %9295 = vst [vmem:[#allocation43_spill] sm:$0xff] %v8080_v27  ;;  %v2789_v35 = vand.u32 4294901760, %v2788_v51  ;;  %v8982_v17 = vand.u32 4294901760, %v8078_v34  ;;  %v2645_v39 = vand.u32 4294901760, %v2582_v16  ;;  %v6130_v46 = vadd.f32 %v7952_v41, %v2474_v45 }
 0x318   : > { %v2809_v30 = vsub.f32 %v8071_v22, %v8980_v10  ;;  %v8089_v5 = vsub.f32 %v2583_v50, %v2648_v0  ;;  %v2585_v49 = vmax.f32 %v6129_v56, 0.0  ;;  %v8091_v18 = vpack.c.bf16 %v2782_v7, %v2775_v19 }
 0x319   : > { %v2802_v32 = vsub.f32 %v8078_v34, %v8982_v17  ;;  %v8096_v62 = vsub.f32 %v2582_v16, %v2645_v39  ;;  %v2584_v51 = vmax.f32 %v6130_v46, 0.0  ;;  %v5356_v38 = vpop.f32.mrb[18].mxu0  ;;  %v8098_v43 = vpack.c.bf16 %v2648_v0, %v2645_v39 }
 0x31a   : > { %9296 = vst [vmem:[#allocation45_spill] sm:$0xff] %v8091_v18  ;;  %v2810_v45 = vand.u32 4294901760, %v2809_v30  ;;  %v8986_v63 = vand.u32 4294901760, %v8089_v5  ;;  %v2654_v9 = vand.u32 4294901760, %v2585_v49  ;;  %v6131_v50 = vadd.f32 %v5356_v38, %v7952_v41  ;;  %v2486_v10 = vpop.f32.mrb[19].mxu0 }
 0x31b   : > { %9297 = vst [vmem:[#allocation47_spill] sm:$0xff] %v8098_v43  ;;  %v2803_v56 = vand.u32 4294901760, %v2802_v32  ;;  %v8988_v7 = vand.u32 4294901760, %v8096_v62  ;;  %v2651_v19 = vand.u32 4294901760, %v2584_v51  ;;  %v6132_v29 = vadd.f32 %v7952_v41, %v2486_v10 }
 0x31c   : > { %v2823_v46 = vsub.f32 %v8089_v5, %v8986_v63  ;;  %v8107_v16 = vsub.f32 %v2585_v49, %v2654_v9  ;;  %v2587_v0 = vmax.f32 %v6131_v50, 0.0  ;;  %v8109_v39 = vpack.c.bf16 %v2796_v59, %v2789_v35 }
 0x31d   : > { %v2816_v38 = vsub.f32 %v8096_v62, %v8988_v7  ;;  %v8114_v30 = vsub.f32 %v2584_v51, %v2651_v19  ;;  %v2586_v32 = vmax.f32 %v6132_v29, 0.0  ;;  %v5359_v17 = vpop.f32.mrb[20].mxu0  ;;  %v8116_v2 = vpack.c.bf16 %v2654_v9, %v2651_v19 }
 0x31e   : > { %9298 = vst [vmem:[#allocation49_spill] sm:$0xff] %v8109_v39  ;;  %v2824_v10 = vand.u32 4294901760, %v2823_v46  ;;  %v8992_v40 = vand.u32 4294901760, %v8107_v16  ;;  %v2660_v36 = vand.u32 4294901760, %v2587_v0  ;;  %v6133_v49 = vadd.f32 %v5359_v17, %v7952_v41  ;;  %v2498_v63 = vpop.f32.mrb[21].mxu0 }
 0x31f   : > { %9299 = vst [vmem:[#allocation51_spill] sm:$0xff] %v8114_v30  ;;  %9300 = vst [vmem:[#allocation53_spill] sm:$0xff] %v8116_v2  ;;  %v2817_v50 = vand.u32 4294901760, %v2816_v38  ;;  %v8993_v59 = vand.u32 4294901760, %v8114_v30  ;;  %v2657_v35 = vand.u32 4294901760, %v2586_v32  ;;  %v6134_v58 = vadd.f32 %v7952_v41, %v2498_v63  ;;  %5778 = vmatprep.subr.bf16.mxu1 %v8116_v2 }
 0x320   : > { %v8123_v51 = vsub.f32 %v2587_v0, %v2660_v36  ;;  %v2589_v29 = vmax.f32 %v6133_v49, 0.0  ;;  %5780 = vmatpush3.bf16.msra.mxu1 %v7971_v28  ;;  %v2837_v9 = vsub.f32 %v8107_v16, %v8992_v40  ;;  %v8129_v19 = vpack.c.bf16 %v2810_v45, %v2803_v56 }
 0x321   : > { %v8131_v17 = vsub.f32 %v2586_v32, %v2657_v35  ;;  %v2588_v46 = vmax.f32 %v6134_v58, 0.0  ;;  %v5362_v38 = vpop.f32.mrb[22].mxu0  ;;  %v8133_v7 = vpack.c.bf16 %v2660_v36, %v2657_v35  ;;  %v2830_v63 = vsub.f32 %v8114_v30, %v8993_v59 }
 0x322   : > { %9301 = vst [vmem:[#allocation55_spill] sm:$0xff] %v8129_v19  ;;  %v8998_v0 = vand.u32 4294901760, %v8123_v51  ;;  %v2666_v49 = vand.u32 4294901760, %v2589_v29  ;;  %v6135_v3 = vadd.f32 %v5362_v38, %v7952_v41  ;;  %v2510_v14 = vpop.f32.mrb[23].mxu0  ;;  %v2838_v57 = vand.u32 4294901760, %v2837_v9 }
 0x323   : > { %9302 = vst [vmem:[#allocation57_spill] sm:$0xff] %v8133_v7  ;;  %v2663_v56 = vand.u32 4294901760, %v2588_v46  ;;  %v6136_v32 = vadd.f32 %v7952_v41, %v2510_v14  ;;  %5782 = vmatprep.subr.bf16.mxu1 %v8133_v7  ;;  %v2831_v58 = vand.u32 4294901760, %v2830_v63  ;;  %v8149_v38 = vpack.c.bf16 %v2824_v10, %v2817_v50 }
 0x324   : > { %v8143_v36 = vsub.f32 %v2589_v29, %v2666_v49  ;;  %v2591_v35 = vmax.f32 %v6135_v3, 0.0  ;;  %5784 = vmatpush3.bf16.msra.mxu1 %v7990_v31  ;;  %v2851_v26 = vsub.f32 %v8123_v51, %v8998_v0  ;;  %v9305_v7 = vand.u32 4294901760, %v8131_v17 }
 0x325   : > { %9303 = vst [vmem:[#allocation59_spill] sm:$0xff] %v8149_v38  ;;  %v8151_v9 = vsub.f32 %v2588_v46, %v2663_v56  ;;  %v2590_v40 = vmax.f32 %v6136_v32, 0.0  ;;  %v5365_v59 = vpop.f32.mrb[24].mxu0  ;;  %v8153_v45 = vpack.c.bf16 %v2666_v49, %v2663_v56  ;;  %v8155_v14 = vpack.c.bf16 %v2838_v57, %v2831_v58 }
 0x326   : > { %v9005_v29 = vand.u32 4294901760, %v8143_v36  ;;  %v2672_v63 = vand.u32 4294901760, %v2591_v35  ;;  %v6137_v3 = vadd.f32 %v5365_v59, %v7952_v41  ;;  %v2522_v31 = vpop.f32.mrb[25].mxu0  ;;  %v2844_v0 = vsub.f32 %v8131_v17, %v9305_v7 }
 0x327   : > { %9304 = vst [vmem:[#allocation61_spill] sm:$0xff] %v8153_v45  ;;  %v2669_v50 = vand.u32 4294901760, %v2590_v40  ;;  %v6138_v46 = vadd.f32 %v7952_v41, %v2522_v31  ;;  %5786 = vmatprep.subr.bf16.mxu1 %v8153_v45  ;;  %v2852_v49 = vand.u32 4294901760, %v2851_v26  ;;  %v9307_v31 = vand.u32 4294901760, %v8151_v9 }
 0x328   : > { %v8165_v57 = vsub.f32 %v2591_v35, %v2672_v63  ;;  %v2593_v56 = vmax.f32 %v6137_v3, 0.0  ;;  %5788 = vmatpush3.bf16.msra.mxu1 %v8008_v53  ;;  %v2845_v32 = vand.u32 4294901760, %v2844_v0  ;;  %v2865_v59 = vsub.f32 %v8143_v36, %v9005_v29 }
 0x329   : > { %v8171_v58 = vsub.f32 %v2590_v40, %v2669_v50  ;;  %v2592_v7 = vmax.f32 %v6138_v46, 0.0  ;;  %v5368_v10 = vpop.f32.mrb[26].mxu0  ;;  %v8173_v28 = vpack.c.bf16 %v2672_v63, %v2669_v50  ;;  %v2858_v26 = vsub.f32 %v8151_v9, %v9307_v31 }
 0x32a   : > { %v9014_v35 = vand.u32 4294901760, %v8165_v57  ;;  %v2678_v3 = vand.u32 4294901760, %v2593_v56  ;;  %v6139_v53 = vadd.f32 %v5368_v10, %v7952_v41  ;;  %v2534_v0 = vpop.f32.mrb[27].mxu0  ;;  %v8180_v45 = vpack.c.bf16 %v2852_v49, %v2845_v32 }
 0x32b   : > { %9306 = vst [vmem:[#allocation63_spill] sm:$0xff] %v8173_v28  ;;  %v2675_v40 = vand.u32 4294901760, %v2592_v7  ;;  %v6140_v46 = vadd.f32 %v7952_v41, %v2534_v0  ;;  %5790 = vmatprep.subr.bf16.mxu1 %v8173_v28  ;;  %v2859_v63 = vand.u32 4294901760, %v2858_v26  ;;  %v2866_v31 = vand.u32 4294901760, %v2865_v59 }
 0x32c   : > { %v8185_v50 = vsub.f32 %v2593_v56, %v2678_v3  ;;  %v2595_v61 = vmax.f32 %v6139_v53, 0.0  ;;  %5792 = vmatpush3.bf16.msra.mxu1 %v8026_v1  ;;  %v2879_v10 = vsub.f32 %v8165_v57, %v9014_v35  ;;  %v9309_v0 = vand.u32 4294901760, %v8171_v58 }
 0x32d   : > { %v8191_v49 = vsub.f32 %v2592_v7, %v2675_v40  ;;  %v2594_v32 = vmax.f32 %v6140_v46, 0.0  ;;  %v5371_v29 = vpop.f32.mrb[28].mxu0  ;;  %v8193_v2 = vpack.c.bf16 %v2678_v3, %v2675_v40  ;;  %v8200_v28 = vpack.c.bf16 %v2866_v31, %v2859_v63 }
 0x32e   : > { %v2872_v26 = vsub.f32 %v8171_v58, %v9309_v0  ;;  %v9023_v56 = vand.u32 4294901760, %v8185_v50  ;;  %v2684_v53 = vand.u32 4294901760, %v2595_v61  ;;  %v6141_v1 = vadd.f32 %v5371_v29, %v7952_v41  ;;  %v2546_v59 = vpop.f32.mrb[29].mxu0 }
 0x32f   : > { %9308 = vst [vmem:[#allocation66_spill] sm:$0xff] %v8193_v2  ;;  %v2681_v7 = vand.u32 4294901760, %v2594_v32  ;;  %v6142_v46 = vadd.f32 %v7952_v41, %v2546_v59  ;;  %5794 = vmatprep.subr.bf16.mxu1 %v8193_v2  ;;  %v2880_v0 = vand.u32 4294901760, %v2879_v10  ;;  %v9311_v59 = vand.u32 4294901760, %v8191_v49 }
 0x330   : > { %v2873_v3 = vand.u32 4294901760, %v2872_v26  ;;  %v8205_v40 = vsub.f32 %v2595_v61, %v2684_v53  ;;  %v2597_v44 = vmax.f32 %v6141_v1, 0.0  ;;  %5796 = vmatpush3.bf16.msra.mxu1 %v8044_v24  ;;  %v2893_v29 = vsub.f32 %v8185_v50, %v9023_v56 }
 0x331   : > { %v8211_v63 = vsub.f32 %v2594_v32, %v2681_v7  ;;  %v2596_v31 = vmax.f32 %v6142_v46, 0.0  ;;  %v5374_v35 = vpop.f32.mrb[30].mxu0  ;;  %v8213_v54 = vpack.c.bf16 %v2684_v53, %v2681_v7  ;;  %v2886_v26 = vsub.f32 %v8191_v49, %v9311_v59 }
 0x332   : > { %v9028_v61 = vand.u32 4294901760, %v8205_v40  ;;  %v2690_v1 = vand.u32 4294901760, %v2597_v44  ;;  %v6143_v24 = vadd.f32 %v5374_v35, %v7952_v41  ;;  %v2558_v10 = vpop.f32.mrb[31].mxu0  ;;  %v8220_v2 = vpack.c.bf16 %v2880_v0, %v2873_v3 }
 0x333   : > { %9310 = vst [vmem:[#allocation67_spill] sm:$0xff] %v8213_v54  ;;  %v2687_v32 = vand.u32 4294901760, %v2596_v31  ;;  %v6144_v46 = vadd.f32 %v7952_v41, %v2558_v10  ;;  %5798 = vmatprep.subr.bf16.mxu1 %v8213_v54  ;;  %v2887_v53 = vand.u32 4294901760, %v2886_v26  ;;  %v2894_v59 = vand.u32 4294901760, %v2893_v29 }
 0x334   : > { %9312 = vst [vmem:[#allocation69_spill] sm:$0xff] %v8220_v2  ;;  %v8225_v7 = vsub.f32 %v2597_v44, %v2690_v1  ;;  %v2599_v38 = vmax.f32 %v6143_v24, 0.0  ;;  %5800 = vmatpush3.bf16.msra.mxu1 %v8062_v15  ;;  %v2907_v35 = vsub.f32 %v8205_v40, %v9028_v61  ;;  %v9314_v41 = vand.u32 4294901760, %v8211_v63 }
 0x335   : > { %v8231_v3 = vsub.f32 %v2596_v31, %v2687_v32  ;;  %v2598_v0 = vmax.f32 %v6144_v46, 0.0  ;;  %v8233_v56 = vpack.c.bf16 %v2690_v1, %v2687_v32  ;;  %v8239_v24 = vpack.c.bf16 %v2894_v59, %v2887_v53 }
 0x336   : > { %v2900_v10 = vsub.f32 %v8211_v63, %v9314_v41  ;;  %v2920_v44 = vand.u32 4294901760, %v8225_v7  ;;  %v2696_v26 = vand.u32 4294901760, %v2599_v38  ;;  %v2908_v15 = vand.u32 4294901760, %v2907_v35 }
 0x337   : > { %9313 = vst [vmem:[#allocation71_spill] sm:$0xff] %v8233_v56  ;;  %9315 = vst [vmem:[#allocation73_spill] sm:$0xff] %v8239_v24  ;;  %v2913_v29 = vand.u32 4294901760, %v8231_v3  ;;  %v2693_v54 = vand.u32 4294901760, %v2598_v0  ;;  %5802 = vmatprep.subr.bf16.mxu1 %v8233_v56  ;;  %v5853_v56 = vpack.c.bf16 %v8165_v57, %v8171_v58  ;;  %v5863_v59 = vpack.c.bf16 %v8053_v13, %v8060_v23 }
 0x338   : > { %v2901_v31 = vand.u32 4294901760, %v2900_v10  ;;  %v8245_v32 = vsub.f32 %v2599_v38, %v2696_v26  ;;  %5804 = vmatpush3.bf16.msra.mxu1 %v8080_v27  ;;  %v2921_v46 = vsub.f32 %v8225_v7, %v2920_v44  ;;  %v5851_v27 = vpack.c.bf16 %v7999_v6, %v8006_v47 }
 0x339   : > { %v8253_v35 = vsub.f32 %v2598_v0, %v2693_v54  ;;  %v8255_v41 = vpack.c.bf16 %v2696_v26, %v2693_v54  ;;  %v2914_v61 = vsub.f32 %v8231_v3, %v2913_v29  ;;  %v5855_v54 = vpack.c.bf16 %v8017_v21, %v8024_v4 }
 0x33a   : > { %v5829_v10 = vpack.c.bf16 %v2908_v15, %v2901_v31  ;;  %v2934_v38 = vand.u32 4294901760, %v8245_v32  ;;  %v2922_v1 = vand.u32 4294901760, %v2921_v46  ;;  %v5857_v15 = vpack.c.bf16 %v8185_v50, %v8191_v49 }
 0x33b   : > { %9316 = vst [vmem:[#allocation75_spill] sm:$0xff] %v8255_v41  ;;  %v2927_v53 = vand.u32 4294901760, %v8253_v35  ;;  %5806 = vmatprep.subr.bf16.mxu1 %v8255_v41  ;;  %v2915_v0 = vand.u32 4294901760, %v2914_v61  ;;  %v5859_v31 = vpack.c.bf16 %v8035_v60, %v8042_v42  ;;  %v5861_v46 = vpack.c.bf16 %v8205_v40, %v8211_v63 }
 0x33c   : > { %5808 = vmatpush3.bf16.msra.mxu1 %v8098_v43  ;;  %v2935_v26 = vsub.f32 %v8245_v32, %v2934_v38  ;;  %v5865_v19 = vpack.c.bf16 %v8225_v7, %v8231_v3  ;;  %v5867_v43 = vpack.c.bf16 %v8071_v22, %v8078_v34  ;;  %v5869_v18 = vpack.c.bf16 %v8245_v32, %v8253_v35 }
 0x33d   : > { %5810 = vmatprep.subr.bf16.mxu1 %v8155_v14  ;;  %v5833_v61 = vpack.c.bf16 %v2922_v1, %v2915_v0  ;;  %v2928_v41 = vsub.f32 %v8253_v35, %v2927_v53  ;;  %v5871_v24 = vpack.c.bf16 %v8089_v5, %v8096_v62  ;;  %v9317_v52 = vand.u32 4294901760, %v8114_v30 }
 0x33e   : > { %v2936_v39 = vand.u32 4294901760, %v2935_v26  ;;  %v9318_v14 = vand.u32 4294901760, %v8107_v16  ;;  %v9319_v0 = vand.u32 4294901760, %v7967_v8  ;;  %v9320_v3 = vand.u32 4294901760, %v7969_v37 }
 0x33f   : > { %v2929_v7 = vand.u32 4294901760, %v2928_v41  ;;  %v9321_v26 = vand.u32 4294901760, %v7962_v33  ;;  %v9322_v32 = vand.u32 4294901760, %v8131_v17  ;;  %v9323_v35 = vand.u32 4294901760, %v8123_v51 }
 0x340   : > { %v8291_v1 = vpack.c.bf16 %v9318_v14, %v9317_v52  ;;  %2709 = vmatmul.mubr.f32.vlgmr.msra.gmra.mrb[0].mxu1 %v9319_v0  ;;  %v9324_v30 = vand.u32 4294901760, %v7988_v48  ;;  %v9325_v52 = vand.u32 4294901760, %v7982_v20  ;;  %v9327_v8 = vand.u32 4294901760, %v8151_v9 }
 0x341   : > { %v8299_v2 = vpack.c.bf16 %v9321_v26, %v9320_v3  ;;  %v8305_v12 = vpack.c.bf16 %v9323_v35, %v9322_v32  ;;  %5812 = vmatpush3.bf16.msra.mxu1 %v8019_v11  ;;  %2939 = vmatprep.mubr.f32.mxu1 %v7935_v55  ;;  %v9328_v41 = vand.u32 4294901760, %v8143_v36  ;;  %v9329_v3 = vand.u32 4294901760, %v8006_v47 }
 0x342   : > { %v8311_v14 = vpack.c.bf16 %v9325_v52, %v9324_v30  ;;  %v9330_v26 = vand.u32 4294901760, %v7999_v6  ;;  %v9331_v35 = vand.u32 4294901760, %v8171_v58  ;;  %v9332_v30 = vand.u32 4294901760, %v8165_v57  ;;  %5814 = vmatprep.subr.bf16.mxu1 %v8180_v45 }
 0x343   : > { %v8319_v0 = vpack.c.bf16 %v9328_v41, %v9327_v8  ;;  %v5837_v11 = vpack.c.bf16 %v2936_v39, %v2929_v7  ;;  %v9334_v8 = vand.u32 4294901760, %v8017_v21  ;;  %v9335_v47 = vand.u32 4294901760, %v8191_v49 }
 0x344   : > { %9326 = vst [vmem:[#allocation77_spill] sm:$0xff] %v8311_v14  ;;  %v8325_v32 = vpack.c.bf16 %v9330_v26, %v9329_v3  ;;  %v8331_v52 = vpack.c.bf16 %v9332_v30, %v9331_v35  ;;  %v9333_v14 = vand.u32 4294901760, %v8024_v4  ;;  %v9336_v6 = vand.u32 4294901760, %v8185_v50 }
 0x345   : > { %v9337_v58 = vand.u32 4294901760, %v8042_v42  ;;  %v9338_v57 = vand.u32 4294901760, %v8035_v60  ;;  %v9339_v39 = vand.u32 4294901760, %v8211_v63  ;;  %v9340_v4 = vand.u32 4294901760, %v8205_v40  ;;  %5816 = vmatpush3.bf16.msra.mxu1 %v8037_v25  ;;  %v9354_v25 = vld [vmem:[#allocation59_spill] sm:$0xff] }
 0x346   : > { %v8338_v41 = vpack.c.bf16 %v9334_v8, %v9333_v14  ;;  %v8344_v3 = vpack.c.bf16 %v9336_v6, %v9335_v47  ;;  %v9341_v21 = vand.u32 4294901760, %v8060_v23  ;;  %v9342_v49 = vand.u32 4294901760, %v8053_v13  ;;  %5818 = vmatprep.subr.bf16.mxu1 %v8200_v28  ;;  %v9347_v13 = vld [vmem:[#allocation37_spill] sm:$0xff]  ;;  %v9355_v28 = vld [vmem:[#allocation51_spill] sm:$0xff]  ;;  %v9359_v8 = vld [vmem:[#allocation30_spill] sm:$0xff] }
 0x347   : > { %v8350_v26 = vpack.c.bf16 %v9338_v57, %v9337_v58  ;;  %v8356_v45 = vpack.c.bf16 %v9340_v4, %v9339_v39  ;;  %v8364_v50 = vpack.c.bf16 %v2920_v44, %v2913_v29  ;;  %v9343_v42 = vand.u32 4294901760, %v8078_v34  ;;  %v9348_v23 = vld [vmem:[#allocation69_spill] sm:$0xff]  ;;  %v9349_v34 = vld [vmem:[#allocation42_spill] sm:$0xff]  ;;  %v3467_v6 = vld [vmem:[#allocation10 + $0x18] sm:$0xff] }
 0x348   : > { %v8362_v7 = vpack.c.bf16 %v9342_v49, %v9341_v21  ;;  %v9344_v60 = vand.u32 4294901760, %v8071_v22  ;;  %v8372_v35 = vpack.c.bf16 %v2934_v38, %v2927_v53  ;;  %v9345_v40 = vand.u32 4294901760, %v8096_v62  ;;  %v9350_v22 = vld [vmem:[#allocation73_spill] sm:$0xff]  ;;  %v9357_v53 = vld [vmem:[#allocation31_spill] sm:$0xff]  ;;  %v3468_v58 = vld [vmem:[#allocation10 + $0x20] sm:$0xff] }
 0x349   : > { %v9346_v63 = vand.u32 4294901760, %v8089_v5  ;;  %5820 = vmatpush3.bf16.msra.mxu1 %v9347_v13  ;;  %v9351_v44 = vld [vmem:[#allocation45_spill] sm:$0xff]  ;;  %v9353_v5 = vld [vmem:[#allocation55_spill] sm:$0xff]  ;;  %v9356_v29 = vpack.c.bf16 %v8107_v16, %v9355_v28  ;;  %v9358_v38 = vpack.c.bf16 %v7962_v33, %v7969_v37  ;;  %v9362_v16 = vpack.c.bf16 %v8143_v36, %v8151_v9  ;;  %v9364_v37 = vld [vmem:[#allocation32_spill] sm:$0xff] }
 0x34a   : > { %v8370_v14 = vpack.c.bf16 %v9344_v60, %v9343_v42  ;;  %5822 = vmatprep.subr.bf16.mxu1 %v9348_v23  ;;  %v9352_v62 = vld [vmem:[#allocation49_spill] sm:$0xff]  ;;  %v9370_v36 = vld [vmem:[#allocation34_spill] sm:$0xff]  ;;  %v9374_v9 = vld [vmem:[#allocation35_spill] sm:$0xff]  ;;  %v3500_v39 = vand.u32 4294901760, %v3468_v58 }
 0x34b   : > { %v8378_v30 = vpack.c.bf16 %v9346_v63, %v9345_v40  ;;  %v9363_v33 = vld [vmem:[#allocation53_spill] sm:$0xff]  ;;  %v3471_v21 = vld [vmem:[#allocation10 + $0x38] sm:$0xff] }
 0x34c   : > { %v3469_v57 = vld [vmem:[#allocation10 + $0x28] sm:$0xff] }
 0x34d   : > { %5824 = vmatpush3.bf16.msra.mxu1 %v9349_v34  ;;  %v3503_v4 = vand.u32 4294901760, %v3469_v57 }
 0x34e   : > { %5826 = vmatprep.subr.bf16.mxu1 %v9350_v22 }
 0x34f   : > { %v8480_v40 = vsub.f32 %v3469_v57, %v3503_v4  ;;  %v8488_v34 = vpack.c.bf16 %v3503_v4, %v3500_v39 }
 0x351   : > { %5828 = vmatpush3.bf16.msra.mxu1 %v9351_v44 }
 0x352   : > { %5830 = vmatprep.subr.bf16.mxu1 %v5829_v10  ;;  %v9360_v10 = vpack.c.bf16 %v8123_v51, %v8131_v17  ;;  %v9368_v51 = vld [vmem:[#allocation33_spill] sm:$0xff] }
 0x353   : > { %v9369_v17 = vld [vmem:[#allocation61_spill] sm:$0xff] }
 0x355   : > { %5832 = vmatpush3.bf16.msra.mxu1 %v9352_v62  ;;  %v3472_v62 = vld [vmem:[#allocation10 + $0x40] sm:$0xff] }
 0x356   : > { %5834 = vmatprep.subr.bf16.mxu1 %v5833_v61  ;;  %v9361_v61 = vpack.c.bf16 %v7982_v20, %v7988_v48  ;;  %v9365_v20 = vld [vmem:[#allocation22_spill] sm:$0xff]  ;;  %v9366_v48 = vand.u32 4294901760, %v9359_v8  ;;  %v3512_v28 = vand.u32 4294901760, %v3472_v62 }
 0x359   : > { %5836 = vmatpush3.bf16.msra.mxu1 %v9353_v5  ;;  %v3473_v5 = vld [vmem:[#allocation10 + $0x48] sm:$0xff] }
 0x35a   : > { %5838 = vmatprep.subr.bf16.mxu1 %v5837_v11  ;;  %v9382_v11 = vld [vmem:[#allocation77_spill] sm:$0xff] }
 0x35d   : > { %5840 = vmatpush3.bf16.msra.mxu1 %v9354_v25 }
 0x35e   : > { %5842 = vmatprep.subr.bf16.mxu1 %v9356_v29  ;;  %v3515_v29 = vand.u32 4294901760, %v3473_v5 }
 0x360   : > { %2941 = vmatmul.mubr.f32.vlgmr.msra.gmra.mrb[2].mxu1 %v9357_v53 }
 0x361   : > { %5844 = vmatpush3.bf16.msra.mxu1 %v9358_v38  ;;  %3076 = vmatprep.mubr.f32.mxu1 %v9359_v8  ;;  %v8497_v38 = vpack.c.bf16 %v3515_v29, %v3512_v28  ;;  %v8499_v8 = vsub.f32 %v3472_v62, %v3512_v28 }
 0x362   : > { %5846 = vmatprep.subr.bf16.mxu1 %v9360_v10  ;;  %v8501_v10 = vsub.f32 %v3473_v5, %v3515_v29 }
 0x365   : > { %5848 = vmatpush3.bf16.msra.mxu1 %v9361_v61 }
 0x366   : > { %5850 = vmatprep.subr.bf16.mxu1 %v9362_v16  ;;  %v3474_v16 = vld [vmem:[#allocation10 + $0x50] sm:$0xff] }
 0x369   : > { %5852 = vmatpush3.bf16.msra.mxu1 %v5851_v27  ;;  %v9367_v27 = vld [vmem:[#allocation57_spill] sm:$0xff] }
 0x36a   : > { %5854 = vmatprep.subr.bf16.mxu1 %v5853_v56  ;;  %v9375_v56 = vld [vmem:[#allocation67_spill] sm:$0xff] }
 0x36d   : > { %5856 = vmatpush3.bf16.msra.mxu1 %v5855_v54  ;;  %v9378_v54 = vld [vmem:[#allocation43_spill] sm:$0xff] }
 0x36e   : > { %5858 = vmatprep.subr.bf16.mxu1 %v5857_v15  ;;  %v9379_v15 = vld [vmem:[#allocation75_spill] sm:$0xff] }
 0x371   : > { %5860 = vmatpush3.bf16.msra.mxu1 %v5859_v31  ;;  %v9380_v31 = vld [vmem:[#allocation47_spill] sm:$0xff] }
 0x372   : > { %5862 = vmatprep.subr.bf16.mxu1 %v5861_v46  ;;  %v9381_v46 = vand.u32 4294901760, %v9364_v37 }
 0x375   : > { %5864 = vmatpush3.bf16.msra.mxu1 %v5863_v59  ;;  %v9377_v59 = vld [vmem:[#allocation71_spill] sm:$0xff] }
 0x376   : > { %5866 = vmatprep.subr.bf16.mxu1 %v5865_v19  ;;  %v9373_v19 = vld [vmem:[#allocation66_spill] sm:$0xff] }
 0x379   : > { %5868 = vmatpush3.bf16.msra.mxu1 %v5867_v43  ;;  %v9371_v43 = vld [vmem:[#allocation63_spill] sm:$0xff] }
 0x37a   : > { %5870 = vmatprep.subr.bf16.mxu1 %v5869_v18  ;;  %v9372_v18 = vld [vmem:[#allocation23_spill] sm:$0xff] }
 0x37d   : > { %5872 = vmatpush3.bf16.msra.mxu1 %v5871_v24  ;;  %v9376_v24 = vld [vmem:[#allocation41_spill] sm:$0xff] }
 0x37e   : > { %5874 = vmatprep.subr.bf16.mxu1 %v9363_v33 }
 0x380   : > { %3079 = vmatmul.mubr.f32.vlgmr.msra.gmra.mrb[4].mxu1 %v9364_v37  ;;  %v3476_v37 = vld [vmem:[#allocation10 + $0x60] sm:$0xff] }
 0x381   : > { %5876 = vmatpush3.bf16.msra.mxu1 %v9365_v20  ;;  %3183 = vmatprep.mubr.f32.mxu1 %v9366_v48 }
 0x382   : > { %5878 = vmatprep.subr.bf16.mxu1 %v9367_v27 }
 0x385   : > { %5880 = vmatpush3.bf16.msra.mxu1 %v9368_v51 }
 0x386   : > { %5882 = vmatprep.subr.bf16.mxu1 %v9369_v17 }
 0x389   : > { %5884 = vmatpush3.bf16.msra.mxu1 %v9370_v36 }
 0x38a   : > { %5886 = vmatprep.subr.bf16.mxu1 %v9371_v43 }
 0x38d   : > { %5888 = vmatpush3.bf16.msra.mxu1 %v9372_v18 }
 0x38e   : > { %5890 = vmatprep.subr.bf16.mxu1 %v9373_v19 }
 0x391   : > { %5892 = vmatpush3.bf16.msra.mxu1 %v9374_v9 }
 0x392   : > { %5894 = vmatprep.subr.bf16.mxu1 %v9375_v56 }
 0x395   : > { %5896 = vmatpush3.bf16.msra.mxu1 %v9376_v24 }
 0x396   : > { %5898 = vmatprep.subr.bf16.mxu1 %v9377_v59 }
 0x399   : > { %5900 = vmatpush3.bf16.msra.mxu1 %v9378_v54 }
 0x39a   : > { %5902 = vmatprep.subr.bf16.mxu1 %v9379_v15 }
 0x39d   : > { %5904 = vmatpush3.bf16.msra.mxu1 %v9380_v31 }
 0x39e   : > { %5906 = vmatprep.subr.bf16.mxu1 %v8291_v1  ;;  %v3464_v1 = vld [vmem:[#allocation10] sm:$0xff] }
 0x3a0   : > { %3187 = vmatmul.mubr.f32.vlgmr.msra.gmra.mrb[6].mxu1 %v9381_v46 }
 0x3a1   : > { %5908 = vmatpush3.bf16.msra.mxu1 %v8299_v2  ;;  %3353 = vmatprep.mubr.f32.mxu1 %v7935_v55 }
 0x3a2   : > { %5910 = vmatprep.subr.bf16.mxu1 %v8305_v12 }
 0x3a5   : > { %5912 = vmatpush3.bf16.msra.mxu1 %v9382_v11 }
 0x3a6   : > { %5914 = vmatprep.subr.bf16.mxu1 %v8319_v0  ;;  %v3465_v0 = vld [vmem:[#allocation10 + $0x8] sm:$0xff] }
 0x3a7   : > { %v3491_v47 = vand.u32 4294901760, %v3465_v0 }
 0x3a9   : > { %5916 = vmatpush3.bf16.msra.mxu1 %v8325_v32  ;;  %v3466_v32 = vld [vmem:[#allocation10 + $0x10] sm:$0xff] }
 0x3aa   : > { %5918 = vmatprep.subr.bf16.mxu1 %v8331_v52  ;;  %v6623_v52 = vmov 0.0|0.0  }
 0x3ad   : > { %5920 = vmatpush3.bf16.msra.mxu1 %v8338_v41  ;;  %v3488_v41 = vand.u32 4294901760, %v3464_v1 }
 0x3ae   : > { %5922 = vmatprep.subr.bf16.mxu1 %v8344_v3  ;;  %v3494_v3 = vand.u32 4294901760, %v3466_v32 }
 0x3af   : > { %v8465_v49 = vpack.c.bf16 %v3491_v47, %v3488_v41 }
 0x3b0   : > { %v8471_v42 = vsub.f32 %v3466_v32, %v3494_v3 }
 0x3b1   : > { %5924 = vmatpush3.bf16.msra.mxu1 %v8350_v26  ;;  %v3497_v26 = vand.u32 4294901760, %v3467_v6 }
 0x3b2   : > { %5926 = vmatprep.subr.bf16.mxu1 %v8356_v45  ;;  %v3470_v45 = vld [vmem:[#allocation10 + $0x30] sm:$0xff] }
 0x3b3   : > { %v8473_v60 = vsub.f32 %v3467_v6, %v3497_v26  ;;  %v3506_v63 = vand.u32 4294901760, %v3470_v45 }
 0x3b5   : > { %5928 = vmatpush3.bf16.msra.mxu1 %v8362_v7  ;;  %v8467_v7 = vsub.f32 %v3464_v1, %v3488_v41  ;;  %v8483_v13 = vsub.f32 %v3470_v45, %v3506_v63  ;;  %v3602_v32 = vand.u32 4294901760, %v8473_v60  ;;  %v3616_v45 = vand.u32 4294901760, %v8480_v40 }
 0x3b6   : > { %5930 = vmatprep.subr.bf16.mxu1 %v8364_v50  ;;  %v8469_v50 = vsub.f32 %v3465_v0, %v3491_v47  ;;  %v3595_v0 = vand.u32 4294901760, %v8471_v42 }
 0x3b7   : > { %v3623_v62 = vand.u32 4294901760, %v8483_v13 }
 0x3b9   : > { %5932 = vmatpush3.bf16.msra.mxu1 %v8370_v14  ;;  %v8475_v14 = vsub.f32 %v3468_v58, %v3500_v39  ;;  %v3603_v58 = vsub.f32 %v8473_v60, %v3602_v32  ;;  %v3624_v28 = vsub.f32 %v8483_v13, %v3623_v62 }
 0x3ba   : > { %5934 = vmatprep.subr.bf16.mxu1 %v8372_v35  ;;  %v8478_v35 = vpack.c.bf16 %v3497_v26, %v3494_v3  ;;  %v3596_v3 = vsub.f32 %v8471_v42, %v3595_v0 }
 0x3bb   : > { %v3604_v39 = vand.u32 4294901760, %v3603_v58  ;;  %v3609_v4 = vand.u32 4294901760, %v8475_v14 }
 0x3bc   : > { %v3597_v26 = vand.u32 4294901760, %v3596_v3 }
 0x3bd   : > { %5936 = vmatpush3.bf16.msra.mxu1 %v8378_v30  ;;  %v3509_v30 = vand.u32 4294901760, %v3471_v21 }
 0x3be   : > { %5938 = vmatprep.subr.bf16.mxu1 %v9363_v33  ;;  %v3475_v33 = vld [vmem:[#allocation10 + $0x58] sm:$0xff] }
 0x3bf   : > { %v8485_v23 = vsub.f32 %v3471_v21, %v3509_v30  ;;  %v8492_v22 = vpack.c.bf16 %v3509_v30, %v3506_v63  ;;  %v3521_v48 = vand.u32 4294901760, %v3475_v33  ;;  %v8553_v21 = vpack.c.bf16 %v3604_v39, %v3597_v26 }
 0x3c0   : > { %3355 = vmatmul.mubr.f32.vlgmr.msra.gmra.mrb[8].mxu1 %v9357_v53  ;;  %v3610_v63 = vsub.f32 %v8475_v14, %v3609_v4  ;;  %v3617_v30 = vsub.f32 %v8480_v40, %v3616_v45 }
 0x3c1   : > { %5940 = vmatpush3.bf16.msra.mxu1 %v9365_v20  ;;  %3457 = vmatprep.mubr.f32.mxu1 %v7935_v55  ;;  %v3518_v20 = vand.u32 4294901760, %v3474_v16  ;;  %v3630_v5 = vand.u32 4294901760, %v8485_v23 }
 0x3c2   : > { %5942 = vmatprep.subr.bf16.mxu1 %v9367_v27  ;;  %v3477_v27 = vld [vmem:[#allocation10 + $0x68] sm:$0xff] }
 0x3c3   : > { %v3631_v29 = vsub.f32 %v8485_v23, %v3630_v5 }
 0x3c5   : > { %5944 = vmatpush3.bf16.msra.mxu1 %v9368_v51  ;;  %v3524_v51 = vand.u32 4294901760, %v3476_v37 }
 0x3c6   : > { %5946 = vmatprep.subr.bf16.mxu1 %v9369_v17  ;;  %v3478_v17 = vld [vmem:[#allocation10 + $0x70] sm:$0xff] }
 0x3c9   : > { %5948 = vmatpush3.bf16.msra.mxu1 %v9370_v36  ;;  %v3479_v36 = vld [vmem:[#allocation10 + $0x78] sm:$0xff] }
 0x3ca   : > { %5950 = vmatprep.subr.bf16.mxu1 %v9371_v43  ;;  %v6625_v43 = vmov 0.0  }
 0x3cd   : > { %5952 = vmatpush3.bf16.msra.mxu1 %v9372_v18  ;;  %v3527_v18 = vand.u32 4294901760, %v3477_v27 }
 0x3ce   : > { %5954 = vmatprep.subr.bf16.mxu1 %v9373_v19  ;;  %v3530_v19 = vand.u32 4294901760, %v3478_v17 }
 0x3cf   : > { %v8522_v46 = vpack.c.bf16 %v3527_v18, %v3524_v51 }
 0x3d1   : > { %5956 = vmatpush3.bf16.msra.mxu1 %v9374_v9  ;;  %v3533_v9 = vand.u32 4294901760, %v3479_v36 }
 0x3d2   : > { %5958 = vmatprep.subr.bf16.mxu1 %v9375_v56  ;;  %v8509_v56 = vpack.c.bf16 %v3521_v48, %v3518_v20 }
 0x3d3   : > { %v8524_v11 = vsub.f32 %v3479_v36, %v3533_v9  ;;  %v8538_v41 = vpack.c.bf16 %v3533_v9, %v3530_v19 }
 0x3d5   : > { %5960 = vmatpush3.bf16.msra.mxu1 %v9376_v24  ;;  %v8511_v24 = vsub.f32 %v3474_v16, %v3518_v20  ;;  %v3625_v16 = vand.u32 4294901760, %v3624_v28  ;;  %v9044_v20 = vand.u32 4294901760, %v8501_v10 }
 0x3d6   : > { %5962 = vmatprep.subr.bf16.mxu1 %v9377_v59  ;;  %v8513_v59 = vsub.f32 %v3475_v33, %v3521_v48  ;;  %v3632_v33 = vand.u32 4294901760, %v3631_v29 }
 0x3d9   : > { %5964 = vmatpush3.bf16.msra.mxu1 %v9378_v54  ;;  %v8515_v54 = vsub.f32 %v3476_v37, %v3524_v51  ;;  %v9045_v37 = vand.u32 4294901760, %v8499_v8 }
 0x3da   : > { %5966 = vmatprep.subr.bf16.mxu1 %v9379_v15  ;;  %v8517_v15 = vsub.f32 %v3477_v27, %v3527_v18  ;;  %v6003_v27 = vpack.c.bf16 %v3632_v33, %v3625_v16  ;;  %v9038_v33 = vand.u32 4294901760, %v8524_v11 }
 0x3db   : > { %v3638_v51 = vsub.f32 %v8499_v8, %v9045_v37  ;;  %v9041_v39 = vand.u32 4294901760, %v8515_v54 }
 0x3dd   : > { %5968 = vmatpush3.bf16.msra.mxu1 %v9380_v31  ;;  %v8519_v31 = vsub.f32 %v3478_v17, %v3530_v19  ;;  %v3645_v17 = vsub.f32 %v8501_v10, %v9044_v20  ;;  %v3639_v19 = vand.u32 4294901760, %v3638_v51 }
 0x3de   : > { %5969 = vmatprep.subr.bf16.mxu1 %v6623_v52 }
 0x3df   : > { %v3646_v9 = vand.u32 4294901760, %v3645_v17  ;;  %v9039_v16 = vand.u32 4294901760, %v8519_v31  ;;  %v3687_v17 = vsub.f32 %v8524_v11, %v9038_v33 }
 0x3e0   : > { %3459 = vmatmul.mubr.f32.vlgmr.msra.gmra.mrb[10].mxu1 %v9357_v53 }
 0x3e1   : > { %5971 = vmatpush3.bf16.msra.mxu1 %v8465_v49  ;;  %5407 = vmatprep.mubr.msk.f32.mxu1 %vm6624_vm0, %v6625_v43  ;;  %v3680_v51 = vsub.f32 %v8519_v31, %v9039_v16 }
 0x3e2   : > { %5972 = vmatprep.subr.bf16.mxu1 %v6623_v52 }
 0x3e5   : > { %5974 = vmatpush3.bf16.msra.mxu1 %v8478_v35 }
 0x3e6   : > { %5975 = vmatprep.subr.bf16.mxu1 %v6623_v52 }
 0x3e9   : > { %5977 = vmatpush3.bf16.msra.mxu1 %v8488_v34 }
 0x3ea   : > { %5978 = vmatprep.subr.bf16.mxu1 %v6623_v52 }
 0x3ed   : > { %5980 = vmatpush3.bf16.msra.mxu1 %v8492_v22 }
 0x3ee   : > { %5981 = vmatprep.subr.bf16.mxu1 %v6623_v52 }
 0x3f1   : > { %5983 = vmatpush3.bf16.msra.mxu1 %v8497_v38 }
 0x3f2   : > { %5984 = vmatprep.subr.bf16.mxu1 %v6623_v52 }
 0x3f5   : > { %5986 = vmatpush3.bf16.msra.mxu1 %v8509_v56 }
 0x3f6   : > { %5987 = vmatprep.subr.bf16.mxu1 %v6623_v52 }
 0x3f9   : > { %5989 = vmatpush3.bf16.msra.mxu1 %v8522_v46 }
 0x3fa   : > { %5990 = vmatprep.subr.bf16.mxu1 %v6623_v52 }
 0x3fd   : > { %5992 = vmatpush3.bf16.msra.mxu1 %v8538_v41 }
 0x3fe   : > { %5993 = vmatprep.subr.bf16.mxu1 %v6623_v52 }
 0x413   : > { %v4615_v55 = vpop.f32.mrb[0].mxu1 }
 0x414   : > { %v4616_v2 = vpop.f32.mrb[1].mxu1 }
 0x415   : > { %v4617_v12 = vadd.f32 %v4616_v2, %v4615_v55  ;;  %v3581_v55 = vand.u32 4294901760, %v8467_v7  ;;  %v3588_v2 = vand.u32 4294901760, %v8469_v50 }
 0x417   : > { %v3589_v1 = vsub.f32 %v8469_v50, %v3588_v2 }
 0x419   : > { %v3590_v6 = vand.u32 4294901760, %v3589_v1  ;;  %v9042_v1 = vand.u32 4294901760, %v8513_v59 }
 0x41b   : > { %v3659_v58 = vsub.f32 %v8513_v59, %v9042_v1 }
 0x433   : > { %v4650_v44 = vpop.f32.mrb[2].mxu1 }
 0x434   : > { %v4651_v25 = vpop.f32.mrb[3].mxu1 }
 0x435   : > { %v4652_v53 = vadd.f32 %v4651_v25, %v4650_v44  ;;  %v3611_v44 = vand.u32 4294901760, %v3610_v63  ;;  %v3618_v25 = vand.u32 4294901760, %v3617_v30  ;;  %v9040_v63 = vand.u32 4294901760, %v8517_v15 }
 0x436   : > { %v3660_v30 = vand.u32 4294901760, %v3659_v58  ;;  %v6024_v58 = vpack.c.bf16 %v8480_v40, %v8475_v14  ;;  %v9385_v14 = vand.u32 4294901760, %v8511_v24  ;;  %v9386_v40 = vand.u32 4294901760, %v8513_v59 }
 0x437   : > { %v8503_v61 = vadd.f32 %v4652_v53, %v4617_v12  ;;  %v3582_v12 = vsub.f32 %v8467_v7, %v3581_v55  ;;  %v8569_v53 = vpack.c.bf16 %v3618_v25, %v3611_v44  ;;  %v3666_v44 = vsub.f32 %v8515_v54, %v9041_v39 }
 0x439   : > { %v3583_v47 = vand.u32 4294901760, %v3582_v12  ;;  %v9043_v12 = vand.u32 4294901760, %v8511_v24  ;;  %v3667_v28 = vand.u32 4294901760, %v3666_v44 }
 0x43b   : > { %v8547_v57 = vpack.c.bf16 %v3590_v6, %v3583_v47  ;;  %v6006_v6 = vpack.c.bf16 %v3646_v9, %v3639_v19  ;;  %v3652_v3 = vsub.f32 %v8511_v24, %v9043_v12  ;;  %v6018_v9 = vpack.c.bf16 %v8469_v50, %v8467_v7 }
 0x43c   : > { %v6072_v7 = vpack.c.bf16 %v3616_v45, %v3609_v4  ;;  %v6075_v50 = vpack.c.bf16 %v3630_v5, %v3623_v62 }
 0x43d   : > { %v3653_v26 = vand.u32 4294901760, %v3652_v3  ;;  %v6021_v3 = vpack.c.bf16 %v8473_v60, %v8471_v42  ;;  %v9383_v42 = vand.u32 4294901760, %v8499_v8  ;;  %v9384_v60 = vand.u32 4294901760, %v8501_v10 }
 0x43f   : > { %v6009_v25 = vpack.c.bf16 %v3660_v30, %v3653_v26  ;;  %v6027_v26 = vpack.c.bf16 %v8485_v23, %v8483_v13  ;;  %v6030_v30 = vpack.c.bf16 %v8501_v10, %v8499_v8  ;;  %v9387_v13 = vand.u32 4294901760, %v8515_v54 }
 0x440   : > { %v9388_v23 = vand.u32 4294901760, %v8517_v15  ;;  %v9389_v8 = vand.u32 4294901760, %v8519_v31  ;;  %v9390_v10 = vand.u32 4294901760, %v8524_v11 }
 0x453   : > { %v4685_v48 = vpop.f32.mrb[4].mxu1 }
 0x454   : > { %v4686_v36 = vpop.f32.mrb[5].mxu1 }
 0x455   : > { %v4687_v18 = vadd.f32 %v4686_v36, %v4685_v48  ;;  %v3681_v36 = vand.u32 4294901760, %v3680_v51 }
 0x457   : > { %v3081_v47 = vadd.f32 %v4687_v18, %v8503_v61  ;;  %v3673_v61 = vsub.f32 %v8517_v15, %v9040_v63  ;;  %v3688_v18 = vand.u32 4294901760, %v3687_v17  ;;  %v6036_v17 = vpack.c.bf16 %v8517_v15, %v8515_v54 }
 0x459   : > { %v3674_v29 = vand.u32 4294901760, %v3673_v61  ;;  %v6015_v19 = vpack.c.bf16 %v3688_v18, %v3681_v36  ;;  %v6039_v36 = vpack.c.bf16 %v8524_v11, %v8519_v31 }
 0x45b   : > { %v6012_v48 = vpack.c.bf16 %v3674_v29, %v3667_v28  ;;  %v6033_v29 = vpack.c.bf16 %v8513_v59, %v8511_v24 }
 0x473   : > { %v4720_v44 = vpop.f32.mrb[6].mxu1 }
 0x474   : > { %v4721_v61 = vpop.f32.mrb[7].mxu1 }
 0x475   : > { %v4722_v28 = vadd.f32 %v4721_v61, %v4720_v44 }
 0x477   : > { %v3189_v51 = vadd.f32 %v4722_v28, %v3081_v47 }
 0x493   : > { %v4755_v18 = vpop.f32.mrb[8].mxu1 }
 0x494   : > { %v4756_v33 = vpop.f32.mrb[9].mxu1 }
 0x495   : > { %v4757_v16 = vadd.f32 %v4756_v33, %v4755_v18 }
 0x497   : > { %v3357_v63 = vadd.f32 %v4757_v16, %v3189_v51 }
 0x4b3   : > { %v4790_v39 = vpop.f32.mrb[10].mxu1 }
 0x4b4   : > { %v4791_v1 = vpop.f32.mrb[11].mxu1 }
 0x4b5   : > { %v4792_v12 = vadd.f32 %v4791_v1, %v4790_v39 }
 0x4b7   : > { %v3461_v20 = vadd.f32 %v4792_v12, %v3357_v63 }
 0x4b9   : > { %v8620_v37 = vand.u32 4294901760, %v3461_v20 }
 0x4bb   : > { %v3569_v44 = vsub.f32 %v3461_v20, %v8620_v37 }
 0x4bd   : > { %v3570_v61 = vand.u32 4294901760, %v3569_v44 }
 0x4bf   : > { %v3571_v47 = vsub.f32 %v3569_v44, %v3570_v61 }
 0x4c1   : > { %v3572_v28 = vand.u32 4294901760, %v3571_v47 }
 0x4c3   : > { %5408 = vmatmul.mubr.f32.vlgmr.msra.gmra.mrb[12].mxu1 %v3572_v28 }
 0x4c4   : > { %5995 = vmatpush3.bf16.msra.mxu1 %v8547_v57  ;;  %5442 = vmatprep.mubr.msk.f32.mxu1 %vm6624_vm0, %v6625_v43  ;;  %v6066_v57 = vpack.c.bf16 %v3588_v2, %v3581_v55  ;;  %v6078_v55 = vpack.c.bf16 %v9384_v60, %v9383_v42  ;;  %v6081_v2 = vpack.c.bf16 %v9386_v40, %v9385_v14 }
 0x4c5   : > { %5996 = vmatprep.subr.bf16.mxu1 %v6623_v52 }
 0x4c8   : > { %5998 = vmatpush3.bf16.msra.mxu1 %v8553_v21  ;;  %v6069_v21 = vpack.c.bf16 %v3602_v32, %v3595_v0  ;;  %v6084_v0 = vpack.c.bf16 %v9388_v23, %v9387_v13  ;;  %v6087_v32 = vpack.c.bf16 %v9390_v10, %v9389_v8 }
 0x4c9   : > { %5999 = vmatprep.subr.bf16.mxu1 %v6623_v52 }
 0x4cc   : > { %6001 = vmatpush3.bf16.msra.mxu1 %v8569_v53 }
 0x4cd   : > { %6002 = vmatprep.subr.bf16.mxu1 %v6623_v52 }
 0x4d0   : > { %6004 = vmatpush3.bf16.msra.mxu1 %v6003_v27 }
 0x4d1   : > { %6005 = vmatprep.subr.bf16.mxu1 %v6623_v52 }
 0x4d4   : > { %6007 = vmatpush3.bf16.msra.mxu1 %v6006_v6 }
 0x4d5   : > { %6008 = vmatprep.subr.bf16.mxu1 %v6623_v52 }
 0x4d8   : > { %6010 = vmatpush3.bf16.msra.mxu1 %v6009_v25 }
 0x4d9   : > { %6011 = vmatprep.subr.bf16.mxu1 %v6623_v52 }
 0x4dc   : > { %6013 = vmatpush3.bf16.msra.mxu1 %v6012_v48 }
 0x4dd   : > { %6014 = vmatprep.subr.bf16.mxu1 %v6623_v52 }
 0x4e0   : > { %6016 = vmatpush3.bf16.msra.mxu1 %v6015_v19 }
 0x4e1   : > { %6017 = vmatprep.subr.bf16.mxu1 %v6623_v52 }
 0x4e3   : > { %5443 = vmatmul.mubr.f32.vlgmr.msra.gmra.mrb[12].mxu1 %v8620_v37 }
 0x4e4   : > { %6019 = vmatpush3.bf16.msra.mxu1 %v6018_v9  ;;  %5477 = vmatprep.mubr.msk.f32.mxu1 %vm6624_vm0, %v6625_v43 }
 0x4e5   : > { %6020 = vmatprep.subr.bf16.mxu1 %v6623_v52 }
 0x4e8   : > { %6022 = vmatpush3.bf16.msra.mxu1 %v6021_v3 }
 0x4e9   : > { %6023 = vmatprep.subr.bf16.mxu1 %v6623_v52 }
 0x4ec   : > { %6025 = vmatpush3.bf16.msra.mxu1 %v6024_v58 }
 0x4ed   : > { %6026 = vmatprep.subr.bf16.mxu1 %v6623_v52 }
 0x4f0   : > { %6028 = vmatpush3.bf16.msra.mxu1 %v6027_v26 }
 0x4f1   : > { %6029 = vmatprep.subr.bf16.mxu1 %v6623_v52 }
 0x4f4   : > { %6031 = vmatpush3.bf16.msra.mxu1 %v6030_v30 }
 0x4f5   : > { %6032 = vmatprep.subr.bf16.mxu1 %v6623_v52 }
 0x4f8   : > { %6034 = vmatpush3.bf16.msra.mxu1 %v6033_v29 }
 0x4f9   : > { %6035 = vmatprep.subr.bf16.mxu1 %v6623_v52 }
 0x4fc   : > { %6037 = vmatpush3.bf16.msra.mxu1 %v6036_v17 }
 0x4fd   : > { %6038 = vmatprep.subr.bf16.mxu1 %v6623_v52 }
 0x500   : > { %6040 = vmatpush3.bf16.msra.mxu1 %v6039_v36 }
 0x501   : > { %6041 = vmatprep.subr.bf16.mxu1 %v6623_v52 }
 0x503   : > { %5478 = vmatmul.mubr.f32.vlgmr.msra.gmra.mrb[12].mxu1 %v3569_v44 }
 0x504   : > { %6043 = vmatpush3.bf16.msra.mxu1 %v8465_v49  ;;  %5512 = vmatprep.mubr.msk.f32.mxu1 %vm6624_vm0, %v6625_v43 }
 0x505   : > { %6044 = vmatprep.subr.bf16.mxu1 %v6623_v52 }
 0x508   : > { %6046 = vmatpush3.bf16.msra.mxu1 %v8478_v35 }
 0x509   : > { %6047 = vmatprep.subr.bf16.mxu1 %v6623_v52 }
 0x50c   : > { %6049 = vmatpush3.bf16.msra.mxu1 %v8488_v34 }
 0x50d   : > { %6050 = vmatprep.subr.bf16.mxu1 %v6623_v52 }
 0x510   : > { %6052 = vmatpush3.bf16.msra.mxu1 %v8492_v22 }
 0x511   : > { %6053 = vmatprep.subr.bf16.mxu1 %v6623_v52 }
 0x514   : > { %6055 = vmatpush3.bf16.msra.mxu1 %v8497_v38 }
 0x515   : > { %6056 = vmatprep.subr.bf16.mxu1 %v6623_v52 }
 0x518   : > { %6058 = vmatpush3.bf16.msra.mxu1 %v8509_v56 }
 0x519   : > { %6059 = vmatprep.subr.bf16.mxu1 %v6623_v52 }
 0x51c   : > { %6061 = vmatpush3.bf16.msra.mxu1 %v8522_v46 }
 0x51d   : > { %6062 = vmatprep.subr.bf16.mxu1 %v6623_v52 }
 0x520   : > { %6064 = vmatpush3.bf16.msra.mxu1 %v8538_v41 }
 0x521   : > { %6065 = vmatprep.subr.bf16.mxu1 %v6623_v52 }
 0x523   : > { %5513 = vmatmul.mubr.f32.vlgmr.msra.gmra.mrb[12].mxu1 %v3570_v61 }
 0x524   : > { %6067 = vmatpush3.bf16.msra.mxu1 %v6066_v57  ;;  %5547 = vmatprep.mubr.msk.f32.mxu1 %vm6624_vm0, %v6625_v43 }
 0x525   : > { %6068 = vmatprep.subr.bf16.mxu1 %v6623_v52 }
 0x528   : > { %6070 = vmatpush3.bf16.msra.mxu1 %v6069_v21 }
 0x529   : > { %6071 = vmatprep.subr.bf16.mxu1 %v6623_v52 }
 0x52c   : > { %6073 = vmatpush3.bf16.msra.mxu1 %v6072_v7 }
 0x52d   : > { %6074 = vmatprep.subr.bf16.mxu1 %v6623_v52 }
 0x530   : > { %6076 = vmatpush3.bf16.msra.mxu1 %v6075_v50 }
 0x531   : > { %6077 = vmatprep.subr.bf16.mxu1 %v6623_v52 }
 0x534   : > { %6079 = vmatpush3.bf16.msra.mxu1 %v6078_v55 }
 0x535   : > { %6080 = vmatprep.subr.bf16.mxu1 %v6623_v52 }
 0x538   : > { %6082 = vmatpush3.bf16.msra.mxu1 %v6081_v2 }
 0x539   : > { %6083 = vmatprep.subr.bf16.mxu1 %v6623_v52 }
 0x53c   : > { %6085 = vmatpush3.bf16.msra.mxu1 %v6084_v0 }
 0x53d   : > { %6086 = vmatprep.subr.bf16.mxu1 %v6623_v52 }
 0x540   : > { %6088 = vmatpush3.bf16.msra.mxu1 %v6087_v32 }
 0x541   : > { %6089 = vmatprep.subr.bf16.mxu1 %v6623_v52 }
 0x543   : > { %5548 = vmatmul.mubr.f32.vlgmr.msra.gmra.mrb[12].mxu1 %v8620_v37 }
 0x544   : > { %6091 = vmatpush3.bf16.msra.mxu1 %v8465_v49  ;;  %5582 = vmatprep.mubr.msk.f32.mxu1 %vm6624_vm0, %v6625_v43  ;;  %v4288_v49 = vld [vmem:[%s8785_s7] ss:$0 sm:$0xff] }
 0x545   : > { %6092 = vmatprep.subr.bf16.mxu1 %v6623_v52 }
 0x548   : > { %6094 = vmatpush3.bf16.msra.mxu1 %v8478_v35 }
 0x549   : > { %6095 = vmatprep.subr.bf16.mxu1 %v6623_v52 }
 0x54c   : > { %6097 = vmatpush3.bf16.msra.mxu1 %v8488_v34 }
 0x54d   : > { %6098 = vmatprep.subr.bf16.mxu1 %v6623_v52 }
 0x550   : > { %6100 = vmatpush3.bf16.msra.mxu1 %v8492_v22 }
 0x551   : > { %6101 = vmatprep.subr.bf16.mxu1 %v6623_v52 }
 0x554   : > { %6103 = vmatpush3.bf16.msra.mxu1 %v8497_v38 }
 0x555   : > { %6104 = vmatprep.subr.bf16.mxu1 %v6623_v52 }
 0x558   : > { %6106 = vmatpush3.bf16.msra.mxu1 %v8509_v56 }
 0x559   : > { %6107 = vmatprep.subr.bf16.mxu1 %v6623_v52 }
 0x55c   : > { %6109 = vmatpush3.bf16.msra.mxu1 %v8522_v46 }
 0x55d   : > { %6110 = vmatprep.subr.bf16.mxu1 %v6623_v52 }
 0x560   : > { %6112 = vmatpush3.bf16.msra.mxu1 %v8538_v41 }
 0x563   : > { %5583 = vmatmul.mubr.f32.vlgmr.msra.gmra.mrb[12].mxu1 %v8620_v37 }
 0x636   : > { %v4124_v35 = vpop.f32.mrb[12].mxu1 }
 0x637   : > { %v6145_v34 = vadd.f32 %v4288_v49, %v4124_v35  ;;  %v5584_v22 = vpop.f32.mrb[13].mxu1 }
 0x639   : > { %4128 = vst [vmem:[%s404_s1] sm:$0xff] %v6145_v34 }
 0x63a   : > { %6545 = shalt.err (!%p6542_p3)
}
 0x63b   : > { %s6546_s20 = scalar_lea.hbm %s8734_s13, 128  ;;  %s6550_s27 = scalar_lea.hbm %s8786_s8, 256 }
 0x63c   : > { %p6547_p7 = scmp.ne.s32.totalorder %s8734_s13, %s6546_s20  ;;  %p6551_p10 = scmp.lt.u32.totalorder %s8734_s13, %s8786_s8 }
 0x63d   : > { %p6552_p5 = scmp.lt.u32.totalorder %s6550_s27, %s6546_s20  ;;  %p6554_p9 = scmp.lt.u32.totalorder %s6546_s20, %s8734_s13 }
 0x63e   : > { %p6548_p11 = pnand %p6547_p7, %p9391_p12 }
 0x63f   : > { %p6553_p13 = por %p6552_p5, %p6551_p10 }
 0x640   : > { %p6549_p8 = pneg %p6548_p11 }
 0x641   : > { %p6555_p4 = por %p6554_p9, %p6553_p13 }
 0x643   : > { %p6556_p6 = pnand %p6555_p4, %p6549_p8 }
 0x645   : > { %6559 = shalt.err (!%p6556_p6)
}
 0x646   : > { %6332 = dma.vmem_to_hbm [thread:$0]  (%p9391_p12), %s8736_s15, 128, %s8734_s13, %s4130_s26  }
 0x647 PF: > { %s9392_s25 = sld [smem:[#allocation19_spill]]  ;;  %s9393_s3 = sld [smem:[#allocation20_spill]] }
 0x648   : > { %p9395_p1 = scmp.ge.s32.totalorder %s6614_s30, 2 }
 0x64d   : > { %s4155_s18 = sand.u32 1, %s9392_s25   ;;  %p9394_p0 = scmp.ne.s32.totalorder %s9393_s3, 0 }
 0x64e   : > { %s4156_s23 = scalar_lea.sflag [#allocation4], %s4155_s18 }
 0x64f   : > { %p6352_p2 = pnand %p9395_p1, %p9394_p0 }
 0x651   : > { %6597 = dma.done.wait (!%p6352_p2), %s4156_s23, 128  }
 0x652   : > { %6599 = vsyncadd (!%p6352_p2), %s4156_s23, 4294967168  ;;  %s9396_s10 = sld [smem:[#allocation21_spill]]  ;;  %p26_p3 = scmp.ge.s32.totalorder %s6804_s16, 4  }
 0x653   : > { %s9397_s27 = smov %s6606_s28  ;;  %s9398_s28 = smov %s6610_s29 }
 0x654   : > { %s9400_s30 = smov %s6804_s16  ;;  %28 = sbr.rel (!%p26_p3) target bundleno = 14 (0xe), region = 123 }
 0x658   : > { %s9399_s29 = smov %s9396_s10 }
 0x65b   :  { %4161 = vsyncpa [#allocation3], 1 }
 0x65c   :  { %4163 = vsyncpa [#allocation3 + $0x1], 1 }
 0x65d   :  { %4164 = vsyncpa [#allocation8], 1 }
 0x65e   :  { %4166 = vsyncpa [#allocation8 + $0x1], 1 }
 0x65f   :  { %4167 = vsyncpa [#allocation11], 1 }
 0x660   :  { %4168 = vsyncpa [#allocation4], 1 }
 0x661   :  { %4170 = vsyncpa [#allocation4 + $0x1], 1 }
 0x662   :  { %4171 = vsyncpa [#allocation5], 1 }
 0x663   :  { %4173 = vsyncpa [#allocation5 + $0x1], 1 }

</bundles_post_ra>
